<compile_context>
chip_gen: v5e
topology: v5e:2x2
jax: 0.10.0
libtpu: 0.0.40
codegen_flags: <defaults>
</compile_context>

<pallas_src>
import math

import jax
import jax.numpy as jnp
import numpy as np
from jax import lax
from jax.experimental import pallas as pl
from jax.experimental.pallas import tpu as pltpu


# ---------------------------------------------------------------------------
# Pallas kernel
# ---------------------------------------------------------------------------
def _cnres_kernel(
    tar_ref,                                 # SMEM (2, E_pad) int32 (scalar prefetch)
    beta_ref,                                # SMEM (1,) f32
    xi_ref, xj_ref,                          # (Eb, F)  bf16  gathered node features
    x_ref,                                   # (N,  F)  bf16  full node features
    adj_ref,                                 # (N,  N)  f32   adjacency, stays in HBM
    wcn1, bcn1, wcn2, bcn2, wcn3, bcn3,      # xcnlin    (w: bf16, b: f32)
    wr1, br1, wr2, br2, wr3, br3,            # xcnreslin
    wij1, bij1, wij2, bij2,                  # xijlin
    wl1, bl1, wl2t, bl2,                     # lin (wl2t pre-transposed (O_pad, H))
    out_ref,                                 # (O_pad, Eb) f32 — edges on lane axis
    ai_buf, aj_buf,                          # VMEM (Eb, N) f32 scratch
    sem,                                     # DMA semaphores (2,)
):
    f32 = jnp.float32
    bf16 = jnp.bfloat16
    eb = ai_buf.shape[0]
    e0 = pl.program_id(0) * eb

    # ---- issue per-edge adjacency row gathers (manual DMA from HBM) -------
    @pl.loop(0, eb)
    def _(r):
        si = tar_ref[0, e0 + r]
        di = tar_ref[1, e0 + r]
        pltpu.make_async_copy(adj_ref.at[si], ai_buf.at[r], sem.at[0]).start()
        pltpu.make_async_copy(adj_ref.at[di], aj_buf.at[r], sem.at[1]).start()

    def lin(h, w_ref, b_ref):
        return jnp.dot(h.astype(bf16), w_ref[...],
                       preferred_element_type=f32) + b_ref[...]

    def mlp3(h, w1, b1, w2, b2, w3, b3):
        # Linear -> ReLU -> Linear -> ReLU -> Linear (dropout/ln = identity)
        h = jnp.maximum(lin(h, w1, b1), 0.0)
        h = jnp.maximum(lin(h, w2, b2), 0.0)
        return lin(h, w3, b3)

    # ---- xij branch: independent of adjacency -> hides gather DMA latency --
    xij_in = xi_ref[...] * xj_ref[...]                       # bf16
    h_ij = jnp.maximum(lin(xij_in, wij1, bij1), 0.0)
    h_ij = lin(h_ij, wij2, bij2)                             # (Eb, H) f32

    # ---- wait for all gathered rows ----------------------------------------
    @pl.loop(0, eb)
    def _(r):
        pltpu.make_async_copy(adj_ref.at[0], ai_buf.at[0], sem.at[0]).wait()
        pltpu.make_async_copy(adj_ref.at[0], aj_buf.at[0], sem.at[1]).wait()

    ai = ai_buf[...]
    aj = aj_buf[...]
    cn = ai * aj                                             # exact 0/1 values
    res = ai + aj - 2.0 * cn

    # one fused MXU matmul: (2*Eb, N) @ (N, F); RHS pushed to MXU once
    stacked = jnp.concatenate([cn.astype(bf16), res.astype(bf16)], axis=0)
    xcn = jnp.dot(stacked, x_ref[...], preferred_element_type=f32)
    xcn0 = xcn[:eb]
    xcn1 = xcn[eb:]

    h_cn = mlp3(xcn0, wcn1, bcn1, wcn2, bcn2, wcn3, bcn3)    # xcnlin(xcn0)
    h_res = mlp3(xcn1, wr1, br1, wr2, br2, wr3, br3)         # xcnreslin(xcn1)

    z = h_cn * beta_ref[0] + h_res + h_ij
    z = jnp.maximum(lin(z, wl1, bl1), 0.0)                   # (Eb, H) f32

    # lane-dense store: contract H, edges land on the lane axis -> (O_pad, Eb)
    y = lax.dot_general(wl2t[...], z.astype(bf16),
                        (((1,), (1,)), ((), ())),
                        preferred_element_type=f32) + bl2[...]
    out_ref[...] = y


# ---------------------------------------------------------------------------
# Wrapper
# ---------------------------------------------------------------------------
def cnres_link_predictor(x, adj, tar_ei, params, *, e_blk=128):
    """x: (N, F) float, adj: (N, N) 0/1 float, tar_ei: (2, E) int32."""
    N, F = x.shape
    E = tar_ei.shape[1]
    H = params["wl2"].shape[0]
    O = params["wl2"].shape[1]

    bf16 = jnp.bfloat16
    f32 = jnp.float32

    # pad edge count to a multiple of e_blk (pad indices = 0, rows sliced off)
    E_pad = ((E + e_blk - 1) // e_blk) * e_blk
    # pad the output channels to a sublane multiple for the transposed store
    O_pad = ((O + 7) // 8) * 8

    tar = jnp.asarray(tar_ei, jnp.int32)
    if E_pad != E:
        tar = jnp.concatenate([tar, jnp.zeros((2, E_pad - E), jnp.int32)], axis=1)

    xb = x.astype(bf16)                        # bf16 operands, f32 accumulation
    adj32 = adj.astype(f32)                    # gathered in-kernel, row by row

    src, dst = tar[0], tar[1]
    xi = xb[src]                               # (E_pad, F) — tiny edge-feature gather
    xj = xb[dst]

    def w(name):
        return params[name].astype(bf16)

    def b(name):
        return params[name].astype(f32)

    # final layer: pre-transposed + zero-padded so the kernel can emit (O_pad, Eb)
    wl2t = jnp.zeros((O_pad, H), bf16).at[:O, :].set(params["wl2"].T.astype(bf16))
    bl2 = jnp.zeros((O_pad, 1), f32).at[:O, 0].set(params["bl2"].reshape(-1).astype(f32))

    weight_args = [
        w("wcn1"), b("bcn1"), w("wcn2"), b("bcn2"), w("wcn3"), b("bcn3"),
        w("wr1"), b("br1"), w("wr2"), b("br2"), w("wr3"), b("br3"),
        w("wij1"), b("bij1"), w("wij2"), b("bij2"),
        w("wl1"), b("bl1"), wl2t, bl2,
    ]

    def full_spec(a):
        return pl.BlockSpec(a.shape, lambda e, tar: (0,) * a.ndim)

    def edge_spec(d):
        return pl.BlockSpec((e_blk, d), lambda e, tar: (e, 0))

    in_specs = [
        pl.BlockSpec(memory_space=pltpu.SMEM),      # beta
        edge_spec(F), edge_spec(F),                 # xi, xj
        full_spec(xb),                              # x resident in VMEM
        pl.BlockSpec(memory_space=pl.ANY),          # adj stays in HBM
    ] + [full_spec(a) for a in weight_args]

    out = pl.pallas_call(
        _cnres_kernel,
        out_shape=jax.ShapeDtypeStruct((O_pad, E_pad), f32),
        grid_spec=pltpu.PrefetchScalarGridSpec(
            num_scalar_prefetch=1,                  # tar (src/dst) -> SMEM
            grid=(E_pad // e_blk,),
            in_specs=in_specs,
            out_specs=pl.BlockSpec((O_pad, e_blk), lambda e, tar: (0, e)),
            scratch_shapes=[
                pltpu.VMEM((e_blk, N), f32),        # gathered A[src] rows
                pltpu.VMEM((e_blk, N), f32),        # gathered A[dst] rows
                pltpu.SemaphoreType.DMA((2,)),
            ],
        ),
        compiler_params=pltpu.CompilerParams(
            dimension_semantics=("parallel",),      # shards edge blocks across TCs
            vmem_limit_bytes=32 * 1024 * 1024,
        ),
    )(tar, params["beta"].astype(f32), xi, xj, xb, adj32, *weight_args)

    return out.T[:E, :O]


# ---------------------------------------------------------------------------
# Deterministic parameter construction (PyTorch-Linear-style uniform init)
# ---------------------------------------------------------------------------
def make_params(key, in_channels, hidden, out_channels):
    def linear(key, fan_in, fan_out):
        kw, kb = jax.random.split(key)
        bound = 1.0 / math.sqrt(fan_in)
        w = jax.random.uniform(kw, (fan_in, fan_out), jnp.float32, -bound, bound)
        b = jax.random.uniform(kb, (1, fan_out), jnp.float32, -bound, bound)
        return w, b

    keys = jax.random.split(key, 10)
    p = {}
    p["wcn1"], p["bcn1"] = linear(keys[0], in_channels, hidden)
    p["wcn2"], p["bcn2"] = linear(keys[1], hidden, hidden)
    p["wcn3"], p["bcn3"] = linear(keys[2], hidden, hidden)
    p["wr1"], p["br1"] = linear(keys[3], in_channels, hidden)
    p["wr2"], p["br2"] = linear(keys[4], hidden, hidden)
    p["wr3"], p["br3"] = linear(keys[5], hidden, hidden)
    p["wij1"], p["bij1"] = linear(keys[6], in_channels, hidden)
    p["wij2"], p["bij2"] = linear(keys[7], hidden, hidden)
    p["wl1"], p["bl1"] = linear(keys[8], hidden, hidden)
    p["wl2"], p["bl2"] = linear(keys[9], hidden, out_channels)
    p["beta"] = jnp.ones((1,), jnp.float32)      # nn.Parameter(beta * ones(1)), beta=1
    return p


# Pure-JAX reference with matching bf16-operand / f32-accumulation precision.
def reference(x, adj, tar_ei, p):
    bf16, f32 = jnp.bfloat16, jnp.float32
    src, dst = tar_ei[0], tar_ei[1]
    xb = x.astype(bf16)
    xi, xj = xb[src], xb[dst]
    ai, aj = adj[src].astype(f32), adj[dst].astype(f32)
    cn = ai * aj
    res = ai + aj - 2.0 * cn
    xcn0 = jnp.dot(cn.astype(bf16), xb, preferred_element_type=f32)
    xcn1 = jnp.dot(res.astype(bf16), xb, preferred_element_type=f32)

    relu = lambda v: jnp.maximum(v, 0.0)

    def lin(h, wn, bn):
        return jnp.dot(h.astype(bf16), p[wn].astype(bf16),
                       preferred_element_type=f32) + p[bn].astype(f32)

    h_cn = lin(relu(lin(relu(lin(xcn0, "wcn1", "bcn1")), "wcn2", "bcn2")), "wcn3", "bcn3")
    h_res = lin(relu(lin(relu(lin(xcn1, "wr1", "br1")), "wr2", "br2")), "wr3", "br3")
    h_ij = lin(relu(lin(xi * xj, "wij1", "bij1")), "wij2", "bij2")
    z = h_cn * p["beta"][0] + h_res + h_ij
    return lin(relu(lin(z, "wl1", "bl1")), "wl2", "bl2")


if __name__ == "__main__":
    N, IN_C, HID, OUT_C, E = 256, 128, 128, 8, 200   # E=200 exercises tail padding

    key = jax.random.PRNGKey(0)
    k_x, k_a, k_e, k_p = jax.random.split(key, 4)

    x = jax.random.normal(k_x, (N, IN_C), jnp.float32)
    a = (jax.random.uniform(k_a, (N, N)) < 0.1).astype(jnp.float32)
    a = jnp.maximum(a, a.T)                             # symmetric
    a = a * (1.0 - jnp.eye(N, dtype=jnp.float32))       # no self loops
    tar_ei = jax.random.randint(k_e, (2, E), 0, N, jnp.int32)

    params = make_params(k_p, IN_C, HID, OUT_C)

    out = cnres_link_predictor(x, a, tar_ei, params, e_blk=128)
    out = jax.block_until_ready(out)

    ref = reference(x, a, tar_ei, params)
    np.testing.assert_allclose(np.asarray(out), np.asarray(ref), rtol=1e-2, atol=1e-2)

    print("KERNEL_OK")
</pallas_src>

<mosaic_0001>
module attributes {stable_mosaic.version = 11 : i64} {
  func.func @_cnres_kernel(%arg0: i32, %arg1: memref<2x256xi32, #tpu.memory_space<smem>>, %arg2: memref<1xf32, #tpu.memory_space<smem>>, %arg3: memref<128x128xbf16, #tpu.memory_space<vmem>>, %arg4: memref<128x128xbf16, #tpu.memory_space<vmem>>, %arg5: memref<256x128xbf16, #tpu.memory_space<vmem>>, %arg6: memref<256x256xf32, #tpu.memory_space<any>>, %arg7: memref<128x128xbf16, #tpu.memory_space<vmem>>, %arg8: memref<1x128xf32, #tpu.memory_space<vmem>>, %arg9: memref<128x128xbf16, #tpu.memory_space<vmem>>, %arg10: memref<1x128xf32, #tpu.memory_space<vmem>>, %arg11: memref<128x128xbf16, #tpu.memory_space<vmem>>, %arg12: memref<1x128xf32, #tpu.memory_space<vmem>>, %arg13: memref<128x128xbf16, #tpu.memory_space<vmem>>, %arg14: memref<1x128xf32, #tpu.memory_space<vmem>>, %arg15: memref<128x128xbf16, #tpu.memory_space<vmem>>, %arg16: memref<1x128xf32, #tpu.memory_space<vmem>>, %arg17: memref<128x128xbf16, #tpu.memory_space<vmem>>, %arg18: memref<1x128xf32, #tpu.memory_space<vmem>>, %arg19: memref<128x128xbf16, #tpu.memory_space<vmem>>, %arg20: memref<1x128xf32, #tpu.memory_space<vmem>>, %arg21: memref<128x128xbf16, #tpu.memory_space<vmem>>, %arg22: memref<1x128xf32, #tpu.memory_space<vmem>>, %arg23: memref<128x128xbf16, #tpu.memory_space<vmem>>, %arg24: memref<1x128xf32, #tpu.memory_space<vmem>>, %arg25: memref<8x128xbf16, #tpu.memory_space<vmem>>, %arg26: memref<8x1xf32, #tpu.memory_space<vmem>>, %arg27: memref<8x128xf32, #tpu.memory_space<vmem>>, %arg28: memref<128x256xf32, #tpu.memory_space<vmem>>, %arg29: memref<128x256xf32, #tpu.memory_space<vmem>>, %arg30: memref<2x!tpu.dma_semaphore, #tpu.memory_space<semaphore_mem>>) attributes {dimension_semantics = [#tpu.dimension_semantics<parallel>], iteration_bounds = array<i64: 2>, scalar_prefetch = 1 : i64, scratch_operands = 3 : i64, tpu.core_type = #tpu.core_type<tc>, window_params = [{transform_indices = @transform_0, window_bounds = array<i64: 1>}, {transform_indices = @transform_1, window_bounds = array<i64: 128, 128>}, {transform_indices = @transform_2, window_bounds = array<i64: 128, 128>}, {pipeline_mode = #tpu.pipeline_mode<synchronous>, transform_indices = @transform_3, window_bounds = array<i64: 256, 128>}, {}, {pipeline_mode = #tpu.pipeline_mode<synchronous>, transform_indices = @transform_5, window_bounds = array<i64: 128, 128>}, {pipeline_mode = #tpu.pipeline_mode<synchronous>, transform_indices = @transform_6, window_bounds = array<i64: 1, 128>}, {pipeline_mode = #tpu.pipeline_mode<synchronous>, transform_indices = @transform_7, window_bounds = array<i64: 128, 128>}, {pipeline_mode = #tpu.pipeline_mode<synchronous>, transform_indices = @transform_8, window_bounds = array<i64: 1, 128>}, {pipeline_mode = #tpu.pipeline_mode<synchronous>, transform_indices = @transform_9, window_bounds = array<i64: 128, 128>}, {pipeline_mode = #tpu.pipeline_mode<synchronous>, transform_indices = @transform_10, window_bounds = array<i64: 1, 128>}, {pipeline_mode = #tpu.pipeline_mode<synchronous>, transform_indices = @transform_11, window_bounds = array<i64: 128, 128>}, {pipeline_mode = #tpu.pipeline_mode<synchronous>, transform_indices = @transform_12, window_bounds = array<i64: 1, 128>}, {pipeline_mode = #tpu.pipeline_mode<synchronous>, transform_indices = @transform_13, window_bounds = array<i64: 128, 128>}, {pipeline_mode = #tpu.pipeline_mode<synchronous>, transform_indices = @transform_14, window_bounds = array<i64: 1, 128>}, {pipeline_mode = #tpu.pipeline_mode<synchronous>, transform_indices = @transform_15, window_bounds = array<i64: 128, 128>}, {pipeline_mode = #tpu.pipeline_mode<synchronous>, transform_indices = @transform_16, window_bounds = array<i64: 1, 128>}, {pipeline_mode = #tpu.pipeline_mode<synchronous>, transform_indices = @transform_17, window_bounds = array<i64: 128, 128>}, {pipeline_mode = #tpu.pipeline_mode<synchronous>, transform_indices = @transform_18, window_bounds = array<i64: 1, 128>}, {pipeline_mode = #tpu.pipeline_mode<synchronous>, transform_indices = @transform_19, window_bounds = array<i64: 128, 128>}, {pipeline_mode = #tpu.pipeline_mode<synchronous>, transform_indices = @transform_20, window_bounds = array<i64: 1, 128>}, {pipeline_mode = #tpu.pipeline_mode<synchronous>, transform_indices = @transform_21, window_bounds = array<i64: 128, 128>}, {pipeline_mode = #tpu.pipeline_mode<synchronous>, transform_indices = @transform_22, window_bounds = array<i64: 1, 128>}, {pipeline_mode = #tpu.pipeline_mode<synchronous>, transform_indices = @transform_23, window_bounds = array<i64: 8, 128>}, {pipeline_mode = #tpu.pipeline_mode<synchronous>, transform_indices = @transform_24, window_bounds = array<i64: 8, 1>}, {transform_indices = @transform_25, window_bounds = array<i64: 8, 128>}]} {
    %c128_i32 = arith.constant 128 : i32
    %0 = arith.muli %arg0, %c128_i32 : i32
    %c0_i32 = arith.constant 0 : i32
    %c128_i32_0 = arith.constant 128 : i32
    %1 = arith.addi %c0_i32, %c128_i32_0 : i32
    %c1_i32 = arith.constant 1 : i32
    scf.for %arg31 = %c0_i32 to %1 step %c1_i32  : i32 {
      %c1_i32_74 = arith.constant 1 : i32
      %97 = arith.muli %arg31, %c1_i32_74 : i32
      %c0_i32_75 = arith.constant 0 : i32
      %98 = arith.addi %c0_i32_75, %97 : i32
      %99 = arith.addi %0, %98 : i32
      %c0_76 = arith.constant 0 : index
      %100 = arith.index_cast %99 : i32 to index
      %101 = memref.load %arg1[%c0_76, %100] : memref<2x256xi32, #tpu.memory_space<smem>>
      %102 = arith.addi %0, %98 : i32
      %c1 = arith.constant 1 : index
      %103 = arith.index_cast %102 : i32 to index
      %104 = memref.load %arg1[%c1, %103] : memref<2x256xi32, #tpu.memory_space<smem>>
      %c0_i32_77 = arith.constant 0 : i32
      %c0_i32_78 = arith.constant 0 : i32
      %105 = tpu.memref_slice %arg6[%101, %c0_i32_78] : memref<256x256xf32, #tpu.memory_space<any>> -> memref<1x256xf32, #tpu.memory_space<any>>
      %106 = tpu.memref_squeeze %105 : memref<1x256xf32, #tpu.memory_space<any>> -> memref<256xf32, #tpu.memory_space<any>>
      %c0_i32_79 = arith.constant 0 : i32
      %107 = tpu.memref_slice %arg28[%98, %c0_i32_79] : memref<128x256xf32, #tpu.memory_space<vmem>> -> memref<1x256xf32, #tpu.memory_space<vmem>>
      %108 = tpu.memref_squeeze %107 : memref<1x256xf32, #tpu.memory_space<vmem>> -> memref<256xf32, #tpu.memory_space<vmem>>
      %109 = tpu.memref_slice %arg30[%c0_i32_77] : memref<2x!tpu.dma_semaphore, #tpu.memory_space<semaphore_mem>> -> memref<1x!tpu.dma_semaphore, #tpu.memory_space<semaphore_mem>>
      %110 = tpu.memref_squeeze %109 : memref<1x!tpu.dma_semaphore, #tpu.memory_space<semaphore_mem>> -> memref<!tpu.dma_semaphore, #tpu.memory_space<semaphore_mem>>
      tpu.enqueue_dma source(%106 : memref<256xf32, #tpu.memory_space<any>>) target(%108 : memref<256xf32, #tpu.memory_space<vmem>>) target_semaphore(%110 : memref<!tpu.dma_semaphore, #tpu.memory_space<semaphore_mem>>)
      %c1_i32_80 = arith.constant 1 : i32
      %c0_i32_81 = arith.constant 0 : i32
      %111 = tpu.memref_slice %arg6[%104, %c0_i32_81] : memref<256x256xf32, #tpu.memory_space<any>> -> memref<1x256xf32, #tpu.memory_space<any>>
      %112 = tpu.memref_squeeze %111 : memref<1x256xf32, #tpu.memory_space<any>> -> memref<256xf32, #tpu.memory_space<any>>
      %c0_i32_82 = arith.constant 0 : i32
      %113 = tpu.memref_slice %arg29[%98, %c0_i32_82] : memref<128x256xf32, #tpu.memory_space<vmem>> -> memref<1x256xf32, #tpu.memory_space<vmem>>
      %114 = tpu.memref_squeeze %113 : memref<1x256xf32, #tpu.memory_space<vmem>> -> memref<256xf32, #tpu.memory_space<vmem>>
      %115 = tpu.memref_slice %arg30[%c1_i32_80] : memref<2x!tpu.dma_semaphore, #tpu.memory_space<semaphore_mem>> -> memref<1x!tpu.dma_semaphore, #tpu.memory_space<semaphore_mem>>
      %116 = tpu.memref_squeeze %115 : memref<1x!tpu.dma_semaphore, #tpu.memory_space<semaphore_mem>> -> memref<!tpu.dma_semaphore, #tpu.memory_space<semaphore_mem>>
      tpu.enqueue_dma source(%112 : memref<256xf32, #tpu.memory_space<any>>) target(%114 : memref<256xf32, #tpu.memory_space<vmem>>) target_semaphore(%116 : memref<!tpu.dma_semaphore, #tpu.memory_space<semaphore_mem>>)
    }
    %c128_i32_1 = arith.constant 128 : i32
    %c0 = arith.constant 0 : index
    %c0_2 = arith.constant 0 : index
    %2 = vector.load %arg3[%c0, %c0_2] : memref<128x128xbf16, #tpu.memory_space<vmem>>, vector<128x128xbf16>
    %c0_3 = arith.constant 0 : index
    %c0_4 = arith.constant 0 : index
    %3 = vector.load %arg4[%c0_3, %c0_4] : memref<128x128xbf16, #tpu.memory_space<vmem>>, vector<128x128xbf16>
    %4 = arith.mulf %2, %3 : vector<128x128xbf16>
    %c0_5 = arith.constant 0 : index
    %c0_6 = arith.constant 0 : index
    %5 = vector.load %arg19[%c0_5, %c0_6] : memref<128x128xbf16, #tpu.memory_space<vmem>>, vector<128x128xbf16>
    %cst = arith.constant dense<0.000000e+00> : vector<128x128xf32>
    %6 = tpu.matmul %4, %5, %cst {dimension_numbers = #tpu.dot_dimension_numbers<[1], [0], [0], [1], [0, 0, 1, 1], [], []>} : vector<128x128xbf16>, vector<128x128xbf16>, vector<128x128xf32> -> vector<128x128xf32>
    %c0_7 = arith.constant 0 : index
    %c0_8 = arith.constant 0 : index
    %7 = vector.load %arg20[%c0_7, %c0_8] : memref<1x128xf32, #tpu.memory_space<vmem>>, vector<1x128xf32>
    %8 = vector.broadcast %7 : vector<1x128xf32> to vector<128x128xf32>
    %9 = arith.addf %6, %8 : vector<128x128xf32>
    %cst_9 = arith.constant 0.000000e+00 : f32
    %10 = vector.broadcast %cst_9 : f32 to vector<128x128xf32>
    %11 = arith.maximumf %9, %10 : vector<128x128xf32>
    %12 = arith.truncf %11 : vector<128x128xf32> to vector<128x128xbf16>
    %c0_10 = arith.constant 0 : index
    %c0_11 = arith.constant 0 : index
    %13 = vector.load %arg21[%c0_10, %c0_11] : memref<128x128xbf16, #tpu.memory_space<vmem>>, vector<128x128xbf16>
    %cst_12 = arith.constant dense<0.000000e+00> : vector<128x128xf32>
    %14 = tpu.matmul %12, %13, %cst_12 {dimension_numbers = #tpu.dot_dimension_numbers<[1], [0], [0], [1], [0, 0, 1, 1], [], []>} : vector<128x128xbf16>, vector<128x128xbf16>, vector<128x128xf32> -> vector<128x128xf32>
    %c0_13 = arith.constant 0 : index
    %c0_14 = arith.constant 0 : index
    %15 = vector.load %arg22[%c0_13, %c0_14] : memref<1x128xf32, #tpu.memory_space<vmem>>, vector<1x128xf32>
    %16 = vector.broadcast %15 : vector<1x128xf32> to vector<128x128xf32>
    %17 = arith.addf %14, %16 : vector<128x128xf32>
    %c0_i32_15 = arith.constant 0 : i32
    %c128_i32_16 = arith.constant 128 : i32
    %18 = arith.addi %c0_i32_15, %c128_i32_16 : i32
    %c1_i32_17 = arith.constant 1 : i32
    scf.for %arg31 = %c0_i32_15 to %18 step %c1_i32_17  : i32 {
      %c0_i32_74 = arith.constant 0 : i32
      %c0_i32_75 = arith.constant 0 : i32
      %c0_i32_76 = arith.constant 0 : i32
      %c0_i32_77 = arith.constant 0 : i32
      %97 = tpu.memref_slice %arg6[%c0_i32_74, %c0_i32_77] : memref<256x256xf32, #tpu.memory_space<any>> -> memref<1x256xf32, #tpu.memory_space<any>>
      %98 = tpu.memref_squeeze %97 : memref<1x256xf32, #tpu.memory_space<any>> -> memref<256xf32, #tpu.memory_space<any>>
      %c0_i32_78 = arith.constant 0 : i32
      %99 = tpu.memref_slice %arg28[%c0_i32_75, %c0_i32_78] : memref<128x256xf32, #tpu.memory_space<vmem>> -> memref<1x256xf32, #tpu.memory_space<vmem>>
      %100 = tpu.memref_squeeze %99 : memref<1x256xf32, #tpu.memory_space<vmem>> -> memref<256xf32, #tpu.memory_space<vmem>>
      %101 = tpu.memref_slice %arg30[%c0_i32_76] : memref<2x!tpu.dma_semaphore, #tpu.memory_space<semaphore_mem>> -> memref<1x!tpu.dma_semaphore, #tpu.memory_space<semaphore_mem>>
      %102 = tpu.memref_squeeze %101 : memref<1x!tpu.dma_semaphore, #tpu.memory_space<semaphore_mem>> -> memref<!tpu.dma_semaphore, #tpu.memory_space<semaphore_mem>>
      tpu.wait_dma2 semaphore(%102 : memref<!tpu.dma_semaphore, #tpu.memory_space<semaphore_mem>>) src(%98 : memref<256xf32, #tpu.memory_space<any>>) dst(%100 : memref<256xf32, #tpu.memory_space<vmem>>)
      %c0_i32_79 = arith.constant 0 : i32
      %c0_i32_80 = arith.constant 0 : i32
      %c1_i32_81 = arith.constant 1 : i32
      %c0_i32_82 = arith.constant 0 : i32
      %103 = tpu.memref_slice %arg6[%c0_i32_79, %c0_i32_82] : memref<256x256xf32, #tpu.memory_space<any>> -> memref<1x256xf32, #tpu.memory_space<any>>
      %104 = tpu.memref_squeeze %103 : memref<1x256xf32, #tpu.memory_space<any>> -> memref<256xf32, #tpu.memory_space<any>>
      %c0_i32_83 = arith.constant 0 : i32
      %105 = tpu.memref_slice %arg29[%c0_i32_80, %c0_i32_83] : memref<128x256xf32, #tpu.memory_space<vmem>> -> memref<1x256xf32, #tpu.memory_space<vmem>>
      %106 = tpu.memref_squeeze %105 : memref<1x256xf32, #tpu.memory_space<vmem>> -> memref<256xf32, #tpu.memory_space<vmem>>
      %107 = tpu.memref_slice %arg30[%c1_i32_81] : memref<2x!tpu.dma_semaphore, #tpu.memory_space<semaphore_mem>> -> memref<1x!tpu.dma_semaphore, #tpu.memory_space<semaphore_mem>>
      %108 = tpu.memref_squeeze %107 : memref<1x!tpu.dma_semaphore, #tpu.memory_space<semaphore_mem>> -> memref<!tpu.dma_semaphore, #tpu.memory_space<semaphore_mem>>
      tpu.wait_dma2 semaphore(%108 : memref<!tpu.dma_semaphore, #tpu.memory_space<semaphore_mem>>) src(%104 : memref<256xf32, #tpu.memory_space<any>>) dst(%106 : memref<256xf32, #tpu.memory_space<vmem>>)
    }
    %c0_18 = arith.constant 0 : index
    %c0_19 = arith.constant 0 : index
    %19 = vector.load %arg28[%c0_18, %c0_19] : memref<128x256xf32, #tpu.memory_space<vmem>>, vector<128x256xf32>
    %c0_20 = arith.constant 0 : index
    %c0_21 = arith.constant 0 : index
    %20 = vector.load %arg29[%c0_20, %c0_21] : memref<128x256xf32, #tpu.memory_space<vmem>>, vector<128x256xf32>
    %21 = arith.mulf %19, %20 : vector<128x256xf32>
    %22 = arith.addf %19, %20 : vector<128x256xf32>
    %cst_22 = arith.constant 2.000000e+00 : f32
    %23 = vector.broadcast %cst_22 : f32 to vector<128x256xf32>
    %24 = arith.mulf %23, %21 : vector<128x256xf32>
    %25 = arith.subf %22, %24 : vector<128x256xf32>
    %26 = arith.truncf %21 : vector<128x256xf32> to vector<128x256xbf16>
    %27 = arith.truncf %25 : vector<128x256xf32> to vector<128x256xbf16>
    %28 = tpu.concatenate %26, %27 in 0 : vector<128x256xbf16>, vector<128x256xbf16> -> vector<256x256xbf16>
    %c0_23 = arith.constant 0 : index
    %c0_24 = arith.constant 0 : index
    %29 = vector.load %arg5[%c0_23, %c0_24] : memref<256x128xbf16, #tpu.memory_space<vmem>>, vector<256x128xbf16>
    %cst_25 = arith.constant dense<0.000000e+00> : vector<256x128xf32>
    %30 = tpu.matmul %28, %29, %cst_25 {dimension_numbers = #tpu.dot_dimension_numbers<[1], [0], [0], [1], [0, 0, 1, 1], [], []>} : vector<256x256xbf16>, vector<256x128xbf16>, vector<256x128xf32> -> vector<256x128xf32>
    %31 = vector.extract_strided_slice %30 {offsets = [0, 0], sizes = [128, 128], strides = [1, 1]} : vector<256x128xf32> to vector<128x128xf32>
    %32 = vector.extract_strided_slice %30 {offsets = [128, 0], sizes = [128, 128], strides = [1, 1]} : vector<256x128xf32> to vector<128x128xf32>
    %33 = arith.truncf %31 : vector<128x128xf32> to vector<128x128xbf16>
    %c0_26 = arith.constant 0 : index
    %c0_27 = arith.constant 0 : index
    %34 = vector.load %arg7[%c0_26, %c0_27] : memref<128x128xbf16, #tpu.memory_space<vmem>>, vector<128x128xbf16>
    %cst_28 = arith.constant dense<0.000000e+00> : vector<128x128xf32>
    %35 = tpu.matmul %33, %34, %cst_28 {dimension_numbers = #tpu.dot_dimension_numbers<[1], [0], [0], [1], [0, 0, 1, 1], [], []>} : vector<128x128xbf16>, vector<128x128xbf16>, vector<128x128xf32> -> vector<128x128xf32>
    %c0_29 = arith.constant 0 : index
    %c0_30 = arith.constant 0 : index
    %36 = vector.load %arg8[%c0_29, %c0_30] : memref<1x128xf32, #tpu.memory_space<vmem>>, vector<1x128xf32>
    %37 = vector.broadcast %36 : vector<1x128xf32> to vector<128x128xf32>
    %38 = arith.addf %35, %37 : vector<128x128xf32>
    %cst_31 = arith.constant 0.000000e+00 : f32
    %39 = vector.broadcast %cst_31 : f32 to vector<128x128xf32>
    %40 = arith.maximumf %38, %39 : vector<128x128xf32>
    %41 = arith.truncf %40 : vector<128x128xf32> to vector<128x128xbf16>
    %c0_32 = arith.constant 0 : index
    %c0_33 = arith.constant 0 : index
    %42 = vector.load %arg9[%c0_32, %c0_33] : memref<128x128xbf16, #tpu.memory_space<vmem>>, vector<128x128xbf16>
    %cst_34 = arith.constant dense<0.000000e+00> : vector<128x128xf32>
    %43 = tpu.matmul %41, %42, %cst_34 {dimension_numbers = #tpu.dot_dimension_numbers<[1], [0], [0], [1], [0, 0, 1, 1], [], []>} : vector<128x128xbf16>, vector<128x128xbf16>, vector<128x128xf32> -> vector<128x128xf32>
    %c0_35 = arith.constant 0 : index
    %c0_36 = arith.constant 0 : index
    %44 = vector.load %arg10[%c0_35, %c0_36] : memref<1x128xf32, #tpu.memory_space<vmem>>, vector<1x128xf32>
    %45 = vector.broadcast %44 : vector<1x128xf32> to vector<128x128xf32>
    %46 = arith.addf %43, %45 : vector<128x128xf32>
    %cst_37 = arith.constant 0.000000e+00 : f32
    %47 = vector.broadcast %cst_37 : f32 to vector<128x128xf32>
    %48 = arith.maximumf %46, %47 : vector<128x128xf32>
    %49 = arith.truncf %48 : vector<128x128xf32> to vector<128x128xbf16>
    %c0_38 = arith.constant 0 : index
    %c0_39 = arith.constant 0 : index
    %50 = vector.load %arg11[%c0_38, %c0_39] : memref<128x128xbf16, #tpu.memory_space<vmem>>, vector<128x128xbf16>
    %cst_40 = arith.constant dense<0.000000e+00> : vector<128x128xf32>
    %51 = tpu.matmul %49, %50, %cst_40 {dimension_numbers = #tpu.dot_dimension_numbers<[1], [0], [0], [1], [0, 0, 1, 1], [], []>} : vector<128x128xbf16>, vector<128x128xbf16>, vector<128x128xf32> -> vector<128x128xf32>
    %c0_41 = arith.constant 0 : index
    %c0_42 = arith.constant 0 : index
    %52 = vector.load %arg12[%c0_41, %c0_42] : memref<1x128xf32, #tpu.memory_space<vmem>>, vector<1x128xf32>
    %53 = vector.broadcast %52 : vector<1x128xf32> to vector<128x128xf32>
    %54 = arith.addf %51, %53 : vector<128x128xf32>
    %55 = arith.truncf %32 : vector<128x128xf32> to vector<128x128xbf16>
    %c0_43 = arith.constant 0 : index
    %c0_44 = arith.constant 0 : index
    %56 = vector.load %arg13[%c0_43, %c0_44] : memref<128x128xbf16, #tpu.memory_space<vmem>>, vector<128x128xbf16>
    %cst_45 = arith.constant dense<0.000000e+00> : vector<128x128xf32>
    %57 = tpu.matmul %55, %56, %cst_45 {dimension_numbers = #tpu.dot_dimension_numbers<[1], [0], [0], [1], [0, 0, 1, 1], [], []>} : vector<128x128xbf16>, vector<128x128xbf16>, vector<128x128xf32> -> vector<128x128xf32>
    %c0_46 = arith.constant 0 : index
    %c0_47 = arith.constant 0 : index
    %58 = vector.load %arg14[%c0_46, %c0_47] : memref<1x128xf32, #tpu.memory_space<vmem>>, vector<1x128xf32>
    %59 = vector.broadcast %58 : vector<1x128xf32> to vector<128x128xf32>
    %60 = arith.addf %57, %59 : vector<128x128xf32>
    %cst_48 = arith.constant 0.000000e+00 : f32
    %61 = vector.broadcast %cst_48 : f32 to vector<128x128xf32>
    %62 = arith.maximumf %60, %61 : vector<128x128xf32>
    %63 = arith.truncf %62 : vector<128x128xf32> to vector<128x128xbf16>
    %c0_49 = arith.constant 0 : index
    %c0_50 = arith.constant 0 : index
    %64 = vector.load %arg15[%c0_49, %c0_50] : memref<128x128xbf16, #tpu.memory_space<vmem>>, vector<128x128xbf16>
    %cst_51 = arith.constant dense<0.000000e+00> : vector<128x128xf32>
    %65 = tpu.matmul %63, %64, %cst_51 {dimension_numbers = #tpu.dot_dimension_numbers<[1], [0], [0], [1], [0, 0, 1, 1], [], []>} : vector<128x128xbf16>, vector<128x128xbf16>, vector<128x128xf32> -> vector<128x128xf32>
    %c0_52 = arith.constant 0 : index
    %c0_53 = arith.constant 0 : index
    %66 = vector.load %arg16[%c0_52, %c0_53] : memref<1x128xf32, #tpu.memory_space<vmem>>, vector<1x128xf32>
    %67 = vector.broadcast %66 : vector<1x128xf32> to vector<128x128xf32>
    %68 = arith.addf %65, %67 : vector<128x128xf32>
    %cst_54 = arith.constant 0.000000e+00 : f32
    %69 = vector.broadcast %cst_54 : f32 to vector<128x128xf32>
    %70 = arith.maximumf %68, %69 : vector<128x128xf32>
    %71 = arith.truncf %70 : vector<128x128xf32> to vector<128x128xbf16>
    %c0_55 = arith.constant 0 : index
    %c0_56 = arith.constant 0 : index
    %72 = vector.load %arg17[%c0_55, %c0_56] : memref<128x128xbf16, #tpu.memory_space<vmem>>, vector<128x128xbf16>
    %cst_57 = arith.constant dense<0.000000e+00> : vector<128x128xf32>
    %73 = tpu.matmul %71, %72, %cst_57 {dimension_numbers = #tpu.dot_dimension_numbers<[1], [0], [0], [1], [0, 0, 1, 1], [], []>} : vector<128x128xbf16>, vector<128x128xbf16>, vector<128x128xf32> -> vector<128x128xf32>
    %c0_58 = arith.constant 0 : index
    %c0_59 = arith.constant 0 : index
    %74 = vector.load %arg18[%c0_58, %c0_59] : memref<1x128xf32, #tpu.memory_space<vmem>>, vector<1x128xf32>
    %75 = vector.broadcast %74 : vector<1x128xf32> to vector<128x128xf32>
    %76 = arith.addf %73, %75 : vector<128x128xf32>
    %c0_60 = arith.constant 0 : index
    %77 = memref.load %arg2[%c0_60] : memref<1xf32, #tpu.memory_space<smem>>
    %78 = vector.broadcast %77 : f32 to vector<128x128xf32>
    %79 = arith.mulf %54, %78 : vector<128x128xf32>
    %80 = arith.addf %79, %76 : vector<128x128xf32>
    %81 = arith.addf %80, %17 : vector<128x128xf32>
    %82 = arith.truncf %81 : vector<128x128xf32> to vector<128x128xbf16>
    %c0_61 = arith.constant 0 : index
    %c0_62 = arith.constant 0 : index
    %83 = vector.load %arg23[%c0_61, %c0_62] : memref<128x128xbf16, #tpu.memory_space<vmem>>, vector<128x128xbf16>
    %cst_63 = arith.constant dense<0.000000e+00> : vector<128x128xf32>
    %84 = tpu.matmul %82, %83, %cst_63 {dimension_numbers = #tpu.dot_dimension_numbers<[1], [0], [0], [1], [0, 0, 1, 1], [], []>} : vector<128x128xbf16>, vector<128x128xbf16>, vector<128x128xf32> -> vector<128x128xf32>
    %c0_64 = arith.constant 0 : index
    %c0_65 = arith.constant 0 : index
    %85 = vector.load %arg24[%c0_64, %c0_65] : memref<1x128xf32, #tpu.memory_space<vmem>>, vector<1x128xf32>
    %86 = vector.broadcast %85 : vector<1x128xf32> to vector<128x128xf32>
    %87 = arith.addf %84, %86 : vector<128x128xf32>
    %cst_66 = arith.constant 0.000000e+00 : f32
    %88 = vector.broadcast %cst_66 : f32 to vector<128x128xf32>
    %89 = arith.maximumf %87, %88 : vector<128x128xf32>
    %c0_67 = arith.constant 0 : index
    %c0_68 = arith.constant 0 : index
    %90 = vector.load %arg25[%c0_67, %c0_68] : memref<8x128xbf16, #tpu.memory_space<vmem>>, vector<8x128xbf16>
    %91 = arith.truncf %89 : vector<128x128xf32> to vector<128x128xbf16>
    %cst_69 = arith.constant dense<0.000000e+00> : vector<8x128xf32>
    %92 = tpu.matmul %90, %91, %cst_69 {dimension_numbers = #tpu.dot_dimension_numbers<[1], [1], [0], [0], [0, 0, 1, 0], [], []>} : vector<8x128xbf16>, vector<128x128xbf16>, vector<8x128xf32> -> vector<8x128xf32>
    %c0_70 = arith.constant 0 : index
    %c0_71 = arith.constant 0 : index
    %93 = vector.load %arg26[%c0_70, %c0_71] : memref<8x1xf32, #tpu.memory_space<vmem>>, vector<8x1xf32>
    %94 = vector.broadcast %93 : vector<8x1xf32> to vector<8x128xf32>
    %95 = arith.addf %92, %94 : vector<8x128xf32>
    %c0_72 = arith.constant 0 : index
    %c0_73 = arith.constant 0 : index
    %96 = vector.load %arg27[%c0_72, %c0_73] : memref<8x128xf32, #tpu.memory_space<vmem>>, vector<8x128xf32>
    tpu.vector_store %arg27[%c0_72, %c0_73], %95 {strides = array<i32>} : memref<8x128xf32, #tpu.memory_space<vmem>>, vector<8x128xf32>,
    return
  }
  func.func @transform_0(%arg0: i32, %arg1: memref<2x256xi32, #tpu.memory_space<smem>>) -> i32 {
    %c0_i32 = arith.constant 0 : i32
    %c0_i32_0 = arith.constant 0 : i32
    return %c0_i32 : i32
  }
  func.func @transform_1(%arg0: i32, %arg1: memref<2x256xi32, #tpu.memory_space<smem>>) -> (i32, i32) {
    %c0_i32 = arith.constant 0 : i32
    %c0_i32_0 = arith.constant 0 : i32
    return %arg0, %c0_i32 : i32, i32
  }
  func.func @transform_2(%arg0: i32, %arg1: memref<2x256xi32, #tpu.memory_space<smem>>) -> (i32, i32) {
    %c0_i32 = arith.constant 0 : i32
    %c0_i32_0 = arith.constant 0 : i32
    return %arg0, %c0_i32 : i32, i32
  }
  func.func @transform_3(%arg0: i32, %arg1: memref<2x256xi32, #tpu.memory_space<smem>>) -> (i32, i32) {
    %c0_i32 = arith.constant 0 : i32
    %c0_i32_0 = arith.constant 0 : i32
    %c0_i32_1 = arith.constant 0 : i32
    return %c0_i32, %c0_i32_0 : i32, i32
  }
  func.func @transform_5(%arg0: i32, %arg1: memref<2x256xi32, #tpu.memory_space<smem>>) -> (i32, i32) {
    %c0_i32 = arith.constant 0 : i32
    %c0_i32_0 = arith.constant 0 : i32
    %c0_i32_1 = arith.constant 0 : i32
    return %c0_i32, %c0_i32_0 : i32, i32
  }
  func.func @transform_6(%arg0: i32, %arg1: memref<2x256xi32, #tpu.memory_space<smem>>) -> (i32, i32) {
    %c0_i32 = arith.constant 0 : i32
    %c0_i32_0 = arith.constant 0 : i32
    %c0_i32_1 = arith.constant 0 : i32
    return %c0_i32, %c0_i32_0 : i32, i32
  }
  func.func @transform_7(%arg0: i32, %arg1: memref<2x256xi32, #tpu.memory_space<smem>>) -> (i32, i32) {
    %c0_i32 = arith.constant 0 : i32
    %c0_i32_0 = arith.constant 0 : i32
    %c0_i32_1 = arith.constant 0 : i32
    return %c0_i32, %c0_i32_0 : i32, i32
  }
  func.func @transform_8(%arg0: i32, %arg1: memref<2x256xi32, #tpu.memory_space<smem>>) -> (i32, i32) {
    %c0_i32 = arith.constant 0 : i32
    %c0_i32_0 = arith.constant 0 : i32
    %c0_i32_1 = arith.constant 0 : i32
    return %c0_i32, %c0_i32_0 : i32, i32
  }
  func.func @transform_9(%arg0: i32, %arg1: memref<2x256xi32, #tpu.memory_space<smem>>) -> (i32, i32) {
    %c0_i32 = arith.constant 0 : i32
    %c0_i32_0 = arith.constant 0 : i32
    %c0_i32_1 = arith.constant 0 : i32
    return %c0_i32, %c0_i32_0 : i32, i32
  }
  func.func @transform_10(%arg0: i32, %arg1: memref<2x256xi32, #tpu.memory_space<smem>>) -> (i32, i32) {
    %c0_i32 = arith.constant 0 : i32
    %c0_i32_0 = arith.constant 0 : i32
    %c0_i32_1 = arith.constant 0 : i32
    return %c0_i32, %c0_i32_0 : i32, i32
  }
  func.func @transform_11(%arg0: i32, %arg1: memref<2x256xi32, #tpu.memory_space<smem>>) -> (i32, i32) {
    %c0_i32 = arith.constant 0 : i32
    %c0_i32_0 = arith.constant 0 : i32
    %c0_i32_1 = arith.constant 0 : i32
    return %c0_i32, %c0_i32_0 : i32, i32
  }
  func.func @transform_12(%arg0: i32, %arg1: memref<2x256xi32, #tpu.memory_space<smem>>) -> (i32, i32) {
    %c0_i32 = arith.constant 0 : i32
    %c0_i32_0 = arith.constant 0 : i32
    %c0_i32_1 = arith.constant 0 : i32
    return %c0_i32, %c0_i32_0 : i32, i32
  }
  func.func @transform_13(%arg0: i32, %arg1: memref<2x256xi32, #tpu.memory_space<smem>>) -> (i32, i32) {
    %c0_i32 = arith.constant 0 : i32
    %c0_i32_0 = arith.constant 0 : i32
    %c0_i32_1 = arith.constant 0 : i32
    return %c0_i32, %c0_i32_0 : i32, i32
  }
  func.func @transform_14(%arg0: i32, %arg1: memref<2x256xi32, #tpu.memory_space<smem>>) -> (i32, i32) {
    %c0_i32 = arith.constant 0 : i32
    %c0_i32_0 = arith.constant 0 : i32
    %c0_i32_1 = arith.constant 0 : i32
    return %c0_i32, %c0_i32_0 : i32, i32
  }
  func.func @transform_15(%arg0: i32, %arg1: memref<2x256xi32, #tpu.memory_space<smem>>) -> (i32, i32) {
    %c0_i32 = arith.constant 0 : i32
    %c0_i32_0 = arith.constant 0 : i32
    %c0_i32_1 = arith.constant 0 : i32
    return %c0_i32, %c0_i32_0 : i32, i32
  }
  func.func @transform_16(%arg0: i32, %arg1: memref<2x256xi32, #tpu.memory_space<smem>>) -> (i32, i32) {
    %c0_i32 = arith.constant 0 : i32
    %c0_i32_0 = arith.constant 0 : i32
    %c0_i32_1 = arith.constant 0 : i32
    return %c0_i32, %c0_i32_0 : i32, i32
  }
  func.func @transform_17(%arg0: i32, %arg1: memref<2x256xi32, #tpu.memory_space<smem>>) -> (i32, i32) {
    %c0_i32 = arith.constant 0 : i32
    %c0_i32_0 = arith.constant 0 : i32
    %c0_i32_1 = arith.constant 0 : i32
    return %c0_i32, %c0_i32_0 : i32, i32
  }
  func.func @transform_18(%arg0: i32, %arg1: memref<2x256xi32, #tpu.memory_space<smem>>) -> (i32, i32) {
    %c0_i32 = arith.constant 0 : i32
    %c0_i32_0 = arith.constant 0 : i32
    %c0_i32_1 = arith.constant 0 : i32
    return %c0_i32, %c0_i32_0 : i32, i32
  }
  func.func @transform_19(%arg0: i32, %arg1: memref<2x256xi32, #tpu.memory_space<smem>>) -> (i32, i32) {
    %c0_i32 = arith.constant 0 : i32
    %c0_i32_0 = arith.constant 0 : i32
    %c0_i32_1 = arith.constant 0 : i32
    return %c0_i32, %c0_i32_0 : i32, i32
  }
  func.func @transform_20(%arg0: i32, %arg1: memref<2x256xi32, #tpu.memory_space<smem>>) -> (i32, i32) {
    %c0_i32 = arith.constant 0 : i32
    %c0_i32_0 = arith.constant 0 : i32
    %c0_i32_1 = arith.constant 0 : i32
    return %c0_i32, %c0_i32_0 : i32, i32
  }
  func.func @transform_21(%arg0: i32, %arg1: memref<2x256xi32, #tpu.memory_space<smem>>) -> (i32, i32) {
    %c0_i32 = arith.constant 0 : i32
    %c0_i32_0 = arith.constant 0 : i32
    %c0_i32_1 = arith.constant 0 : i32
    return %c0_i32, %c0_i32_0 : i32, i32
  }
  func.func @transform_22(%arg0: i32, %arg1: memref<2x256xi32, #tpu.memory_space<smem>>) -> (i32, i32) {
    %c0_i32 = arith.constant 0 : i32
    %c0_i32_0 = arith.constant 0 : i32
    %c0_i32_1 = arith.constant 0 : i32
    return %c0_i32, %c0_i32_0 : i32, i32
  }
  func.func @transform_23(%arg0: i32, %arg1: memref<2x256xi32, #tpu.memory_space<smem>>) -> (i32, i32) {
    %c0_i32 = arith.constant 0 : i32
    %c0_i32_0 = arith.constant 0 : i32
    %c0_i32_1 = arith.constant 0 : i32
    return %c0_i32, %c0_i32_0 : i32, i32
  }
  func.func @transform_24(%arg0: i32, %arg1: memref<2x256xi32, #tpu.memory_space<smem>>) -> (i32, i32) {
    %c0_i32 = arith.constant 0 : i32
    %c0_i32_0 = arith.constant 0 : i32
    %c0_i32_1 = arith.constant 0 : i32
    return %c0_i32, %c0_i32_0 : i32, i32
  }
  func.func @transform_25(%arg0: i32, %arg1: memref<2x256xi32, #tpu.memory_space<smem>>) -> (i32, i32) {
    %c0_i32 = arith.constant 0 : i32
    %c0_i32_0 = arith.constant 0 : i32
    return %c0_i32, %arg0 : i32, i32
  }
}

</mosaic_0001>

<bundles_post_ra>
// kernel: tpu_custom_call.1
= control target key start
LH: loop header
LB: loop body
LE: loop exit
PB: predicated region body
PF: predicated region fallthrough
CT: control target
= control target key end

     0   :  { %s5671_s0 = inlined_call_operand.vmem [shape: s32[2,256], index: 0, kind: input, shape index: {}]   ;;  %s5672_s1 = inlined_call_operand.<no memory space> [shape: f32[1], index: 1, kind: input, shape index: {}]   ;;  %s5673_s2 = inlined_call_operand.hbm [shape: bf16[256,128], index: 2, kind: input, shape index: {}]   ;;  %s5674_s3 = inlined_call_operand.hbm [shape: bf16[256,128], index: 3, kind: input, shape index: {}]   ;;  %s5675_s4 = inlined_call_operand.hbm [shape: bf16[256,128], index: 4, kind: input, shape index: {}]   ;;  %s5676_s5 = inlined_call_operand.hbm [shape: f32[256,256], index: 5, kind: input, shape index: {}]   ;;  %s5677_s6 = inlined_call_operand.hbm [shape: bf16[128,128], index: 6, kind: input, shape index: {}]   ;;  %s5678_s7 = inlined_call_operand.vmem [shape: f32[1,128], index: 7, kind: input, shape index: {}]   ;;  %s5679_s8 = inlined_call_operand.hbm [shape: bf16[128,128], index: 8, kind: input, shape index: {}]   ;;  %s5680_s9 = inlined_call_operand.vmem [shape: f32[1,128], index: 9, kind: input, shape index: {}]   ;;  %s5681_s10 = inlined_call_operand.hbm [shape: bf16[128,128], index: 10, kind: input, shape index: {}]   ;;  %s5682_s11 = inlined_call_operand.vmem [shape: f32[1,128], index: 11, kind: input, shape index: {}]   ;;  %s5683_s12 = inlined_call_operand.hbm [shape: bf16[128,128], index: 12, kind: input, shape index: {}]   ;;  %s5684_s13 = inlined_call_operand.vmem [shape: f32[1,128], index: 13, kind: input, shape index: {}]   ;;  %s5685_s14 = inlined_call_operand.hbm [shape: bf16[128,128], index: 14, kind: input, shape index: {}]   ;;  %s5686_s15 = inlined_call_operand.vmem [shape: f32[1,128], index: 15, kind: input, shape index: {}]   ;;  %s5687_s16 = inlined_call_operand.hbm [shape: bf16[128,128], index: 16, kind: input, shape index: {}]   ;;  %s5688_s17 = inlined_call_operand.vmem [shape: f32[1,128], index: 17, kind: input, shape index: {}]   ;;  %s5689_s18 = inlined_call_operand.hbm [shape: bf16[128,128], index: 18, kind: input, shape index: {}]   ;;  %s5690_s19 = inlined_call_operand.vmem [shape: f32[1,128], index: 19, kind: input, shape index: {}]   ;;  %s5691_s20 = inlined_call_operand.hbm [shape: bf16[128,128], index: 20, kind: input, shape index: {}]   ;;  %s5692_s21 = inlined_call_operand.vmem [shape: f32[1,128], index: 21, kind: input, shape index: {}]   ;;  %s5693_s22 = inlined_call_operand.hbm [shape: bf16[128,128], index: 22, kind: input, shape index: {}]   ;;  %s5694_s23 = inlined_call_operand.vmem [shape: f32[1,128], index: 23, kind: input, shape index: {}]   ;;  %s5695_s24 = inlined_call_operand.vmem [shape: bf16[8,128], index: 24, kind: input, shape index: {}]   ;;  %s5696_s25 = inlined_call_operand.vmem [shape: f32[8,1], index: 25, kind: input, shape index: {}]   ;;  %s5697_s26 = inlined_call_operand.hbm [shape: f32[8,256], index: 26, kind: output, shape index: {}]  }
   0x1   :  { %5738 = sst [smem:[#allocation104_spill]] %s5671_s0 }
   0x2   :  { %5739 = sst [smem:[#allocation105_spill]] %s5672_s1 }
   0x3   :  { %5740 = sst [smem:[#allocation106_spill]] %s5673_s2 }
   0x4   :  { %5741 = sst [smem:[#allocation107_spill]] %s5674_s3 }
   0x5   :  { %5742 = sst [smem:[#allocation108_spill]] %s5675_s4  ;;  %s4651_s4 = smov [#allocation6]  }
   0x6   :  { %5743 = sst [smem:[#allocation109_spill]] %s5676_s5 }
   0x7   :  { %5744 = sst [smem:[#allocation110_spill]] %s5677_s6 }
   0x8   :  { %5745 = sst [smem:[#allocation111_spill]] %s5678_s7 }
   0x9   :  { %5746 = sst [smem:[#allocation112_spill]] %s5679_s8 }
   0xa   :  { %5747 = sst [smem:[#allocation113_spill]] %s5680_s9 }
   0xb   :  { %5748 = sst [smem:[#allocation114_spill]] %s5681_s10 }
   0xc   :  { %5749 = sst [smem:[#allocation115_spill]] %s5682_s11 }
   0xd   :  { %5750 = sst [smem:[#allocation116_spill]] %s5683_s12 }
   0xe   :  { %5751 = sst [smem:[#allocation117_spill]] %s5685_s14 }
   0xf   :  { %5752 = sst [smem:[#allocation118_spill]] %s5687_s16 }
  0x10   :  { %5753 = sst [smem:[#allocation119_spill]] %s5688_s17 }
  0x11   :  { %5754 = sst [smem:[#allocation120_spill]] %s5689_s18 }
  0x12   :  { %5755 = sst [smem:[#allocation121_spill]] %s5691_s20 }
  0x13   :  { %5756 = sst [smem:[#allocation122_spill]] %s5693_s22 }
  0x14   :  { %5757 = sst [smem:[#allocation123_spill]] %s5694_s23 }
  0x15   :  { %5758 = sst [smem:[#allocation124_spill]] %s5695_s24 }
  0x16   :  { %5759 = sst [smem:[#allocation125_spill]] %s5696_s25 }
  0x17   :  { %5760 = sst [smem:[#allocation126_spill]] %s5697_s26 }
  0x18   :  { %s5761_s7 = sld [smem:[#allocation104_spill]] }
  0x19   :  { %s5762_s11 = sld [smem:[#allocation105_spill]] }
  0x1e   :  { %s32_s17 = sshll.u32 %s5761_s7, 4  ;;  %s33_s17 = int_to_ptr.vmem [resolvable:$true] %s32_s17 }
  0x1f   :  { %36 = sst [smem:[#allocation7]] %s5762_s11 }
  0x20   :  { %35 = dma.vmem_to_smem %s33_s17, 64, %s4651_s4, [#allocation5] }
  0x21   :  { %4585 = dma.done.wait [#allocation5], 64 }
  0x22   :  { %4586 = vsyncadd [#allocation5], 4294967232 }
  0x23   :  { %39 = sfence }
  0x24   :  { %40 = vsyncpa [#allocation9], 0 }
  0x25   :  { %42 = vsyncpa [#allocation9 + $0x1], 0 }
  0x26   :  { %43 = vsyncpa [#allocation12], 0 }
  0x27   :  { %45 = vsyncpa [#allocation12 + $0x1], 0 }
  0x28   :  { %46 = vsyncpa [#allocation15], 0 }
  0x29   :  { %47 = vsyncpa [#allocation18], 0 }
  0x2a   :  { %48 = vsyncpa [#allocation21], 0 }
  0x2b   :  { %49 = vsyncpa [#allocation24], 0 }
  0x2c   :  { %50 = vsyncpa [#allocation27], 0 }
  0x2d   :  { %51 = vsyncpa [#allocation10], 0 }
  0x2e   :  { %53 = vsyncpa [#allocation10 + $0x1], 0  ;;  %s4810_s29 = smov 0   ;;  %s4812_s11 = smov 0  }
  0x2f   :  { %s4814_s0 = smov 0   ;;  %s4816_s17 = smov 0  }
  0x30 LB: > { %5763 = sst [smem:[#allocation43_spill]] %s4633_s11  ;;  %s4834_s10 = sadd.s32 4294967295, %s4641_s17   ;;  %s4641_s17 = sphi %s4816_s17, %s5915_s17   ;;  %s4637_s0 = sphi %s4814_s0, %s5918_s0   ;;  %s4633_s11 = sphi %s4812_s11, %s5917_s11   ;;  %s4629_s29 = sphi %s4810_s29, %s5916_s29  }
  0x31   : > { %5764 = sst [smem:[#allocation44_spill]] %s4637_s0  ;;  %p3350_p0 = scmp.ge.s32.totalorder %s4641_s17, 1 }
  0x32   : > { %5765 = sst [smem:[#allocation45_spill]] %s4641_s17  ;;  %p101_p1 = scmp.eq.s32.totalorder %s4834_s10, 0 }
  0x33   : > { %s5766_s2 = sld [smem:[#allocation108_spill]]  ;;  %p604_p2 = scmp.lt.s32.totalorder %s4641_s17, 3 }
  0x34   : > { %s4652_s1 = smov [#allocation13]   ;;  %s5768_s28 = sld [smem:[#allocation110_spill]] }
  0x35   : > { %p4839_p3 = pnand %p3350_p0, %p604_p2  ;;  %s620_s27 = sshll.u32 %s4652_s1, 4  ;;  %s621_s27 = int_to_ptr.vmem [resolvable:$true] %s620_s27 }
  0x36   : > { %s4653_s26 = smov [#allocation14]   ;;  %s5702_s25 = smov 64  }
  0x37   : > { %p3975_p4 = pneg %p4839_p3  ;;  %s634_s24 = sshll.u32 %s4653_s26, 4  ;;  %s635_s24 = int_to_ptr.vmem [resolvable:$true] %s634_s24 }
  0x38   : > { %s5704_s23 = smov 4   ;;  %s5771_s14 = sld [smem:[#allocation117_spill]] }
  0x39   : > { %s618_s5 = sshll.u32 %s5766_s2, 4  ;;  %p4851_p6 = pnand %p3975_p4, %p101_p1  ;;  %s619_s5 = int_to_ptr.hbm [resolvable:$true] %s618_s5 }
  0x3a   : > { %s632_s8 = sshll.u32 %s5768_s28, 4  ;;  %s5770_s2 = sld [smem:[#allocation114_spill]]  ;;  %s633_s8 = int_to_ptr.hbm [resolvable:$true] %s632_s8 }
  0x3b   : > { %3978 = dma.hbm_to_vmem [thread:$0]  (!%p4851_p6), %s619_s5, 2048, %s621_s27, [#allocation12], %s5702_s25, %s5702_s25, %s5704_s23  }
  0x3c   : > { %3981 = dma.hbm_to_vmem [thread:$0]  (!%p4851_p6), %s633_s8, 1024, %s635_s24, [#allocation15], %s5702_s25, %s5702_s25, %s5704_s23  }
  0x3d   : > { %s4656_s26 = smov [#allocation17]   ;;  %s4657_s5 = smov [#allocation20]  }
  0x3e   : > { %s700_s28 = sshll.u32 %s5771_s14, 4  ;;  %s668_s9 = sshll.u32 %s4656_s26, 4  ;;  %s701_s28 = int_to_ptr.hbm [resolvable:$true] %s700_s28  ;;  %s669_s9 = int_to_ptr.vmem [resolvable:$true] %s668_s9 }
  0x3f   : > { %s702_s27 = sshll.u32 %s4657_s5, 4  ;;  %s5772_s18 = sld [smem:[#allocation120_spill]]  ;;  %s703_s27 = int_to_ptr.vmem [resolvable:$true] %s702_s27 }
  0x40   : > { %s666_s1 = sshll.u32 %s5770_s2, 4  ;;  %s5773_s7 = sld [smem:[#allocation112_spill]]  ;;  %s667_s1 = int_to_ptr.hbm [resolvable:$true] %s666_s1 }
  0x41   : > { %3987 = dma.hbm_to_vmem [thread:$0]  (!%p4851_p6), %s667_s1, 1024, %s669_s9, [#allocation18], %s5702_s25, %s5702_s25, %s5704_s23  }
  0x42   : > { %3993 = dma.hbm_to_vmem [thread:$0]  (!%p4851_p6), %s701_s28, 1024, %s703_s27, [#allocation21], %s5702_s25, %s5702_s25, %s5704_s23  }
  0x43   : > { %s4658_s14 = smov [#allocation23]   ;;  %s4659_s9 = smov [#allocation16]  }
  0x44   : > { %s736_s1 = sshll.u32 %s4658_s14, 4  ;;  %s651_s5 = sshll.u32 %s4659_s9, 4  ;;  %s737_s1 = int_to_ptr.vmem [resolvable:$true] %s736_s1  ;;  %s652_s5 = int_to_ptr.vmem [resolvable:$true] %s651_s5 }
  0x45   : > { %s734_s24 = sshll.u32 %s5772_s18, 4  ;;  %s5774_s12 = sld [smem:[#allocation116_spill]]  ;;  %s735_s24 = int_to_ptr.hbm [resolvable:$true] %s734_s24 }
  0x46   : > { %s649_s26 = sshll.u32 %s5773_s7, 4  ;;  %s5775_s16 = sld [smem:[#allocation118_spill]]  ;;  %s650_s26 = int_to_ptr.hbm [resolvable:$true] %s649_s26 }
  0x47   : > { %3999 = dma.hbm_to_vmem [thread:$0]  (!%p4851_p6), %s735_s24, 1024, %s737_s1, [#allocation24], %s5702_s25, %s5702_s25, %s5704_s23  }
  0x48   : > { %3984 = dma.hbm_to_vmem [thread:$0]  (!%p4851_p6), %s650_s26, 1024, %s652_s5, [#allocation15], %s5702_s25, %s5702_s25, %s5704_s23  }
  0x49   : > { %s4660_s3 = smov [#allocation19]   ;;  %s4661_s7 = smov [#allocation22]  }
  0x4a   : > { %s685_s24 = sshll.u32 %s4660_s3, 4  ;;  %s719_s1 = sshll.u32 %s4661_s7, 4  ;;  %s686_s24 = int_to_ptr.vmem [resolvable:$true] %s685_s24  ;;  %s720_s1 = int_to_ptr.vmem [resolvable:$true] %s719_s1 }
  0x4b   : > { %s683_s28 = sshll.u32 %s5774_s12, 4  ;;  %s5776_s20 = sld [smem:[#allocation121_spill]]  ;;  %s684_s28 = int_to_ptr.hbm [resolvable:$true] %s683_s28 }
  0x4c   : > { %s717_s8 = sshll.u32 %s5775_s16, 4  ;;  %s5777_s22 = sld [smem:[#allocation122_spill]]  ;;  %s718_s8 = int_to_ptr.hbm [resolvable:$true] %s717_s8 }
  0x4d   : > { %3990 = dma.hbm_to_vmem [thread:$0]  (!%p4851_p6), %s684_s28, 1024, %s686_s24, [#allocation18], %s5702_s25, %s5702_s25, %s5704_s23  }
  0x4e   : > { %3996 = dma.hbm_to_vmem [thread:$0]  (!%p4851_p6), %s718_s8, 1024, %s720_s1, [#allocation21], %s5702_s25, %s5702_s25, %s5704_s23  }
  0x4f   : > { %s4662_s14 = smov [#allocation25]   ;;  %s4663_s8 = smov [#allocation26]  }
  0x50   : > { %s753_s27 = sshll.u32 %s4662_s14, 4  ;;  %s770_s3 = sshll.u32 %s4663_s8, 4  ;;  %s754_s27 = int_to_ptr.vmem [resolvable:$true] %s753_s27  ;;  %s771_s3 = int_to_ptr.vmem [resolvable:$true] %s770_s3 }
  0x51   : > { %s751_s5 = sshll.u32 %s5776_s20, 4  ;;  %s3349_s24 = sadd.s32 4294967294, %s4641_s17   ;;  %s752_s5 = int_to_ptr.hbm [resolvable:$true] %s751_s5 }
  0x52   : > { %s768_s28 = sshll.u32 %s5777_s22, 4  ;;  %s4931_s7 = sadd.s32 1, %s4641_s17   ;;  %s769_s28 = int_to_ptr.hbm [resolvable:$true] %s768_s28 }
  0x53   : > { %4002 = dma.hbm_to_vmem [thread:$0]  (!%p4851_p6), %s752_s5, 1024, %s754_s27, [#allocation24], %s5702_s25, %s5702_s25, %s5704_s23  }
  0x54   : > { %4005 = dma.hbm_to_vmem [thread:$0]  (!%p4851_p6), %s769_s28, 1024, %s771_s3, [#allocation27], %s5702_s25, %s5702_s25, %s5704_s23  }
  0x55   : > { %5778 = sst [smem:[#allocation46_spill]] %s4931_s7  ;;  %s84_s1 = ssub.s32 %s4641_s17, %s4931_s7 }
  0x56   : > { %s87_s9 = sadd.s32 1, %s4637_s0  ;;  %p85_p7 = scmp.eq.s32.totalorder %s84_s1, 0 }
  0x57   : > { %p94_p8 = scmp.ne.s32.totalorder %s4637_s0, %s4633_s11  ;;  %p95_p9 = scmp.eq.s32.totalorder %s4641_s17, 0 }
  0x58   : > { %p100_p10 = scmp.ne.s32.totalorder %s4633_s11, %s4629_s29  ;;  %p591_p13 = scmp.eq.s32.totalorder %s4834_s10, 1 }
  0x59   : > { %s4942_s26 = scalar_select %p85_p7, %s4637_s0, %s87_s9  }
  0x5a   : > { %p4944_p11 = por %p95_p9, %p94_p8  ;;  %p4950_p12 = por %p101_p1, %p100_p10 }
  0x5b   : > { %5779 = sst [smem:[#allocation47_spill]] %s4942_s26  ;;  %p597_p0 = scmp.eq.s32.totalorder %s3349_s24, 1 }
  0x5c   : > { %p4027_p2 = scmp.lt.s32.totalorder %s4641_s17, 2  ;;  %s793_s30 = sand.u32 1, %s4637_s0  }
  0x5d   : > { %p4957_p4 = por %p591_p13, %p94_p8  ;;  %p4961_p6 = por %p597_p0, %p100_p10 }
  0x5e   : > { %s4965_s14 = sshll.u32 %s793_s30, 6  ;;  %s3745_s27 = sshll.u32 %s4641_s17, 6 }
  0x5f   : > { %s5784_s1 = sld [smem:[#allocation106_spill]]  ;;  %s797_s25 = scalar_lea.vmem [#allocation8], %s4965_s14 }
  0x60   : > { %s805_s24 = sshll.u32 %s797_s25, 4  ;;  %p4974_p7 = pnand %p4027_p2, %p4944_p11  ;;  %s806_s24 = int_to_ptr.vmem [resolvable:$true] %s805_s24 }
  0x61   : > { %s5786_s20 = sld [smem:[#allocation107_spill]]  ;;  %s794_s0 = scalar_lea.sflag [#allocation9], %s793_s30 }
  0x62   : > { %p4429_p9 = pneg %p4974_p7 }
  0x65   : > { %s802_s9 = scalar_lea.hbm %s5784_s1, %s3745_s27 }
  0x66   : > { %s803_s23 = sshll.u32 %s802_s9, 4  ;;  %s4432_s9 = scalar_lea.hbm %s5784_s1, 128  ;;  %s804_s23 = int_to_ptr.hbm [resolvable:$true] %s803_s23 }
  0x67   : > { %s824_s22 = scalar_lea.hbm %s5786_s20, %s3745_s27  ;;  %s4425_s8 = sshra.s32 %s804_s23, 4  ;;  %s4426_s8 = int_to_ptr.hbm [resolvable:$true] %s4425_s8 }
  0x68   : > { %s825_s26 = sshll.u32 %s824_s22, 4  ;;  %s4427_s3 = scalar_lea.hbm %s4426_s8, 64  ;;  %s826_s26 = int_to_ptr.hbm [resolvable:$true] %s825_s26 }
  0x69   : > { %p4428_p8 = scmp.ne.s32.totalorder %s4426_s8, %s4427_s3  ;;  %p4433_p13 = scmp.lt.s32.totalorder %s4426_s8, %s5784_s1 }
  0x6a   : > { %p4434_p0 = scmp.lt.s32.totalorder %s4432_s9, %s4427_s3 }
  0x6b   : > { %p4430_p10 = pnand %p4429_p9, %p4428_p8 }
  0x6c   : > { %p4435_p2 = por %p4434_p0, %p4433_p13 }
  0x6d   : > { %p4431_p11 = pneg %p4430_p10 }
  0x6f   : > { %p4436_p5 = pnand %p4435_p2, %p4431_p11 }
  0x71   : > { %4439 = shalt.err (!%p4436_p5)
}
  0x72   : > { %s5787_s22 = smov 4   ;;  %s5788_s30 = smov 64  }
  0x73   : > { %4009 = dma.hbm_to_vmem [thread:$0]  (!%p4974_p7), %s804_s23, 1024, %s806_s24, %s794_s0, %s5788_s30, %s5788_s30, %s5787_s22  }
  0x74   : > { %s819_s27 = scalar_lea.vmem [#allocation11], %s4965_s14  ;;  %s815_s4 = sand.u32 1, %s4641_s17  }
  0x75   : > { %s827_s25 = sshll.u32 %s819_s27, 4  ;;  %s816_s16 = scalar_lea.sflag [#allocation12], %s815_s4  ;;  %s828_s25 = int_to_ptr.vmem [resolvable:$true] %s827_s25 }
  0x76   : > { %s4455_s8 = sshra.s32 %s826_s26, 4  ;;  %s4462_s1 = scalar_lea.hbm %s5786_s20, 128  ;;  %s4456_s8 = int_to_ptr.hbm [resolvable:$true] %s4455_s8 }
  0x77   : > { %s4457_s3 = scalar_lea.hbm %s4456_s8, 64  ;;  %p4463_p11 = scmp.lt.s32.totalorder %s4456_s8, %s5786_s20 }
  0x78   : > { %p4458_p8 = scmp.ne.s32.totalorder %s4456_s8, %s4457_s3  ;;  %p4464_p13 = scmp.lt.s32.totalorder %s4462_s1, %s4457_s3 }
  0x7a   : > { %p4460_p5 = pnand %p4458_p8, %p4429_p9  ;;  %p4465_p0 = por %p4464_p13, %p4463_p11 }
  0x7c   : > { %p4461_p10 = pneg %p4460_p5 }
  0x7e   : > { %p4466_p2 = pnand %p4465_p0, %p4461_p10 }
  0x80   : > { %4469 = shalt.err (!%p4466_p2)
}
  0x81   : > { %4012 = dma.hbm_to_vmem [thread:$0]  (!%p4974_p7), %s826_s26, 1024, %s828_s25, %s816_s16, %s5788_s30, %s5788_s30, %s5787_s22  }
  0x82   : > { %839 = sbr.rel (%p4839_p3) target bundleno = 1978 (0x7ba), region = 116 }
  0x87   : > { %s5016_s0 = sand.u32 1, %s4633_s11  }
  0x88   : > { %s3369_s7 = sshll.u32 %s5016_s0, 6  ;;  %s842_s14 = scalar_lea.sflag [#allocation9], %s5016_s0 }
  0x89   : > { %s5020_s1 = scalar_lea.vmem [#allocation8], %s3369_s7 }
  0x8a   : > { %4588 = dma.done.wait (%p4950_p12), %s842_s14, 1024  }
  0x8b   : > { %4590 = vsyncadd (%p4950_p12), %s842_s14, 4294966272  ;;  %s851_s12 = sand.u32 1, %s4834_s10   ;;  %s5027_s26 = scalar_lea.vmem [#allocation11], %s3369_s7 }
  0x8c   : > { %s852_s6 = scalar_lea.sflag [#allocation12], %s851_s12 }
  0x8d   : > { %4592 = dma.done.wait (%p4950_p12), %s852_s6, 1024  }
  0x8e   : > { %4594 = vsyncadd (%p4950_p12), %s852_s6, 4294966272 }
  0x8f   : > { %4596 = dma.done.wait (%p101_p1), [#allocation12], 2048  }
  0x90   : > { %4598 = vsyncadd (%p101_p1), [#allocation12], 4294965248 }
  0x91   : > { %4600 = dma.done.wait (%p101_p1), [#allocation15], 2048  }
  0x92   : > { %4602 = vsyncadd (%p101_p1), [#allocation15], 4294965248 }
  0x93   : > { %4604 = dma.done.wait (%p101_p1), [#allocation18], 2048  }
  0x94   : > { %4606 = vsyncadd (%p101_p1), [#allocation18], 4294965248 }
  0x95   : > { %4608 = dma.done.wait (%p101_p1), [#allocation21], 2048  }
  0x96   : > { %4610 = vsyncadd (%p101_p1), [#allocation21], 4294965248 }
  0x97   : > { %4612 = dma.done.wait (%p101_p1), [#allocation24], 2048  }
  0x98   : > { %4614 = vsyncadd (%p101_p1), [#allocation24], 4294965248 }
  0x99   : > { %4616 = dma.done.wait (%p101_p1), [#allocation27], 1024  }
  0x9a   : > { %4618 = vsyncadd (%p101_p1), [#allocation27], 4294966272  ;;  %s3381_s5 = sshll.u32 %s5016_s0, 3  ;;  %s5061_s30 = smov 0  }
  0x9b   : > { %s5059_s22 = scalar_lea.vmem [#allocation28], %s3381_s5 }
  0x9c LB: >> { %s5789_s24 = sshll.u32 %s4834_s10, 7  ;;  %s1001_s25 = sshrl.u32 %s4645_s30, 3  ;;  %s4645_s30 = sphi %s5061_s30, %s984_s30  }
  0x9d   : >> { %s985_s27 = sadd.s32 %s4645_s30, %s5789_s24  ;;  %s1002_s7 = sand.u32 7, %s4645_s30  }
  0x9e   : >> { %s986_s4 = sshra.s32 %s985_s27, 7  ;;  %s990_s16 = sand.u32 127, %s985_s27 }
  0x9f   : >> { %s3383_s8 = sshll.u32 %s986_s4, 8  ;;  %s993_s3 = sadd.s32 128, %s990_s16 }
  0xa0   : >> { %s991_s9 = sadd.s32 %s3383_s8, %s990_s16  ;;  %s994_s18 = sadd.s32 %s3383_s8, %s993_s3 }
  0xa1   : >> { %s992_s23 = sld [smem:[#allocation6 + %s991_s9]]  ;;  %s3385_s12 = sshll.u32 %s1001_s25, 4 }
  0xa2   : >> { %s995_s14 = sld [smem:[#allocation6 + %s994_s18]]  ;;  %s1004_s6 = sadd.s32 %s3385_s12, %s1002_s7 }
  0xa3   : >> { %s1005_s5 = scalar_lea.vmem [#allocation2], %s1004_s6  ;;  %s1019_s11 = scalar_lea.vmem [#allocation3], %s1004_s6 }
  0xa4   : >> { %s5071_s20 = sshll.u32 %s1005_s5, 4  ;;  %s5073_s17 = sshll.u32 %s1019_s11, 4  ;;  %s1009_s20 = int_to_ptr.vmem [resolvable:$true] %s5071_s20 }
  0xa5   : >> { %5790 = sst [smem:[#allocation48_spill]] %s5073_s17 }
  0xa6   : >> { %s5791_s25 = sld [smem:[#allocation109_spill]] }
  0xa7   : >> { %s996_s27 = sshrl.u32 %s992_s23, 3  ;;  %s997_s4 = sand.u32 7, %s992_s23  }
  0xa8   : >> { %s3384_s24 = sshll.u32 %s996_s27, 4  ;;  %s1014_s16 = sshrl.u32 %s995_s14, 3 }
  0xa9   : >> { %s999_s8 = sadd.s32 %s3384_s24, %s997_s4  ;;  %s1015_s3 = sand.u32 7, %s995_s14  }
  0xaa   : >> { %s3386_s12 = sshll.u32 %s1014_s16, 4 }
  0xab   : >> { %s5082_s6 = sadd.s32 %s3386_s12, %s1015_s3 }
  0xac   : >> { %s1000_s7 = scalar_lea.hbm %s5791_s25, %s999_s8  ;;  %s1018_s23 = scalar_lea.hbm %s5791_s25, %s5082_s6 }
  0xad   : >> { %s5080_s5 = sshll.u32 %s1000_s7, 4  ;;  %s4489_s8 = scalar_lea.hbm %s5791_s25, 512  ;;  %s1007_s5 = int_to_ptr.hbm [resolvable:$true] %s5080_s5 }
  0xae   : >> { %s4485_s27 = sshra.s32 %s1007_s5, 4  ;;  %s4486_s27 = int_to_ptr.hbm [resolvable:$true] %s4485_s27 }
  0xaf   : >> { %s4487_s24 = scalar_lea.hbm %s4486_s27, 2  ;;  %p4490_p3 = scmp.lt.s32.totalorder %s4486_s27, %s5791_s25 }
  0xb0   : >> { %p4488_p1 = scmp.ne.s32.totalorder %s4486_s27, %s4487_s24  ;;  %p4491_p12 = scmp.lt.s32.totalorder %s4489_s8, %s4487_s24 }
  0xb2   : >> { %p4492_p7 = por %p4491_p12, %p4490_p3 }
  0xb4   : >> { %p4493_p9 = pnand %p4492_p7, %p4488_p1 }
  0xb6   : >> { %4496 = shalt.err (!%p4493_p9)  }
  0xb7   : >> { %s4497_s17 = sshra.s32 %s1009_s20, 4  ;;  %s4664_s18 = smov [#allocation2]   ;;  %s4498_s17 = int_to_ptr.vmem [resolvable:$true] %s4497_s17 }
  0xb8   : >> { %s4499_s3 = scalar_lea.vmem %s4498_s17, 2  ;;  %s4501_s7 = scalar_lea.vmem %s4664_s18, 256 }
  0xb9   : >> { %p4500_p8 = scmp.ne.s32.totalorder %s4498_s17, %s4499_s3  ;;  %p4502_p5 = scmp.lt.s32.totalorder %s4498_s17, [#allocation2] }
  0xba   : >> { %p4503_p10 = scmp.lt.s32.totalorder %s4501_s7, %s4499_s3 }
  0xbc   : >> { %p4504_p11 = por %p4503_p10, %p4502_p5 }
  0xbe   : >> { %p4505_p13 = pnand %p4504_p11, %p4500_p8 }
  0xc0   : >> { %4508 = shalt.err (!%p4505_p13)  }
  0xc1   : >> { %s4665_s12 = smov 128   ;;  %s4666_s6 = smov 1  }
  0xc2   : >> { %1013 = dma.hbm_to_vmem [thread:$0]  %s1007_s5, 32, %s1009_s20, [#allocation4], %s4665_s12, %s4665_s12, %s4666_s6 }
  0xc3   : >> { %s1021_s11 = sshll.u32 %s1018_s23, 4  ;;  %s1022_s11 = int_to_ptr.hbm [resolvable:$true] %s1021_s11 }
  0xc4   : >> { %s4509_s27 = sshra.s32 %s1022_s11, 4  ;;  %s4510_s27 = int_to_ptr.hbm [resolvable:$true] %s4509_s27 }
  0xc5   : >> { %s4511_s24 = scalar_lea.hbm %s4510_s27, 2  ;;  %p4514_p2 = scmp.lt.s32.totalorder %s4510_s27, %s5791_s25 }
  0xc6   : >> { %p4512_p0 = scmp.ne.s32.totalorder %s4510_s27, %s4511_s24  ;;  %p4515_p1 = scmp.lt.s32.totalorder %s4489_s8, %s4511_s24 }
  0xc8   : >> { %p4516_p3 = por %p4515_p1, %p4514_p2 }
  0xca   : >> { %p4517_p12 = pnand %p4516_p3, %p4512_p0 }
  0xcc   : >> { %4520 = shalt.err (!%p4517_p12)  }
  0xcd   : >> { %s5792_s16 = sld [smem:[#allocation48_spill]]  ;;  %s4667_s20 = smov [#allocation3]  }
  0xce   : >> { %s4525_s5 = scalar_lea.vmem %s4667_s20, 256 }
  0xd3   : >> { %s5793_s9 = int_to_ptr.vmem [resolvable:$true] %s5792_s16 }
  0xd4   : >> { %s4521_s17 = sshra.s32 %s5793_s9, 4  ;;  %s4522_s17 = int_to_ptr.vmem [resolvable:$true] %s4521_s17 }
  0xd5   : >> { %s4523_s3 = scalar_lea.vmem %s4522_s17, 2  ;;  %p4526_p9 = scmp.lt.s32.totalorder %s4522_s17, [#allocation3] }
  0xd6   : >> { %p4524_p7 = scmp.ne.s32.totalorder %s4522_s17, %s4523_s3  ;;  %p4527_p8 = scmp.lt.s32.totalorder %s4525_s5, %s4523_s3 }
  0xd8   : >> { %p4528_p5 = por %p4527_p8, %p4526_p9 }
  0xda   : >> { %p4529_p10 = pnand %p4528_p5, %p4524_p7 }
  0xdc   : >> { %4532 = shalt.err (!%p4529_p10)  }
  0xdd   : >> { %s5794_s23 = smov %s5793_s9  ;;  %s984_s30 = sadd.s32 1, %s4645_s30  }
  0xde   : >> { %1028 = dma.hbm_to_vmem [thread:$0]  %s1022_s11, 32, %s5794_s23, [#allocation4 + $0x1], %s4665_s12, %s4665_s12, %s4666_s6 }
  0xdf   : >> { %p981_p11 = scmp.ge.s32.totalorder %s984_s30, 128  }
  0xe0   : > { %v3754_v0 = vld [vmem:[#allocation23 + $0x38] sm:$0xff] (%p981_p11)  ;;  %v3753_v1 = vld [vmem:[#allocation23 + $0x30] sm:$0xff] (%p981_p11)  ;;  %v3752_v2 = vld [vmem:[#allocation23 + $0x28] sm:$0xff] (%p981_p11)  ;;  %s4647_s18 = smov (%p981_p11), 0  }
  0xe1   : > { %983 = sbr.rel (!%p981_p11) target bundleno = 156 (0x9c), region = 235  ;;  %1185 = vmatpush.bf16.msra.mxu0 (%p981_p11), %v3754_v0  ;;  %3913 = vmatpush.bf16.msra.mxu2 (%p981_p11), %v3754_v0  ;;  %v3751_v3 = vld [vmem:[#allocation23 + $0x20] sm:$0xff] (%p981_p11)  ;;  %v3750_v4 = vld [vmem:[#allocation23 + $0x18] sm:$0xff] (%p981_p11)  ;;  %v3749_v7 = vld [vmem:[#allocation23 + $0x10] sm:$0xff] (%p981_p11) }
  0xe2   : > { %3914 = vmatpush.bf16.msra.mxu3 (%p981_p11), %v3754_v0  ;;  %v3836_v5 = vld [vmem:[%s5020_s1] sm:$0xff] (%p981_p11)   ;;  %v3748_v12 = vld [vmem:[#allocation23 + $0x8] sm:$0xff] (%p981_p11)  ;;  %v3901_v17 = vld [vmem:[%s5020_s1 + $0x18] sm:$0xff] (%p981_p11)  }
  0xe3   : > { %v3868_v6 = vld [vmem:[%s5027_s26] sm:$0xff] (%p981_p11)   ;;  %v3837_v8 = vunpack.c.l.bf16 (%p981_p11), %v3836_v5  ;;  %v3838_v9 = vunpack.c.h.bf16 (%p981_p11), %v3836_v5  ;;  %v3908_v18 = vld [vmem:[%s5027_s26 + $0x18] sm:$0xff] (%p981_p11)   ;;  %v3849_v19 = vunpack.c.l.bf16 (%p981_p11), %v3901_v17  ;;  %v3850_v20 = vunpack.c.h.bf16 (%p981_p11), %v3901_v17  ;;  %v3899_v25 = vld [vmem:[%s5020_s1 + $0x8] sm:$0xff] (%p981_p11)  }
  0xe4   : > { %v3869_v10 = vunpack.c.l.bf16 (%p981_p11), %v3868_v6  ;;  %v3870_v11 = vunpack.c.h.bf16 (%p981_p11), %v3868_v6  ;;  %v3747_v15 = vld [vmem:[#allocation23] sm:$0xff] (%p981_p11)  ;;  %v3881_v21 = vunpack.c.l.bf16 (%p981_p11), %v3908_v18  ;;  %v3882_v22 = vunpack.c.h.bf16 (%p981_p11), %v3908_v18  ;;  %v3906_v26 = vld [vmem:[%s5027_s26 + $0x8] sm:$0xff] (%p981_p11)   ;;  %v3762_v49 = vld [vmem:[#allocation25 + $0x38] sm:$0xff] (%p981_p11) }
  0xe5   : > { %1186 = vmatpush.bf16.msra.mxu0 (%p981_p11), %v3753_v1  ;;  %3915 = vmatpush.bf16.msra.mxu2 (%p981_p11), %v3753_v1  ;;  %v3903_v28 = vld [vmem:[%s5020_s1 + $0x28] sm:$0xff] (%p981_p11)   ;;  %v3902_v30 = vld [vmem:[%s5020_s1 + $0x20] sm:$0xff] (%p981_p11)   ;;  %v3841_v35 = vunpack.c.l.bf16 (%p981_p11), %v3899_v25  ;;  %v3842_v36 = vunpack.c.h.bf16 (%p981_p11), %v3899_v25  ;;  %v3873_v37 = vunpack.c.l.bf16 (%p981_p11), %v3906_v26  ;;  %v3874_v38 = vunpack.c.h.bf16 (%p981_p11), %v3906_v26  ;;  %v3904_v50 = vld [vmem:[%s5020_s1 + $0x30] sm:$0xff] (%p981_p11)  }
  0xe6   : > { %3916 = vmatpush.bf16.msra.mxu3 %v3753_v1  ;;  %v1093_v13 = vmul.f32 %v3869_v10, %v3837_v8  ;;  %v1094_v14 = vmul.f32 %v3870_v11, %v3838_v9  ;;  %v1099_v23 = vmul.f32 %v3881_v21, %v3849_v19  ;;  %v1100_v24 = vmul.f32 %v3882_v22, %v3850_v20  ;;  %v3910_v29 = vld [vmem:[%s5027_s26 + $0x28] sm:$0xff]   ;;  %v3909_v39 = vld [vmem:[%s5027_s26 + $0x20] sm:$0xff]   ;;  %v3911_v51 = vld [vmem:[%s5027_s26 + $0x30] sm:$0xff]  }
  0xe7   : > { %v3857_v31 = vunpack.c.l.bf16 %v3903_v28  ;;  %v3858_v32 = vunpack.c.h.bf16 %v3903_v28  ;;  %v3889_v33 = vunpack.c.l.bf16 %v3910_v29  ;;  %v3890_v34 = vunpack.c.h.bf16 %v3910_v29  ;;  %1326 = vmatpush.bf16.msra.mxu1 %v3762_v49  ;;  %v3761_v54 = vld [vmem:[#allocation25 + $0x30] sm:$0xff]  ;;  %v3760_v61 = vld [vmem:[#allocation25 + $0x28] sm:$0xff]  ;;  %v3905_v10 = vld [vmem:[%s5020_s1 + $0x38] sm:$0xff]  }
  0xe8   : > { %v1109_v16 = vpack.c.bf16 %v1094_v14, %v1093_v13  ;;  %v1112_v27 = vpack.c.bf16 %v1100_v24, %v1099_v23  ;;  %v3853_v42 = vunpack.c.l.bf16 %v3902_v30  ;;  %v3854_v43 = vunpack.c.h.bf16 %v3902_v30  ;;  %v3900_v62 = vld [vmem:[%s5020_s1 + $0x10] sm:$0xff]   ;;  %v3912_v11 = vld [vmem:[%s5027_s26 + $0x38] sm:$0xff]   ;;  %v3756_v22 = vld [vmem:[#allocation25 + $0x8] sm:$0xff] }
  0xe9   : > { %1187 = vmatpush.bf16.msra.mxu0 %v3752_v2  ;;  %3917 = vmatpush.bf16.msra.mxu2 %v3752_v2  ;;  %v1103_v40 = vmul.f32 %v3889_v33, %v3857_v31  ;;  %v1104_v41 = vmul.f32 %v3890_v34, %v3858_v32  ;;  %v3885_v44 = vunpack.c.l.bf16 %v3909_v39  ;;  %v3886_v45 = vunpack.c.h.bf16 %v3909_v39  ;;  %v3907_v63 = vld [vmem:[%s5027_s26 + $0x10] sm:$0xff]   ;;  %v3758_v20 = vld [vmem:[#allocation25 + $0x18] sm:$0xff]  ;;  %v3755_v23 = vld [vmem:[#allocation25] sm:$0xff] }
  0xea   : > { %3918 = vmatpush.bf16.msra.mxu3 %v3752_v2  ;;  %v1095_v47 = vmul.f32 %v3873_v37, %v3841_v35  ;;  %v1096_v48 = vmul.f32 %v3874_v38, %v3842_v36  ;;  %v3861_v56 = vunpack.c.l.bf16 %v3904_v50  ;;  %v3862_v57 = vunpack.c.h.bf16 %v3904_v50  ;;  %v3759_v2 = vld [vmem:[#allocation25 + $0x20] sm:$0xff]  ;;  %v3757_v21 = vld [vmem:[#allocation25 + $0x10] sm:$0xff] }
  0xeb   : > { %v1114_v46 = vpack.c.bf16 %v1104_v41, %v1103_v40  ;;  %v1101_v52 = vmul.f32 %v3885_v44, %v3853_v42  ;;  %v1102_v53 = vmul.f32 %v3886_v45, %v3854_v43  ;;  %v3893_v58 = vunpack.c.l.bf16 %v3911_v51  ;;  %1327 = vmatpush.bf16.msra.mxu1 %v3761_v54  ;;  %v4103_v25 = vld [vmem:[%s5690_s19] ss:$0 sm:$0xff] }
  0xec   : > { %v1110_v55 = vpack.c.bf16 %v1096_v48, %v1095_v47  ;;  %v3894_v59 = vunpack.c.h.bf16 %v3911_v51  ;;  %v3877_v5 = vunpack.c.l.bf16 %v3907_v63  ;;  %v3878_v6 = vunpack.c.h.bf16 %v3907_v63 }
  0xed   : > { %1188 = vmatpush.bf16.msra.mxu0 %v3751_v3  ;;  %3919 = vmatpush.bf16.msra.mxu2 %v3751_v3  ;;  %v1113_v60 = vpack.c.bf16 %v1102_v53, %v1101_v52  ;;  %v1105_v0 = vmul.f32 %v3893_v58, %v3861_v56  ;;  %v3865_v13 = vunpack.c.l.bf16 %v3905_v10  ;;  %v3866_v14 = vunpack.c.h.bf16 %v3905_v10 }
  0xee   : > { %3920 = vmatpush.bf16.msra.mxu3 %v3751_v3  ;;  %v1106_v1 = vmul.f32 %v3894_v59, %v3862_v57  ;;  %v3845_v3 = vunpack.c.l.bf16 %v3900_v62 }
  0xef   : > { %1328 = vmatpush.bf16.msra.mxu1 %v3760_v61 }
  0xf0   : > { %v1097_v8 = vmul.f32 %v3877_v5, %v3845_v3 }
  0xf1   : > { %1189 = vmatpush.bf16.msra.mxu0 %v3750_v4  ;;  %3921 = vmatpush.bf16.msra.mxu2 %v3750_v4 }
  0xf2   : > { %3922 = vmatpush.bf16.msra.mxu3 %v3750_v4  ;;  %v3846_v4 = vunpack.c.h.bf16 %v3900_v62 }
  0xf3   : > { %1329 = vmatpush.bf16.msra.mxu1 %v3759_v2 }
  0xf4   : > { %v1098_v9 = vmul.f32 %v3878_v6, %v3846_v4 }
  0xf5   : > { %1190 = vmatpush.bf16.msra.mxu0 %v3749_v7  ;;  %3923 = vmatpush.bf16.msra.mxu2 %v3749_v7 }
  0xf6   : > { %3924 = vmatpush.bf16.msra.mxu3 %v3749_v7  ;;  %v1115_v7 = vpack.c.bf16 %v1106_v1, %v1105_v0 }
  0xf7   : > { %1330 = vmatpush.bf16.msra.mxu1 %v3758_v20 }
  0xf9   : > { %1191 = vmatpush.bf16.msra.mxu0 %v3748_v12  ;;  %3925 = vmatpush.bf16.msra.mxu2 %v3748_v12 }
  0xfa   : > { %3926 = vmatpush.bf16.msra.mxu3 %v3748_v12  ;;  %v1111_v12 = vpack.c.bf16 %v1098_v9, %v1097_v8 }
  0xfb   : > { %1331 = vmatpush.bf16.msra.mxu1 %v3757_v21 }
  0xfd   : > { %1192 = vmatpush.bf16.msra.mxu0 %v3747_v15  ;;  %3927 = vmatpush.bf16.msra.mxu2 %v3747_v15 }
  0xfe   : > { %3928 = vmatpush.bf16.msra.mxu3 %v3747_v15  ;;  %v3897_v15 = vunpack.c.l.bf16 %v3912_v11 }
  0xff   : > { %1332 = vmatpush.bf16.msra.mxu1 %v3756_v22 }
 0x100   : > { %1193 = vmatmul.bf16.vlgmr.msra.gmra.mxu0 %v1109_v16  ;;  %1208 = vmatmul.bf16.vlgmr.msra.gmra.mxu2 %v1112_v27  ;;  %v3898_v16 = vunpack.c.h.bf16 %v3912_v11  ;;  %v1107_v17 = vmul.f32 %v3897_v15, %v3865_v13 }
 0x101   : > { %1218 = vmatmul.bf16.vlgmr.msra.gmra.mxu3 %v1114_v46 }
 0x102   : > { %v1108_v18 = vmul.f32 %v3898_v16, %v3866_v14 }
 0x103   : > { %1333 = vmatpush.bf16.msra.mxu1 %v3755_v23 }
 0x104   : > { %v1116_v19 = vpack.c.bf16 %v1108_v18, %v1107_v17  ;;  %v4104_v17 = vld [vmem:[%s5692_s21] ss:$0 sm:$0xff] }
 0x110   : > { %1198 = vmatmul.bf16.gmra.mxu0 %v1110_v55  ;;  %1213 = vmatmul.bf16.gmra.mxu2 %v1113_v60 }
 0x111   : > { %1223 = vmatmul.bf16.gmra.mxu3 %v1115_v7 }
 0x120   : > { %1203 = vmatmul.bf16.gmra.mxu0 %v1111_v12 }
 0x121   : > { %1228 = vmatmul.bf16.gmra.mxu3 %v1116_v19 }
 0x17d   : > { %v1194_v24 = vpop.f32.mrf.mxu0 }
 0x17e   : > { %v1195_v26 = vadd.f32 %v4103_v25, %v1194_v24 }
 0x180   : > { %v1234_v29 = vmax.f32 %v1195_v26, 0.0 }
 0x183   : > { %v1209_v40 = vpop.f32.mrf.mxu2 }
 0x184   : > { %v1210_v48 = vadd.f32 %v4103_v25, %v1209_v40  ;;  %v1219_v54 = vpop.f32.mrf.mxu3 }
 0x185   : > { %v1196_v27 = vpop.f32.mrf.mxu0  ;;  %v1220_v63 = vadd.f32 %v4103_v25, %v1219_v54 }
 0x186   : > { %v1197_v28 = vadd.f32 %v4103_v25, %v1196_v27  ;;  %v1240_v51 = vmax.f32 %v1210_v48, 0.0 }
 0x187   : > { %v1244_v1 = vmax.f32 %v1220_v63, 0.0 }
 0x188   : > { %v1235_v30 = vmax.f32 %v1197_v28, 0.0 }
 0x18a   : > { %v1250_v31 = vpack.c.bf16 %v1235_v30, %v1234_v29 }
 0x18b   : > { %v1211_v47 = vpop.f32.mrf.mxu2 }
 0x18c   : > { %1334 = vmatmul.bf16.vlgmr.msra.gmra.mxu1 %v1250_v31  ;;  %v1212_v49 = vadd.f32 %v4103_v25, %v1211_v47  ;;  %v1221_v60 = vpop.f32.mrf.mxu3 }
 0x18d   : > { %v1199_v32 = vpop.f32.mrf.mxu0  ;;  %v1222_v0 = vadd.f32 %v4103_v25, %v1221_v60 }
 0x18e   : > { %v1200_v33 = vadd.f32 %v4103_v25, %v1199_v32  ;;  %v1241_v52 = vmax.f32 %v1212_v49, 0.0 }
 0x18f   : > { %v1245_v2 = vmax.f32 %v1222_v0, 0.0 }
 0x190   : > { %v1236_v36 = vmax.f32 %v1200_v33, 0.0  ;;  %v1253_v53 = vpack.c.bf16 %v1241_v52, %v1240_v51 }
 0x191   : > { %v1255_v3 = vpack.c.bf16 %v1245_v2, %v1244_v1 }
 0x193   : > { %v1214_v50 = vpop.f32.mrf.mxu2 }
 0x194   : > { %v1215_v56 = vadd.f32 %v4103_v25, %v1214_v50  ;;  %v1224_v62 = vpop.f32.mrf.mxu3 }
 0x195   : > { %v1201_v34 = vpop.f32.mrf.mxu0  ;;  %v1225_v5 = vadd.f32 %v4103_v25, %v1224_v62 }
 0x196   : > { %v1202_v35 = vadd.f32 %v4103_v25, %v1201_v34  ;;  %v1242_v58 = vmax.f32 %v1215_v56, 0.0 }
 0x197   : > { %v1246_v8 = vmax.f32 %v1225_v5, 0.0 }
 0x198   : > { %v1237_v37 = vmax.f32 %v1202_v35, 0.0 }
 0x19a   : > { %v1251_v38 = vpack.c.bf16 %v1237_v37, %v1236_v36 }
 0x19b   : > { %v1216_v55 = vpop.f32.mrf.mxu2 }
 0x19c   : > { %1339 = vmatmul.bf16.gmra.mxu1 %v1251_v38  ;;  %v1217_v57 = vadd.f32 %v4103_v25, %v1216_v55  ;;  %v1226_v4 = vpop.f32.mrf.mxu3 }
 0x19d   : > { %v1204_v39 = vpop.f32.mrf.mxu0  ;;  %v1227_v6 = vadd.f32 %v4103_v25, %v1226_v4 }
 0x19e   : > { %v1205_v41 = vadd.f32 %v4103_v25, %v1204_v39  ;;  %v1243_v59 = vmax.f32 %v1217_v57, 0.0 }
 0x19f   : > { %v1247_v9 = vmax.f32 %v1227_v6, 0.0 }
 0x1a0   : > { %v1238_v44 = vmax.f32 %v1205_v41, 0.0  ;;  %v1254_v61 = vpack.c.bf16 %v1243_v59, %v1242_v58 }
 0x1a1   : > { %v1256_v10 = vpack.c.bf16 %v1247_v9, %v1246_v8 }
 0x1a4   : > { %v1229_v7 = vpop.f32.mrf.mxu3 }
 0x1a5   : > { %v1206_v42 = vpop.f32.mrf.mxu0  ;;  %v1230_v12 = vadd.f32 %v4103_v25, %v1229_v7 }
 0x1a6   : > { %v1207_v43 = vadd.f32 %v4103_v25, %v1206_v42 }
 0x1a7   : > { %v1248_v14 = vmax.f32 %v1230_v12, 0.0 }
 0x1a8   : > { %v1239_v45 = vmax.f32 %v1207_v43, 0.0 }
 0x1aa   : > { %v1252_v46 = vpack.c.bf16 %v1239_v45, %v1238_v44 }
 0x1ac   : > { %1344 = vmatmul.bf16.gmra.mxu1 %v1252_v46  ;;  %v1231_v11 = vpop.f32.mrf.mxu3 }
 0x1ad   : > { %v1232_v13 = vadd.f32 %v4103_v25, %v1231_v11 }
 0x1af   : > { %v1249_v15 = vmax.f32 %v1232_v13, 0.0 }
 0x1b1   : > { %v1257_v16 = vpack.c.bf16 %v1249_v15, %v1248_v14 }
 0x1bc   : > { %1349 = vmatmul.bf16.gmra.mxu1 %v1253_v53 }
 0x1cc   : > { %1354 = vmatmul.bf16.gmra.mxu1 %v1254_v61 }
 0x1dc   : > { %1359 = vmatmul.bf16.gmra.mxu1 %v1255_v3 }
 0x1ec   : > { %1364 = vmatmul.bf16.gmra.mxu1 %v1256_v10 }
 0x1fc   : > { %1369 = vmatmul.bf16.gmra.mxu1 %v1257_v16 }
 0x209   : > { %v1335_v18 = vpop.f32.mrf.mxu1 }
 0x20a   : > { %v5131_v19 = vadd.f32 %v4104_v17, %v1335_v18 }
 0x20c   : > { %5795 = vst [vmem:[#allocation49_spill] sm:$0xff] %v5131_v19 }
 0x211   : > { %v1337_v20 = vpop.f32.mrf.mxu1 }
 0x212   : > { %v5133_v21 = vadd.f32 %v4104_v17, %v1337_v20 }
 0x214   : > { %5796 = vst [vmem:[#allocation50_spill] sm:$0xff] %v5133_v21 }
 0x219   : > { %v1340_v22 = vpop.f32.mrf.mxu1 }
 0x21a   : > { %v5135_v23 = vadd.f32 %v4104_v17, %v1340_v22 }
 0x21c   : > { %5797 = vst [vmem:[#allocation51_spill] sm:$0xff] %v5135_v23 }
 0x221   : > { %v1342_v24 = vpop.f32.mrf.mxu1 }
 0x222   : > { %v5137_v26 = vadd.f32 %v4104_v17, %v1342_v24 }
 0x224   : > { %5798 = vst [vmem:[#allocation52_spill] sm:$0xff] %v5137_v26 }
 0x229   : > { %v1345_v25 = vpop.f32.mrf.mxu1 }
 0x22a   : > { %v5139_v27 = vadd.f32 %v4104_v17, %v1345_v25 }
 0x22c   : > { %5799 = vst [vmem:[#allocation53_spill] sm:$0xff] %v5139_v27 }
 0x231   : > { %v1347_v28 = vpop.f32.mrf.mxu1 }
 0x232   : > { %v5141_v29 = vadd.f32 %v4104_v17, %v1347_v28 }
 0x234   : > { %5800 = vst [vmem:[#allocation54_spill] sm:$0xff] %v5141_v29 }
 0x239   : > { %v1350_v30 = vpop.f32.mrf.mxu1 }
 0x23a   : > { %v5143_v31 = vadd.f32 %v4104_v17, %v1350_v30 }
 0x23c   : > { %5801 = vst [vmem:[#allocation55_spill] sm:$0xff] %v5143_v31 }
 0x241   : > { %v1352_v32 = vpop.f32.mrf.mxu1 }
 0x242   : > { %v5145_v33 = vadd.f32 %v4104_v17, %v1352_v32 }
 0x244   : > { %5802 = vst [vmem:[#allocation56_spill] sm:$0xff] %v5145_v33 }
 0x249   : > { %v1355_v34 = vpop.f32.mrf.mxu1 }
 0x24a   : > { %v5147_v35 = vadd.f32 %v4104_v17, %v1355_v34 }
 0x24c   : > { %5803 = vst [vmem:[#allocation57_spill] sm:$0xff] %v5147_v35 }
 0x251   : > { %v1357_v36 = vpop.f32.mrf.mxu1 }
 0x252   : > { %v5149_v37 = vadd.f32 %v4104_v17, %v1357_v36 }
 0x254   : > { %5804 = vst [vmem:[#allocation58_spill] sm:$0xff] %v5149_v37 }
 0x259   : > { %v1360_v38 = vpop.f32.mrf.mxu1 }
 0x25a   : > { %v5151_v39 = vadd.f32 %v4104_v17, %v1360_v38 }
 0x25c   : > { %5805 = vst [vmem:[#allocation59_spill] sm:$0xff] %v5151_v39 }
 0x261   : > { %v1362_v40 = vpop.f32.mrf.mxu1 }
 0x262   : > { %v5153_v41 = vadd.f32 %v4104_v17, %v1362_v40 }
 0x264   : > { %5806 = vst [vmem:[#allocation60_spill] sm:$0xff] %v5153_v41 }
 0x269   : > { %v1365_v42 = vpop.f32.mrf.mxu1 }
 0x26a   : > { %v5155_v43 = vadd.f32 %v4104_v17, %v1365_v42 }
 0x26c   : > { %5807 = vst [vmem:[#allocation61_spill] sm:$0xff] %v5155_v43 }
 0x271   : > { %v1367_v44 = vpop.f32.mrf.mxu1 }
 0x272   : > { %v5157_v45 = vadd.f32 %v4104_v17, %v1367_v44 }
 0x274   : > { %5808 = vst [vmem:[#allocation62_spill] sm:$0xff] %v5157_v45 }
 0x279   : > { %v1370_v46 = vpop.f32.mrf.mxu1 }
 0x27a   : > { %v5159_v47 = vadd.f32 %v4104_v17, %v1370_v46 }
 0x27c   : > { %5809 = vst [vmem:[#allocation63_spill] sm:$0xff] %v5159_v47 }
 0x281   : > { %v1372_v48 = vpop.f32.mrf.mxu1 }
 0x282   : > { %v5161_v49 = vadd.f32 %v4104_v17, %v1372_v48 }
 0x284   : > { %5810 = vst [vmem:[#allocation64_spill] sm:$0xff] %v5161_v49 }
 0x285 LB: >> { %4619 = dma.done.wait [#allocation4], 32  ;;  %s4649_s18 = sphi %s4647_s18, %s1380_s18  }
 0x286   : >> { %4620 = vsyncadd [#allocation4], 4294967264 }
 0x287   : >> { %4621 = dma.done.wait [#allocation4 + $0x1], 32 }
 0x288   : >> { %4622 = vsyncadd [#allocation4 + $0x1], 4294967264  ;;  %s1380_s18 = sadd.s32 1, %s4649_s18  }
 0x289   : >> { %p1377_p13 = scmp.ge.s32.totalorder %s1380_s18, 128  }
 0x28a   : > { %v3770_v50 = vld [vmem:[#allocation13 + $0x38] sm:$0xff] (%p1377_p13)  ;;  %v3769_v52 = vld [vmem:[#allocation13 + $0x30] sm:$0xff] (%p1377_p13)  ;;  %v3768_v54 = vld [vmem:[#allocation13 + $0x28] sm:$0xff] (%p1377_p13)  ;;  %s5868_s6 = sld [smem:[#allocation111_spill]] (%p1377_p13)  ;;  %s3740_s14 = sshll.u32 (%p1377_p13), %s4834_s10, 3 }
 0x28b   : > { %1379 = sbr.rel (!%p1377_p13) target bundleno = 645 (0x285), region = 246  ;;  %v3778_v51 = vld [vmem:[#allocation13 + $0x78] sm:$0xff] (%p1377_p13)  ;;  %1898 = vmatpush.bf16.msrb.mxu2 (%p1377_p13), %v3770_v50  ;;  %v3777_v53 = vld [vmem:[#allocation13 + $0x70] sm:$0xff] (%p1377_p13)  ;;  %v3776_v55 = vld [vmem:[#allocation13 + $0x68] sm:$0xff] (%p1377_p13)  ;;  %s5890_s24 = sld [smem:[#allocation113_spill]] (%p1377_p13) }
 0x28c   : > { %1987 = vmatpush.bf16.msrb.mxu3 (%p1377_p13), %v3778_v51  ;;  %v3767_v56 = vld [vmem:[#allocation13 + $0x20] sm:$0xff] (%p1377_p13)  ;;  %v3766_v58 = vld [vmem:[#allocation13 + $0x18] sm:$0xff] (%p1377_p13)  ;;  %v5165_v61 = vld [vmem:[#allocation2 + $0x8] sm:$0xff] (%p1377_p13)  ;;  %s2890_s17 = sld [smem:[#allocation7]] (%p1377_p13)  ;;  %s3123_s3 = sshll.u32 (%p1377_p13), %s5059_s22, 4  ;;  %s3124_s3 = int_to_ptr.vmem [resolvable:$true] %s3123_s3 }
 0x28d   : > { %v3775_v57 = vld [vmem:[#allocation13 + $0x60] sm:$0xff] (%p1377_p13)  ;;  %v3774_v59 = vld [vmem:[#allocation13 + $0x58] sm:$0xff] (%p1377_p13)  ;;  %v5167_v62 = vld [vmem:[#allocation2 + $0x10] sm:$0xff] (%p1377_p13)  ;;  %s5891_s5 = sld [smem:[#allocation115_spill]] (%p1377_p13) }
 0x28e   : > { %v5163_v60 = vld [vmem:[#allocation2] sm:$0xff] (%p1377_p13)  ;;  %v5169_v63 = vld [vmem:[#allocation2 + $0x18] sm:$0xff] (%p1377_p13)  ;;  %v5173_v1 = vld [vmem:[#allocation3 + $0x8] sm:$0xff] (%p1377_p13)  ;;  %s5892_s26 = sld [smem:[#allocation119_spill]] (%p1377_p13) }
 0x28f   : > { %1899 = vmatpush.bf16.msrb.mxu2 (%p1377_p13), %v3769_v52  ;;  %v5171_v0 = vld [vmem:[#allocation3] sm:$0xff] (%p1377_p13)  ;;  %v5175_v2 = vld [vmem:[#allocation3 + $0x10] sm:$0xff] (%p1377_p13)  ;;  %v5177_v3 = vld [vmem:[#allocation3 + $0x18] sm:$0xff] (%p1377_p13)  ;;  %v5185_v5 = vmul.f32 (%p1377_p13), %v5173_v1, %v5165_v61  ;;  %s5909_s18 = sld [smem:[#allocation123_spill]] (%p1377_p13) }
 0x290   : > { %1988 = vmatpush.bf16.msrb.mxu3 %v3777_v53  ;;  %v5181_v4 = vmul.f32 %v5171_v0, %v5163_v60  ;;  %v5189_v6 = vmul.f32 %v5175_v2, %v5167_v62  ;;  %v5193_v7 = vmul.f32 %v5177_v3, %v5169_v63  ;;  %v3765_v8 = vld [vmem:[#allocation13 + $0x10] sm:$0xff]  ;;  %v3764_v12 = vld [vmem:[#allocation13 + $0x8] sm:$0xff]  ;;  %v3763_v18 = vld [vmem:[#allocation13] sm:$0xff]  ;;  %s5912_s9 = sld [smem:[#allocation126_spill]] }
 0x291   : > { %v3773_v9 = vld [vmem:[#allocation13 + $0x50] sm:$0xff]  ;;  %v3772_v13 = vld [vmem:[#allocation13 + $0x48] sm:$0xff]  ;;  %v3771_v20 = vld [vmem:[#allocation13 + $0x40] sm:$0xff] }
 0x292   : > { %v1578_v10 = vpack.c.bf16 %v5185_v5, %v5181_v4  ;;  %v1579_v11 = vpack.c.bf16 %v5193_v7, %v5189_v6  ;;  %v5199_v22 = vld [vmem:[#allocation2 + $0x20] sm:$0xff]  ;;  %v5201_v24 = vld [vmem:[#allocation2 + $0x28] sm:$0xff]  ;;  %v5203_v30 = vld [vmem:[#allocation2 + $0x30] sm:$0xff] }
 0x293   : > { %1900 = vmatpush.bf16.msrb.mxu2 %v3768_v54  ;;  %v5205_v32 = vld [vmem:[#allocation2 + $0x38] sm:$0xff]  ;;  %v5207_v34 = vld [vmem:[#allocation3 + $0x20] sm:$0xff]  ;;  %v5209_v36 = vld [vmem:[#allocation3 + $0x28] sm:$0xff] }
 0x294   : > { %1989 = vmatpush.bf16.msrb.mxu3 %v3776_v55  ;;  %v1626_v14 = vunpack.c.l.b16 %v1578_v10  ;;  %v1628_v15 = vunpack.c.l.b16 %v1579_v11  ;;  %v1627_v16 = vunpack.c.h.b16 %v1578_v10  ;;  %v1629_v17 = vunpack.c.h.b16 %v1579_v11  ;;  %v5211_v38 = vld [vmem:[#allocation3 + $0x30] sm:$0xff]  ;;  %v5213_v40 = vld [vmem:[#allocation3 + $0x38] sm:$0xff]  ;;  %v5243_v10 = vld [vmem:[#allocation3 + $0x40] sm:$0xff] }
 0x295   : > { %v5217_v42 = vmul.f32 %v5207_v34, %v5199_v22  ;;  %v5221_v44 = vmul.f32 %v5209_v36, %v5201_v24  ;;  %v5225_v46 = vmul.f32 %v5211_v38, %v5203_v30  ;;  %v5229_v48 = vmul.f32 %v5213_v40, %v5205_v32  ;;  %v5245_v11 = vld [vmem:[#allocation3 + $0x48] sm:$0xff]  ;;  %v5279_v37 = vld [vmem:[#allocation2 + $0x60] sm:$0xff]  ;;  %v5283_v29 = vld [vmem:[#allocation2 + $0x70] sm:$0xff] }
 0x296   : > { %v1658_v25 = vpack.c.b16 %v1628_v15, %v1626_v14  ;;  %v1659_v28 = vpack.c.b16 %v1629_v17, %v1627_v16  ;;  %5821 = vst [vmem:[#allocation75_spill] sm:$0xff] %v5279_v37  ;;  %v5281_v35 = vld [vmem:[#allocation2 + $0x68] sm:$0xff]  ;;  %v5285_v27 = vld [vmem:[#allocation2 + $0x78] sm:$0xff]  ;;  %v5287_v26 = vld [vmem:[#allocation3 + $0x60] sm:$0xff]  ;;  %s4553_s30 = scalar_lea.hbm %s5912_s9, 16 }
 0x297   : > { %1901 = vmatpush.bf16.msrb.mxu2 %v3767_v56  ;;  %v1580_v50 = vpack.c.bf16 %v5221_v44, %v5217_v42  ;;  %v1581_v51 = vpack.c.bf16 %v5229_v48, %v5225_v46  ;;  %v5235_v56 = vld [vmem:[#allocation2 + $0x40] sm:$0xff]  ;;  %5822 = vst [vmem:[#allocation76_spill] sm:$0xff] %v5281_v35  ;;  %v5289_v23 = vld [vmem:[#allocation3 + $0x68] sm:$0xff]  ;;  %v5291_v21 = vld [vmem:[#allocation3 + $0x70] sm:$0xff] }
 0x298   : > { %1990 = vmatpush.bf16.msrb.mxu3 %v3775_v57  ;;  %v5237_v57 = vld [vmem:[#allocation2 + $0x48] sm:$0xff]  ;;  %v5253_v14 = vmul.f32 %v5243_v10, %v5235_v56  ;;  %5823 = vst [vmem:[#allocation77_spill] sm:$0xff] %v5283_v29  ;;  %v5293_v19 = vld [vmem:[#allocation3 + $0x78] sm:$0xff] }
 0x299   : > { %v1630_v52 = vunpack.c.l.b16 %v1580_v50  ;;  %v1632_v53 = vunpack.c.l.b16 %v1581_v51  ;;  %v1631_v54 = vunpack.c.h.b16 %v1580_v50  ;;  %v1633_v55 = vunpack.c.h.b16 %v1581_v51  ;;  %v1435_v50 = vld [vmem:[#allocation3 + $0x88] sm:$0xff]  ;;  %v1405_v51 = vld [vmem:[#allocation2 + $0x98] sm:$0xff]  ;;  %5824 = vst [vmem:[#allocation78_spill] sm:$0xff] %v5285_v27 }
 0x29a   : > { %5813 = vst [vmem:[#allocation67_spill] sm:$0xff] %v5253_v14  ;;  %v5257_v15 = vmul.f32 %v5245_v11, %v5237_v57 }
 0x29b   : > { %1902 = vmatpush.bf16.msrb.mxu2 %v3766_v58  ;;  %v1660_v58 = vpack.c.b16 %v1632_v53, %v1630_v52  ;;  %v1436_v52 = vld [vmem:[#allocation3 + $0x90] sm:$0xff]  ;;  %v1437_v53 = vld [vmem:[#allocation3 + $0x98] sm:$0xff]  ;;  %5825 = vst [vmem:[#allocation79_spill] sm:$0xff] %v5287_v26 }
 0x29c   : > { %1991 = vmatpush.bf16.msrb.mxu3 %v3774_v59  ;;  %v1661_v59 = vpack.c.b16 %v1633_v55, %v1631_v54  ;;  %5814 = vst [vmem:[#allocation68_spill] sm:$0xff] %v5257_v15  ;;  %v1582_v49 = vpack.c.bf16 %v5257_v15, %v5253_v14 }
 0x29d   : > { %5826 = vst [vmem:[#allocation80_spill] sm:$0xff] %v5289_v23 }
 0x29e   : > { %v1634_v45 = vunpack.c.l.b16 %v1582_v49  ;;  %v1635_v41 = vunpack.c.h.b16 %v1582_v49  ;;  %5827 = vst [vmem:[#allocation81_spill] sm:$0xff] %v5291_v21  ;;  %v1407_v49 = vld [vmem:[#allocation2 + $0xa8] sm:$0xff] }
 0x29f   : > { %1903 = vmatpush.bf16.msrb.mxu2 %v3765_v8  ;;  %v5239_v8 = vld [vmem:[#allocation2 + $0x50] sm:$0xff]  ;;  %5828 = vst [vmem:[#allocation82_spill] sm:$0xff] %v5293_v19 }
 0x2a0   : > { %1992 = vmatpush.bf16.msrb.mxu3 %v3773_v9  ;;  %v5241_v9 = vld [vmem:[#allocation2 + $0x58] sm:$0xff] }
 0x2a1   : > { %5811 = vst [vmem:[#allocation65_spill] sm:$0xff] %v5241_v9 }
 0x2a3   : > { %1904 = vmatpush.bf16.msrb.mxu2 %v3764_v12  ;;  %v5247_v12 = vld [vmem:[#allocation3 + $0x50] sm:$0xff] }
 0x2a4   : > { %1993 = vmatpush.bf16.msrb.mxu3 %v3772_v13  ;;  %v5249_v13 = vld [vmem:[#allocation3 + $0x58] sm:$0xff]  ;;  %v5261_v16 = vmul.f32 %v5247_v12, %v5239_v8 }
 0x2a5   : > { %5812 = vst [vmem:[#allocation66_spill] sm:$0xff] %v5249_v13  ;;  %v5265_v17 = vmul.f32 %v5249_v13, %v5241_v9  ;;  %v1413_v9 = vld [vmem:[#allocation2 + $0xd8] sm:$0xff] }
 0x2a6   : > { %5815 = vst [vmem:[#allocation69_spill] sm:$0xff] %v5261_v16 }
 0x2a7   : > { %1905 = vmatpush.bf16.msrb.mxu2 %v3763_v18  ;;  %5816 = vst [vmem:[#allocation70_spill] sm:$0xff] %v5265_v17  ;;  %v1402_v18 = vld [vmem:[#allocation2 + $0x80] sm:$0xff]  ;;  %v1583_v47 = vpack.c.bf16 %v5265_v17, %v5261_v16 }
 0x2a8   : > { %1994 = vmatpush.bf16.msrb.mxu3 %v3771_v20  ;;  %v1403_v20 = vld [vmem:[#allocation2 + $0x88] sm:$0xff] }
 0x2a9   : > { %v5269_v55 = vadd.f32 %v1435_v50, %v1403_v20  ;;  %v1636_v43 = vunpack.c.l.b16 %v1583_v47  ;;  %v1637_v39 = vunpack.c.h.b16 %v1583_v47  ;;  %v5297_v47 = vmul.f32 %v5287_v26, %v5279_v37 }
 0x2aa   : > { %1906 = vmatmul.bf16.vlgmr.msrb.gmra.mxu2 %v1658_v25  ;;  %v1404_v25 = vld [vmem:[#allocation2 + $0x90] sm:$0xff] }
 0x2ab   : > { %1995 = vmatmul.bf16.vlgmr.msrb.gmra.mxu3 %v1659_v28  ;;  %v1434_v28 = vld [vmem:[#allocation3 + $0x80] sm:$0xff]  ;;  %5818 = vst [vmem:[#allocation72_spill] sm:$0xff] %v5269_v55  ;;  %v1662_v33 = vpack.c.b16 %v1636_v43, %v1634_v45  ;;  %v1663_v31 = vpack.c.b16 %v1637_v39, %v1635_v41  ;;  %v5301_v39 = vmul.f32 %v5289_v23, %v5281_v35  ;;  %v1439_v55 = vld [vmem:[#allocation3 + $0xa8] sm:$0xff] }
 0x2ac   : > { %v5267_v54 = vadd.f32 %v1434_v28, %v1402_v18  ;;  %5829 = vst [vmem:[#allocation83_spill] sm:$0xff] %v5297_v47  ;;  %v5305_v41 = vmul.f32 %v5291_v21, %v5283_v29  ;;  %v5309_v43 = vmul.f32 %v5293_v19, %v5285_v27  ;;  %v1406_v45 = vld [vmem:[#allocation2 + $0xa0] sm:$0xff]  ;;  %v5313_v23 = vadd.f32 %v1439_v55, %v1407_v49 }
 0x2ad   : > { %5830 = vst [vmem:[#allocation84_spill] sm:$0xff] %v5301_v39  ;;  %v1584_v19 = vpack.c.bf16 %v5301_v39, %v5297_v47  ;;  %v5323_v13 = vmul.f32 %v1434_v28, %v1402_v18  ;;  %v1411_v39 = vld [vmem:[#allocation2 + $0xc8] sm:$0xff]  ;;  %v1412_v47 = vld [vmem:[#allocation2 + $0xd0] sm:$0xff] }
 0x2ae   : > { %5817 = vst [vmem:[#allocation71_spill] sm:$0xff] %v5267_v54  ;;  %v1409_v54 = vld [vmem:[#allocation2 + $0xb8] sm:$0xff]  ;;  %v1585_v27 = vpack.c.bf16 %v5309_v43, %v5305_v41 }
 0x2af   : > { %5831 = vst [vmem:[#allocation85_spill] sm:$0xff] %v5305_v41  ;;  %v1638_v29 = vunpack.c.l.b16 %v1584_v19  ;;  %v1639_v17 = vunpack.c.h.b16 %v1584_v19  ;;  %v1443_v41 = vld [vmem:[#allocation3 + $0xc8] sm:$0xff]  ;;  %v1444_v19 = vld [vmem:[#allocation3 + $0xd0] sm:$0xff] }
 0x2b0   : > { %5832 = vst [vmem:[#allocation86_spill] sm:$0xff] %v5309_v43  ;;  %v1640_v37 = vunpack.c.l.b16 %v1585_v27  ;;  %v1641_v16 = vunpack.c.h.b16 %v1585_v27  ;;  %v1442_v43 = vld [vmem:[#allocation3 + $0xc0] sm:$0xff]  ;;  %v1445_v27 = vld [vmem:[#allocation3 + $0xd8] sm:$0xff] }
 0x2b1   : > { %5834 = vst [vmem:[#allocation88_spill] sm:$0xff] %v5313_v23  ;;  %v5325_v23 = vmul.f32 %v1435_v50, %v1403_v20 }
 0x2b2   : > { %v1664_v15 = vpack.c.b16 %v1640_v37, %v1638_v29  ;;  %v1665_v14 = vpack.c.b16 %v1641_v16, %v1639_v17  ;;  %5837 = vst [vmem:[#allocation91_spill] sm:$0xff] %v5323_v13  ;;  %v5333_v37 = vadd.f32 %v1443_v41, %v1411_v39 }
 0x2b3   : > { %5838 = vst [vmem:[#allocation92_spill] sm:$0xff] %v5325_v23  ;;  %v1586_v16 = vpack.c.bf16 %v5325_v23, %v5323_v13  ;;  %v1416_v23 = vld [vmem:[#allocation2 + $0xf0] sm:$0xff]  ;;  %v1417_v13 = vld [vmem:[#allocation2 + $0xf8] sm:$0xff] }
 0x2b4   : > { %5842 = vst [vmem:[#allocation96_spill] sm:$0xff] %v5333_v37  ;;  %v1414_v37 = vld [vmem:[#allocation2 + $0xe0] sm:$0xff] }
 0x2b5   : > { %v1642_v18 = vunpack.c.l.b16 %v1586_v16 }
 0x2ba   : > { %1911 = vmatmul.bf16.gmra.mxu2 %v1660_v58  ;;  %v5271_v58 = vadd.f32 %v1436_v52, %v1404_v25 }
 0x2bb   : > { %2000 = vmatmul.bf16.gmra.mxu3 %v1661_v59  ;;  %v5273_v59 = vadd.f32 %v1437_v53, %v1405_v51 }
 0x2bc   : > { %5819 = vst [vmem:[#allocation73_spill] sm:$0xff] %v5271_v58  ;;  %v1438_v58 = vld [vmem:[#allocation3 + $0xa0] sm:$0xff] }
 0x2bd   : > { %5820 = vst [vmem:[#allocation74_spill] sm:$0xff] %v5273_v59  ;;  %v1408_v59 = vld [vmem:[#allocation2 + $0xb0] sm:$0xff]  ;;  %v5311_v26 = vadd.f32 %v1438_v58, %v1406_v45 }
 0x2bf   : > { %5833 = vst [vmem:[#allocation87_spill] sm:$0xff] %v5311_v26  ;;  %v1410_v26 = vld [vmem:[#allocation2 + $0xc0] sm:$0xff] }
 0x2c0   : > { %v5331_v29 = vadd.f32 %v1442_v43, %v1410_v26 }
 0x2c2   : > { %5841 = vst [vmem:[#allocation95_spill] sm:$0xff] %v5331_v29  ;;  %v1415_v29 = vld [vmem:[#allocation2 + $0xe8] sm:$0xff] }
 0x2ca   : > { %1916 = vmatmul.bf16.gmra.mxu2 %v1662_v33  ;;  %v1440_v33 = vld [vmem:[#allocation3 + $0xb0] sm:$0xff] }
 0x2cb   : > { %2005 = vmatmul.bf16.gmra.mxu3 %v1663_v31  ;;  %v1441_v31 = vld [vmem:[#allocation3 + $0xb8] sm:$0xff]  ;;  %v5315_v35 = vadd.f32 %v1440_v33, %v1408_v59 }
 0x2cc   : > { %v5317_v21 = vadd.f32 %v1441_v31, %v1409_v54 }
 0x2cd   : > { %5835 = vst [vmem:[#allocation89_spill] sm:$0xff] %v5315_v35  ;;  %v5327_v35 = vmul.f32 %v1436_v52, %v1404_v25  ;;  %v1643_v25 = vunpack.c.h.b16 %v1586_v16  ;;  %v5343_v52 = vmul.f32 %v1438_v58, %v1406_v45  ;;  %v1448_v16 = vld [vmem:[#allocation3 + $0xf0] sm:$0xff] }
 0x2ce   : > { %5836 = vst [vmem:[#allocation90_spill] sm:$0xff] %v5317_v21  ;;  %v5329_v21 = vmul.f32 %v1437_v53, %v1405_v51  ;;  %v5345_v53 = vmul.f32 %v1439_v55, %v1407_v49  ;;  %v5355_v45 = vadd.f32 %v1448_v16, %v1416_v23 }
 0x2cf   : > { %5839 = vst [vmem:[#allocation93_spill] sm:$0xff] %v5327_v35 }
 0x2d0   : > { %5840 = vst [vmem:[#allocation94_spill] sm:$0xff] %v5329_v21  ;;  %v1587_v17 = vpack.c.bf16 %v5329_v21, %v5327_v35  ;;  %v1446_v21 = vld [vmem:[#allocation3 + $0xe0] sm:$0xff]  ;;  %v1447_v35 = vld [vmem:[#allocation3 + $0xe8] sm:$0xff] }
 0x2d1   : > { %v5353_v58 = vadd.f32 %v1447_v35, %v1415_v29  ;;  %5848 = vst [vmem:[#allocation102_spill] sm:$0xff] %v5355_v45  ;;  %v5365_v45 = vmul.f32 %v1443_v41, %v1411_v39  ;;  %v3783_v39 = vld [vmem:[#allocation14 + $0x20] sm:$0xff] }
 0x2d2   : > { %v1644_v20 = vunpack.c.l.b16 %v1587_v17  ;;  %v1645_v28 = vunpack.c.h.b16 %v1587_v17  ;;  %v1449_v17 = vld [vmem:[#allocation3 + $0xf8] sm:$0xff] }
 0x2d3   : > { %5847 = vst [vmem:[#allocation101_spill] sm:$0xff] %v5353_v58  ;;  %v5357_v55 = vadd.f32 %v1449_v17, %v1417_v13  ;;  %v5369_v58 = vmul.f32 %v1445_v27, %v1413_v9 }
 0x2d4   : > { %v1666_v50 = vpack.c.b16 %v1644_v20, %v1642_v18  ;;  %v1667_v51 = vpack.c.b16 %v1645_v28, %v1643_v25  ;;  %v5351_v18 = vadd.f32 %v1446_v21, %v1414_v37 }
 0x2d5   : > { %5849 = vst [vmem:[#allocation103_spill] sm:$0xff] %v5357_v55  ;;  %v5367_v55 = vmul.f32 %v1444_v19, %v1412_v47 }
 0x2d6   : > { %5846 = vst [vmem:[#allocation100_spill] sm:$0xff] %v5351_v18  ;;  %v3785_v18 = vld [vmem:[#allocation14 + $0x30] sm:$0xff] }
 0x2da   : > { %1921 = vmatmul.bf16.gmra.mxu2 %v1664_v15  ;;  %v5335_v15 = vadd.f32 %v1444_v19, %v1412_v47  ;;  %v5375_v19 = vmul.f32 %v1446_v21, %v1414_v37 }
 0x2db   : > { %2010 = vmatmul.bf16.gmra.mxu3 %v1665_v14  ;;  %v5337_v14 = vadd.f32 %v1445_v27, %v1413_v9  ;;  %v3782_v9 = vld [vmem:[#allocation14 + $0x18] sm:$0xff]  ;;  %v5377_v27 = vmul.f32 %v1447_v35, %v1415_v29  ;;  %v3779_v35 = vld [vmem:[#allocation14] sm:$0xff] }
 0x2dc   : > { %5843 = vst [vmem:[#allocation97_spill] sm:$0xff] %v5335_v15  ;;  %v5347_v15 = vmul.f32 %v1440_v33, %v1408_v59 }
 0x2dd   : > { %5844 = vst [vmem:[#allocation98_spill] sm:$0xff] %v5337_v14  ;;  %v5349_v14 = vmul.f32 %v1441_v31, %v1409_v54  ;;  %v1588_v54 = vpack.c.bf16 %v5345_v53, %v5343_v52 }
 0x2df   : > { %5845 = vst [vmem:[#allocation99_spill] sm:$0xff] %v5349_v14  ;;  %v1589_v59 = vpack.c.bf16 %v5349_v14, %v5347_v15  ;;  %v1646_v49 = vunpack.c.l.b16 %v1588_v54  ;;  %v1647_v31 = vunpack.c.h.b16 %v1588_v54  ;;  %v1591_v54 = vpack.c.bf16 %v5369_v58, %v5367_v55 }
 0x2e1   : > { %v1648_v33 = vunpack.c.l.b16 %v1589_v59  ;;  %v1649_v20 = vunpack.c.h.b16 %v1589_v59  ;;  %v1652_v59 = vunpack.c.l.b16 %v1591_v54 }
 0x2e3   : > { %v1668_v25 = vpack.c.b16 %v1648_v33, %v1646_v49  ;;  %v1669_v28 = vpack.c.b16 %v1649_v20, %v1647_v31  ;;  %v1653_v33 = vunpack.c.h.b16 %v1591_v54  ;;  %v5379_v31 = vmul.f32 %v1448_v16, %v1416_v23  ;;  %v3781_v20 = vld [vmem:[#allocation14 + $0x10] sm:$0xff] }
 0x2ea   : > { %1926 = vmatmul.bf16.gmra.mxu2 %v1666_v50  ;;  %v5363_v50 = vmul.f32 %v1442_v43, %v1410_v26  ;;  %v3784_v26 = vld [vmem:[#allocation14 + $0x28] sm:$0xff] }
 0x2eb   : > { %2015 = vmatmul.bf16.gmra.mxu3 %v1667_v51  ;;  %v3786_v51 = vld [vmem:[#allocation14 + $0x38] sm:$0xff] }
 0x2ec   : > { %2152 = vmatpush.bf16.msrb.mxu0 %v3786_v51  ;;  %v1590_v14 = vpack.c.bf16 %v5365_v45, %v5363_v50 }
 0x2ee   : > { %v1650_v43 = vunpack.c.l.b16 %v1590_v14  ;;  %v1651_v49 = vunpack.c.h.b16 %v1590_v14  ;;  %v1592_v14 = vpack.c.bf16 %v5377_v27, %v5375_v19 }
 0x2f0   : > { %2153 = vmatpush.bf16.msrb.mxu0 %v3785_v18  ;;  %v1670_v47 = vpack.c.b16 %v1652_v59, %v1650_v43  ;;  %v1671_v41 = vpack.c.b16 %v1653_v33, %v1651_v49  ;;  %v5381_v18 = vmul.f32 %v1449_v17, %v1417_v13  ;;  %v1654_v21 = vunpack.c.l.b16 %v1592_v14 }
 0x2f1   : > { %v1655_v51 = vunpack.c.h.b16 %v1592_v14 }
 0x2f4   : > { %2154 = vmatpush.bf16.msrb.mxu0 %v3784_v26 }
 0x2f8   : > { %2155 = vmatpush.bf16.msrb.mxu0 %v3783_v39 }
 0x2fa   : > { %1931 = vmatmul.bf16.gmra.mxu2 %v1668_v25  ;;  %v1593_v25 = vpack.c.bf16 %v5381_v18, %v5379_v31 }
 0x2fb   : > { %2020 = vmatmul.bf16.gmra.mxu3 %v1669_v28  ;;  %v3780_v28 = vld [vmem:[#allocation14 + $0x8] sm:$0xff] }
 0x2fc   : > { %2156 = vmatpush.bf16.msrb.mxu0 %v3782_v9  ;;  %v1656_v37 = vunpack.c.l.b16 %v1593_v25  ;;  %v1657_v54 = vunpack.c.h.b16 %v1593_v25 }
 0x2fe   : > { %v1672_v23 = vpack.c.b16 %v1656_v37, %v1654_v21  ;;  %v1673_v29 = vpack.c.b16 %v1657_v54, %v1655_v51 }
 0x300   : > { %2157 = vmatpush.bf16.msrb.mxu0 %v3781_v20 }
 0x304   : > { %2158 = vmatpush.bf16.msrb.mxu0 %v3780_v28 }
 0x308   : > { %2159 = vmatpush.bf16.msrb.mxu0 %v3779_v35 }
 0x30a   : > { %1936 = vmatmul.bf16.gmra.mxu2 %v1670_v47 }
 0x30b   : > { %2025 = vmatmul.bf16.gmra.mxu3 %v1671_v41 }
 0x31a   : > { %1941 = vmatmul.bf16.gmra.mxu2 %v1672_v23 }
 0x31b   : > { %2030 = vmatmul.bf16.gmra.mxu3 %v1673_v29 }
 0x32d   : > { %v1907_v13 = vpop.f32.mrf.mxu2 }
 0x32e   : > { %v1996_v16 = vpop.f32.mrf.mxu3 }
 0x32f   : > { %v1997_v43 = vadd.f32 %v1996_v16, %v1907_v13 }
 0x335   : > { %v1909_v17 = vpop.f32.mrf.mxu2 }
 0x336   : > { %v1998_v26 = vpop.f32.mrf.mxu3 }
 0x337   : > { %v1999_v59 = vadd.f32 %v1998_v26, %v1909_v17 }
 0x339   : > { %v2076_v49 = vpack.c.bf16 %v1999_v59, %v1997_v43 }
 0x33b   : > { %2160 = vmatmul.bf16.vlgmr.msrb.gmra.mxu0 %v2076_v49 }
 0x33d   : > { %v1912_v33 = vpop.f32.mrf.mxu2 }
 0x33e   : > { %v2001_v39 = vpop.f32.mrf.mxu3 }
 0x33f   : > { %v2002_v9 = vadd.f32 %v2001_v39, %v1912_v33 }
 0x345   : > { %v1914_v47 = vpop.f32.mrf.mxu2 }
 0x346   : > { %v2003_v41 = vpop.f32.mrf.mxu3 }
 0x347   : > { %v2004_v20 = vadd.f32 %v2003_v41, %v1914_v47 }
 0x349   : > { %v2077_v14 = vpack.c.bf16 %v2004_v20, %v2002_v9 }
 0x34b   : > { %2165 = vmatmul.bf16.gmra.mxu0 %v2077_v14 }
 0x34d   : > { %v1917_v25 = vpop.f32.mrf.mxu2 }
 0x34e   : > { %v2006_v28 = vpop.f32.mrf.mxu3 }
 0x34f   : > { %v2007_v51 = vadd.f32 %v2006_v28, %v1917_v25  ;;  %v1482_v25 = vadd.f32 %v5171_v0, %v5163_v60  ;;  %v1483_v28 = vadd.f32 %v5173_v1, %v5165_v61  ;;  %v1517_v60 = vmul.f32 2.0, %v5193_v7 }
 0x355   : > { %v1919_v21 = vpop.f32.mrf.mxu2 }
 0x356   : > { %v2008_v37 = vpop.f32.mrf.mxu3 }
 0x357   : > { %v2009_v54 = vadd.f32 %v2008_v37, %v1919_v21  ;;  %v1484_v21 = vadd.f32 %v5175_v2, %v5167_v62  ;;  %v1485_v37 = vadd.f32 %v5177_v3, %v5169_v63  ;;  %v3793_v63 = vld [vmem:[#allocation16 + $0x30] sm:$0xff] }
 0x359   : > { %v2078_v35 = vpack.c.bf16 %v2009_v54, %v2007_v51  ;;  %v1549_v2 = vsub.f32 %v1485_v37, %v1517_v60  ;;  %v1518_v37 = vmul.f32 2.0, %v5217_v42 }
 0x35b   : > { %2170 = vmatmul.bf16.gmra.mxu0 %v2078_v35  ;;  %v3794_v35 = vld [vmem:[#allocation16 + $0x38] sm:$0xff] }
 0x35c   : > { %2293 = vmatpush.bf16.msrb.mxu1 %v3794_v35 }
 0x35d   : > { %v1922_v23 = vpop.f32.mrf.mxu2 }
 0x35e   : > { %v2011_v29 = vpop.f32.mrf.mxu3 }
 0x35f   : > { %v2012_v17 = vadd.f32 %v2011_v29, %v1922_v23  ;;  %v1514_v23 = vmul.f32 2.0, %v5181_v4  ;;  %v1515_v29 = vmul.f32 2.0, %v5185_v5 }
 0x360   : > { %2294 = vmatpush.bf16.msrb.mxu1 %v3793_v63  ;;  %v5850_v63 = vld [vmem:[#allocation65_spill] sm:$0xff] }
 0x361   : > { %v1546_v61 = vsub.f32 %v1482_v25, %v1514_v23  ;;  %v1547_v1 = vsub.f32 %v1483_v28, %v1515_v29 }
 0x363   : > { %v1594_v3 = vpack.c.bf16 %v1547_v1, %v1546_v61  ;;  %v3788_v61 = vld [vmem:[#allocation16 + $0x8] sm:$0xff]  ;;  %v3787_v1 = vld [vmem:[#allocation16] sm:$0xff] }
 0x365   : > { %v1924_v13 = vpop.f32.mrf.mxu2  ;;  %v1706_v4 = vunpack.c.l.b16 %v1594_v3  ;;  %v1707_v5 = vunpack.c.h.b16 %v1594_v3  ;;  %v5851_v3 = vld [vmem:[#allocation66_spill] sm:$0xff] }
 0x366   : > { %v2013_v16 = vpop.f32.mrf.mxu3 }
 0x367   : > { %v2014_v26 = vadd.f32 %v2013_v16, %v1924_v13  ;;  %v1516_v13 = vmul.f32 2.0, %v5189_v6  ;;  %v3792_v6 = vld [vmem:[#allocation16 + $0x28] sm:$0xff] }
 0x368   : > { %2295 = vmatpush.bf16.msrb.mxu1 %v3792_v6  ;;  %v5853_v6 = vld [vmem:[#allocation68_spill] sm:$0xff] }
 0x369   : > { %v2079_v43 = vpack.c.bf16 %v2014_v26, %v2012_v17  ;;  %v1548_v62 = vsub.f32 %v1484_v21, %v1516_v13  ;;  %v3790_v21 = vld [vmem:[#allocation16 + $0x18] sm:$0xff] }
 0x36b   : > { %2175 = vmatmul.bf16.gmra.mxu0 %v2079_v43  ;;  %v1595_v26 = vpack.c.bf16 %v1549_v2, %v1548_v62  ;;  %v1490_v62 = vadd.f32 %v5243_v10, %v5235_v56  ;;  %v1491_v2 = vadd.f32 %v5245_v11, %v5237_v57 }
 0x36d   : > { %v1927_v59 = vpop.f32.mrf.mxu2  ;;  %v1708_v43 = vunpack.c.l.b16 %v1595_v26 }
 0x36e   : > { %v2016_v49 = vpop.f32.mrf.mxu3 }
 0x36f   : > { %v2017_v47 = vadd.f32 %v2016_v49, %v1927_v59  ;;  %v1709_v59 = vunpack.c.h.b16 %v1595_v26  ;;  %v1493_v26 = vadd.f32 %v5851_v3, %v5850_v63 }
 0x375   : > { %v1929_v33 = vpop.f32.mrf.mxu2 }
 0x376   : > { %v2018_v39 = vpop.f32.mrf.mxu3 }
 0x377   : > { %v2019_v41 = vadd.f32 %v2018_v39, %v1929_v33  ;;  %v1738_v33 = vpack.c.b16 %v1708_v43, %v1706_v4  ;;  %v1739_v39 = vpack.c.b16 %v1709_v59, %v1707_v5  ;;  %v5852_v5 = vld [vmem:[#allocation67_spill] sm:$0xff] }
 0x378   : > { %v1522_v59 = vmul.f32 2.0, %v5852_v5 }
 0x379   : > { %v2080_v9 = vpack.c.bf16 %v2019_v41, %v2017_v47  ;;  %1946 = vmatmul.bf16.gmra.mxu2 %v1738_v33  ;;  %2035 = vmatmul.bf16.gmra.mxu3 %v1739_v39  ;;  %v3791_v47 = vld [vmem:[#allocation16 + $0x20] sm:$0xff]  ;;  %v1486_v41 = vadd.f32 %v5207_v34, %v5199_v22  ;;  %v1521_v22 = vmul.f32 2.0, %v5229_v48  ;;  %v5855_v39 = vld [vmem:[#allocation70_spill] sm:$0xff] }
 0x37a   : > { %2296 = vmatpush.bf16.msrb.mxu1 %v3791_v47  ;;  %v1525_v47 = vmul.f32 2.0, %v5855_v39 }
 0x37b   : > { %2180 = vmatmul.bf16.gmra.mxu0 %v2080_v9  ;;  %v1487_v9 = vadd.f32 %v5209_v36, %v5201_v24  ;;  %v1550_v24 = vsub.f32 %v1486_v41, %v1518_v37  ;;  %v1554_v41 = vsub.f32 %v1490_v62, %v1522_v59 }
 0x37d   : > { %v1932_v20 = vpop.f32.mrf.mxu2 }
 0x37e   : > { %v2021_v14 = vpop.f32.mrf.mxu3  ;;  %2297 = vmatpush.bf16.msrb.mxu1 %v3790_v21 }
 0x37f   : > { %v2022_v0 = vadd.f32 %v2021_v14, %v1932_v20  ;;  %v1488_v20 = vadd.f32 %v5211_v38, %v5203_v30  ;;  %v1489_v14 = vadd.f32 %v5213_v40, %v5205_v32  ;;  %v3789_v32 = vld [vmem:[#allocation16 + $0x10] sm:$0xff] }
 0x381   : > { %v1553_v30 = vsub.f32 %v1489_v14, %v1521_v22  ;;  %v5857_v22 = vld [vmem:[#allocation79_spill] sm:$0xff] }
 0x382   : > { %2298 = vmatpush.bf16.msrb.mxu1 %v3789_v32  ;;  %v5862_v32 = vld [vmem:[#allocation78_spill] sm:$0xff] }
 0x385   : > { %v1934_v51 = vpop.f32.mrf.mxu2 }
 0x386   : > { %v2023_v54 = vpop.f32.mrf.mxu3  ;;  %2299 = vmatpush.bf16.msrb.mxu1 %v3788_v61 }
 0x387   : > { %v2024_v16 = vadd.f32 %v2023_v54, %v1934_v51  ;;  %v1519_v51 = vmul.f32 2.0, %v5221_v44  ;;  %v1520_v54 = vmul.f32 2.0, %v5225_v46 }
 0x389   : > { %v2081_v17 = vpack.c.bf16 %v2024_v16, %v2022_v0  ;;  %v1551_v36 = vsub.f32 %v1487_v9, %v1519_v51  ;;  %v1552_v23 = vsub.f32 %v1488_v20, %v1520_v54  ;;  %v1557_v9 = vsub.f32 %v1493_v26, %v1525_v47  ;;  %v5856_v54 = vld [vmem:[#allocation75_spill] sm:$0xff] }
 0x38a   : > { %2300 = vmatpush.bf16.msrb.mxu1 %v3787_v1  ;;  %v5438_v26 = vld [vmem:[%s5868_s6] ss:$0 sm:$0xff]  ;;  %s5910_s6 = sld [smem:[#allocation125_spill]] }
 0x38b   : > { %2185 = vmatmul.bf16.gmra.mxu0 %v2081_v17  ;;  %v1596_v40 = vpack.c.bf16 %v1551_v36, %v1550_v24  ;;  %v1597_v29 = vpack.c.bf16 %v1553_v30, %v1552_v23  ;;  %v1492_v17 = vadd.f32 %v5247_v12, %v5239_v8  ;;  %v5859_v24 = vld [vmem:[#allocation80_spill] sm:$0xff]  ;;  %v5860_v23 = vld [vmem:[#allocation77_spill] sm:$0xff]  ;;  %v5869_v47 = vld [vmem:[#allocation91_spill] sm:$0xff] }
 0x38c   : > { %v5861_v30 = vld [vmem:[#allocation81_spill] sm:$0xff] }
 0x38d   : > { %v1937_v49 = vpop.f32.mrf.mxu2  ;;  %v1710_v13 = vunpack.c.l.b16 %v1596_v40  ;;  %v1712_v42 = vunpack.c.l.b16 %v1597_v29  ;;  %v1711_v60 = vunpack.c.h.b16 %v1596_v40  ;;  %v1713_v44 = vunpack.c.h.b16 %v1597_v29  ;;  %v5863_v40 = vld [vmem:[#allocation82_spill] sm:$0xff] }
 0x38e   : > { %v2026_v7 = vpop.f32.mrf.mxu3  ;;  %v1497_v29 = vadd.f32 %v5863_v40, %v5862_v32 }
 0x38f   : > { %v2027_v34 = vadd.f32 %v2026_v7, %v1937_v49  ;;  %v1740_v48 = vpack.c.b16 %v1712_v42, %v1710_v13  ;;  %v1741_v16 = vpack.c.b16 %v1713_v44, %v1711_v60  ;;  %v1523_v49 = vmul.f32 2.0, %v5853_v6  ;;  %v5854_v7 = vld [vmem:[#allocation69_spill] sm:$0xff]  ;;  %v5864_v13 = vld [vmem:[#allocation83_spill] sm:$0xff]  ;;  %v5865_v60 = vld [vmem:[#allocation84_spill] sm:$0xff] }
 0x390   : > { %v1524_v33 = vmul.f32 2.0, %v5854_v7  ;;  %v1526_v42 = vmul.f32 2.0, %v5864_v13  ;;  %v1527_v44 = vmul.f32 2.0, %v5865_v60 }
 0x391   : > { %1951 = vmatmul.bf16.gmra.mxu2 %v1740_v48  ;;  %2040 = vmatmul.bf16.gmra.mxu3 %v1741_v16  ;;  %v1555_v57 = vsub.f32 %v1491_v2, %v1523_v49  ;;  %v5867_v48 = vld [vmem:[#allocation86_spill] sm:$0xff] }
 0x392   : > { %v1556_v11 = vsub.f32 %v1492_v17, %v1524_v33  ;;  %v1529_v16 = vmul.f32 2.0, %v5867_v48  ;;  %v5877_v48 = vld [vmem:[#allocation99_spill] sm:$0xff] }
 0x393   : > { %v1598_v12 = vpack.c.bf16 %v1555_v57, %v1554_v41  ;;  %v5871_v57 = vld [vmem:[#allocation93_spill] sm:$0xff] }
 0x394   : > { %v1599_v20 = vpack.c.bf16 %v1557_v9, %v1556_v11  ;;  %v1561_v17 = vsub.f32 %v1497_v29, %v1529_v16  ;;  %v1532_v11 = vmul.f32 2.0, %v5871_v57  ;;  %v5872_v9 = vld [vmem:[#allocation94_spill] sm:$0xff]  ;;  %v1537_v16 = vmul.f32 2.0, %v5877_v48 }
 0x395   : > { %v1939_v25 = vpop.f32.mrf.mxu2  ;;  %v1714_v14 = vunpack.c.l.b16 %v1598_v12  ;;  %v1538_v57 = vmul.f32 2.0, %v5363_v50  ;;  %v3818_v48 = vld [vmem:[#allocation20 + $0x38] sm:$0xff] }
 0x396   : > { %v2028_v28 = vpop.f32.mrf.mxu3  ;;  %v1717_v21 = vunpack.c.h.b16 %v1599_v20  ;;  %2700 = vmatpush.bf16.msra.mxu2 %v3818_v48 }
 0x397   : > { %v2029_v35 = vadd.f32 %v2028_v28, %v1939_v25  ;;  %v1716_v25 = vunpack.c.l.b16 %v1599_v20  ;;  %v1715_v28 = vunpack.c.h.b16 %v1598_v12 }
 0x399   : > { %v2082_v38 = vpack.c.bf16 %v2029_v35, %v2027_v34  ;;  %v1742_v37 = vpack.c.b16 %v1716_v25, %v1714_v14  ;;  %v1743_v51 = vpack.c.b16 %v1717_v21, %v1715_v28  ;;  %v1494_v34 = vadd.f32 %v5857_v22, %v5856_v54  ;;  %v5858_v35 = vld [vmem:[#allocation76_spill] sm:$0xff]  ;;  %v5873_v25 = vld [vmem:[#allocation71_spill] sm:$0xff]  ;;  %v5876_v22 = vld [vmem:[#allocation74_spill] sm:$0xff] }
 0x39a   : > { %v1495_v36 = vadd.f32 %v5859_v24, %v5858_v35  ;;  %v5874_v21 = vld [vmem:[#allocation72_spill] sm:$0xff] }
 0x39b   : > { %2190 = vmatmul.bf16.gmra.mxu0 %v2082_v38  ;;  %v1496_v38 = vadd.f32 %v5861_v30, %v5860_v23  ;;  %v1558_v1 = vsub.f32 %v1494_v34, %v1526_v42 }
 0x39c   : > { %v1559_v62 = vsub.f32 %v1495_v36, %v1527_v44  ;;  %v1534_v44 = vmul.f32 2.0, %v5343_v52 }
 0x39d   : > { %v1942_v46 = vpop.f32.mrf.mxu2 }
 0x39e   : > { %v2031_v0 = vpop.f32.mrf.mxu3  ;;  %v1600_v63 = vpack.c.bf16 %v1559_v62, %v1558_v1 }
 0x39f   : > { %v2032_v56 = vadd.f32 %v2031_v0, %v1942_v46  ;;  %v5866_v46 = vld [vmem:[#allocation85_spill] sm:$0xff] }
 0x3a0   : > { %v1528_v0 = vmul.f32 2.0, %v5866_v46  ;;  %v1719_v5 = vunpack.c.h.b16 %v1600_v63  ;;  %v1535_v46 = vmul.f32 2.0, %v5345_v53 }
 0x3a1   : > { %1956 = vmatmul.bf16.gmra.mxu2 %v1742_v37  ;;  %2045 = vmatmul.bf16.gmra.mxu3 %v1743_v51  ;;  %v5875_v51 = vld [vmem:[#allocation73_spill] sm:$0xff] }
 0x3a2   : > { %v1560_v2 = vsub.f32 %v1496_v38, %v1528_v0  ;;  %v1564_v54 = vsub.f32 %v5875_v51, %v1532_v11  ;;  %v1536_v0 = vmul.f32 2.0, %v5347_v15  ;;  %v1539_v11 = vmul.f32 2.0, %v5365_v45  ;;  %v5884_v51 = vld [vmem:[#allocation97_spill] sm:$0xff]  ;;  %v3810_v45 = vld [vmem:[#allocation19 + $0x38] sm:$0xff] }
 0x3a3   : > { %2559 = vmatpush.bf16.msra.mxu1 %v3810_v45 }
 0x3a4   : > { %v1601_v3 = vpack.c.bf16 %v1561_v17, %v1560_v2  ;;  %v5878_v2 = vld [vmem:[#allocation87_spill] sm:$0xff] }
 0x3a5   : > { %v1944_v4 = vpop.f32.mrf.mxu2  ;;  %v1566_v17 = vsub.f32 %v5878_v2, %v1534_v44  ;;  %v1545_v44 = vmul.f32 2.0, %v5381_v18 }
 0x3a6   : > { %v2033_v43 = vpop.f32.mrf.mxu3  ;;  %v1721_v59 = vunpack.c.h.b16 %v1601_v3 }
 0x3a7   : > { %v2034_v10 = vadd.f32 %v2033_v43, %v1944_v4  ;;  %v1718_v4 = vunpack.c.l.b16 %v1600_v63  ;;  %v1720_v43 = vunpack.c.l.b16 %v1601_v3  ;;  %v5879_v63 = vld [vmem:[#allocation88_spill] sm:$0xff] }
 0x3a8   : > { %v1745_v49 = vpack.c.b16 %v1721_v59, %v1719_v5  ;;  %v1567_v3 = vsub.f32 %v5879_v63, %v1535_v46  ;;  %v5881_v5 = vld [vmem:[#allocation90_spill] sm:$0xff] }
 0x3a9   : > { %v2083_v8 = vpack.c.bf16 %v2034_v10, %v2032_v56  ;;  %v1744_v6 = vpack.c.b16 %v1720_v43, %v1718_v4  ;;  %v1530_v56 = vmul.f32 2.0, %v5869_v47  ;;  %v5870_v10 = vld [vmem:[#allocation92_spill] sm:$0xff]  ;;  %v5880_v4 = vld [vmem:[#allocation89_spill] sm:$0xff]  ;;  %v1569_v59 = vsub.f32 %v5881_v5, %v1537_v16 }
 0x3aa   : > { %v1531_v41 = vmul.f32 2.0, %v5870_v10  ;;  %v1568_v43 = vsub.f32 %v5880_v4, %v1536_v0  ;;  %v1604_v52 = vpack.c.bf16 %v1567_v3, %v1566_v17  ;;  %v5888_v17 = vld [vmem:[#allocation102_spill] sm:$0xff]  ;;  %v5889_v3 = vld [vmem:[#allocation103_spill] sm:$0xff] }
 0x3ab   : > { %2195 = vmatmul.bf16.gmra.mxu0 %v2083_v8  ;;  %v1533_v8 = vmul.f32 2.0, %v5872_v9  ;;  %v1562_v28 = vsub.f32 %v5873_v25, %v1530_v56  ;;  %v1540_v9 = vmul.f32 2.0, %v5367_v55  ;;  %v5882_v25 = vld [vmem:[#allocation95_spill] sm:$0xff] }
 0x3ac   : > { %v1563_v37 = vsub.f32 %v5874_v21, %v1531_v41  ;;  %v1726_v53 = vunpack.c.l.b16 %v1604_v52  ;;  %v1727_v15 = vunpack.c.h.b16 %v1604_v52  ;;  %v5883_v21 = vld [vmem:[#allocation96_spill] sm:$0xff] }
 0x3ad   : > { %v1565_v34 = vsub.f32 %v5876_v22, %v1533_v8  ;;  %v1541_v8 = vmul.f32 2.0, %v5369_v58  ;;  %v5885_v22 = vld [vmem:[#allocation98_spill] sm:$0xff] }
 0x3ae   : > { %v1602_v24 = vpack.c.bf16 %v1563_v37, %v1562_v28  ;;  %v1570_v28 = vsub.f32 %v5882_v25, %v1538_v57  ;;  %v1571_v37 = vsub.f32 %v5883_v21, %v1539_v11  ;;  %v3806_v21 = vld [vmem:[#allocation19 + $0x18] sm:$0xff] }
 0x3af   : > { %v1603_v36 = vpack.c.bf16 %v1565_v34, %v1564_v54  ;;  %v1572_v54 = vsub.f32 %v5884_v51, %v1540_v9  ;;  %v1573_v34 = vsub.f32 %v5885_v22, %v1541_v8  ;;  %v3802_v9 = vld [vmem:[#allocation17 + $0x38] sm:$0xff]  ;;  %v3807_v8 = vld [vmem:[#allocation19 + $0x20] sm:$0xff]  ;;  %v3800_v22 = vld [vmem:[#allocation17 + $0x28] sm:$0xff] }
 0x3b0   : > { %v1722_v23 = vunpack.c.l.b16 %v1602_v24  ;;  %v1723_v38 = vunpack.c.h.b16 %v1602_v24  ;;  %v1606_v50 = vpack.c.bf16 %v1571_v37, %v1570_v28  ;;  %2434 = vmatpush.bf16.msra.mxu0 %v3802_v9  ;;  %v3801_v28 = vld [vmem:[#allocation17 + $0x30] sm:$0xff] }
 0x3b1   : > { %1961 = vmatmul.bf16.gmra.mxu2 %v1744_v6  ;;  %2050 = vmatmul.bf16.gmra.mxu3 %v1745_v49  ;;  %v1724_v30 = vunpack.c.l.b16 %v1603_v36  ;;  %v1725_v32 = vunpack.c.h.b16 %v1603_v36  ;;  %v1605_v49 = vpack.c.bf16 %v1569_v59, %v1568_v43  ;;  %v1607_v24 = vpack.c.bf16 %v1573_v34, %v1572_v54  ;;  %v3805_v34 = vld [vmem:[#allocation19 + $0x10] sm:$0xff] }
 0x3b2   : > { %v1730_v36 = vunpack.c.l.b16 %v1606_v50 }
 0x3b3   : > { %v1746_v40 = vpack.c.b16 %v1724_v30, %v1722_v23  ;;  %v1747_v29 = vpack.c.b16 %v1725_v32, %v1723_v38  ;;  %v1732_v55 = vunpack.c.l.b16 %v1607_v24  ;;  %v1731_v23 = vunpack.c.h.b16 %v1606_v50  ;;  %v3804_v50 = vld [vmem:[#allocation19 + $0x8] sm:$0xff] }
 0x3b4   : > { %v1733_v58 = vunpack.c.h.b16 %v1607_v24  ;;  %2435 = vmatpush.bf16.msra.mxu0 %v3801_v28 }
 0x3b5   : > { %v1750_v30 = vpack.c.b16 %v1732_v55, %v1730_v36 }
 0x3b6   : > { %v1751_v38 = vpack.c.b16 %v1733_v58, %v1731_v23  ;;  %v3798_v58 = vld [vmem:[#allocation17 + $0x18] sm:$0xff] }
 0x3b8   : > { %v2161_v61 = vpop.f32.mrf.mxu0  ;;  %2436 = vmatpush.bf16.msra.mxu0 %v3800_v22 }
 0x3b9   : > { %v2162_v7 = vadd.f32 %v5438_v26, %v2161_v61 }
 0x3bb   : > { %v2201_v12 = vmax.f32 %v2162_v7, 0.0  ;;  %v1728_v7 = vunpack.c.l.b16 %v1605_v49 }
 0x3c0   : > { %v2163_v33 = vpop.f32.mrf.mxu0 }
 0x3c1   : > { %v2164_v39 = vadd.f32 %v5438_v26, %v2163_v33  ;;  %1966 = vmatmul.bf16.gmra.mxu2 %v1746_v40  ;;  %2055 = vmatmul.bf16.gmra.mxu3 %v1747_v29  ;;  %v1729_v33 = vunpack.c.h.b16 %v1605_v49 }
 0x3c3   : > { %v2202_v20 = vmax.f32 %v2164_v39, 0.0  ;;  %v1748_v39 = vpack.c.b16 %v1728_v7, %v1726_v53  ;;  %v1749_v47 = vpack.c.b16 %v1729_v33, %v1727_v15 }
 0x3c5   : > { %v2217_v14 = vpack.c.bf16 %v2202_v20, %v2201_v12 }
 0x3c7   : > { %2301 = vmatmul.bf16.vlgmr.msrb.gmra.mxu1 %v2217_v14 }
 0x3c8   : > { %v2166_v35 = vpop.f32.mrf.mxu0 }
 0x3c9   : > { %v2167_v13 = vadd.f32 %v5438_v26, %v2166_v35 }
 0x3cb   : > { %v2203_v61 = vmax.f32 %v2167_v13, 0.0  ;;  %v1542_v13 = vmul.f32 2.0, %v5375_v19  ;;  %v1577_v19 = vsub.f32 %v5889_v3, %v1545_v44 }
 0x3d0   : > { %v2168_v42 = vpop.f32.mrf.mxu0 }
 0x3d1   : > { %v2169_v60 = vadd.f32 %v5438_v26, %v2168_v42  ;;  %1971 = vmatmul.bf16.gmra.mxu2 %v1748_v39  ;;  %2060 = vmatmul.bf16.gmra.mxu3 %v1749_v47  ;;  %v1543_v42 = vmul.f32 2.0, %v5377_v27 }
 0x3d3   : > { %v2204_v1 = vmax.f32 %v2169_v60, 0.0  ;;  %v1544_v60 = vmul.f32 2.0, %v5379_v31  ;;  %v3809_v31 = vld [vmem:[#allocation19 + $0x30] sm:$0xff] }
 0x3d4   : > { %2560 = vmatpush.bf16.msra.mxu1 %v3809_v31 }
 0x3d5   : > { %v2218_v62 = vpack.c.bf16 %v2204_v1, %v2203_v61  ;;  %v5886_v61 = vld [vmem:[#allocation100_spill] sm:$0xff]  ;;  %v1576_v63 = vsub.f32 %v5888_v17, %v1544_v60 }
 0x3d6   : > { %v1574_v1 = vsub.f32 %v5886_v61, %v1542_v13 }
 0x3d7   : > { %2306 = vmatmul.bf16.gmra.mxu1 %v2218_v62  ;;  %v5887_v62 = vld [vmem:[#allocation101_spill] sm:$0xff]  ;;  %v1609_v43 = vpack.c.bf16 %v1577_v19, %v1576_v63  ;;  %v3816_v63 = vld [vmem:[#allocation20 + $0x28] sm:$0xff] }
 0x3d8   : > { %v2171_v6 = vpop.f32.mrf.mxu0  ;;  %v1575_v2 = vsub.f32 %v5887_v62, %v1543_v42  ;;  %v3796_v42 = vld [vmem:[#allocation17 + $0x8] sm:$0xff] }
 0x3d9   : > { %v2172_v56 = vadd.f32 %v5438_v26, %v2171_v6  ;;  %v1736_v18 = vunpack.c.l.b16 %v1609_v43  ;;  %v1737_v6 = vunpack.c.h.b16 %v1609_v43 }
 0x3da   : > { %v1608_v27 = vpack.c.bf16 %v1575_v2, %v1574_v1 }
 0x3db   : > { %v2205_v12 = vmax.f32 %v2172_v56, 0.0 }
 0x3dc   : > { %v1734_v5 = vunpack.c.l.b16 %v1608_v27  ;;  %v1735_v59 = vunpack.c.h.b16 %v1608_v27 }
 0x3de   : > { %v1752_v52 = vpack.c.b16 %v1736_v18, %v1734_v5  ;;  %v1753_v49 = vpack.c.b16 %v1737_v6, %v1735_v59  ;;  %v5491_v5 = vld [vmem:[%s5890_s24] ss:$0 sm:$0xff]  ;;  %s5911_s24 = sld [smem:[#allocation124_spill]] }
 0x3e0   : > { %v2173_v10 = vpop.f32.mrf.mxu0 }
 0x3e1   : > { %v2174_v41 = vadd.f32 %v5438_v26, %v2173_v10  ;;  %1976 = vmatmul.bf16.gmra.mxu2 %v1750_v30  ;;  %2065 = vmatmul.bf16.gmra.mxu3 %v1751_v38  ;;  %v3808_v10 = vld [vmem:[#allocation19 + $0x28] sm:$0xff]  ;;  %v3803_v30 = vld [vmem:[#allocation19] sm:$0xff] }
 0x3e2   : > { %2561 = vmatpush.bf16.msra.mxu1 %v3808_v10 }
 0x3e3   : > { %v2206_v20 = vmax.f32 %v2174_v41, 0.0 }
 0x3e5   : > { %v2219_v14 = vpack.c.bf16 %v2206_v20, %v2205_v12 }
 0x3e6   : > { %2562 = vmatpush.bf16.msra.mxu1 %v3807_v8 }
 0x3e7   : > { %2311 = vmatmul.bf16.gmra.mxu1 %v2219_v14  ;;  %v3817_v14 = vld [vmem:[#allocation20 + $0x30] sm:$0xff] }
 0x3e8   : > { %v2176_v35 = vpop.f32.mrf.mxu0  ;;  %2701 = vmatpush.bf16.msra.mxu2 %v3817_v14 }
 0x3e9   : > { %v2177_v32 = vadd.f32 %v5438_v26, %v2176_v35  ;;  %v3799_v35 = vld [vmem:[#allocation17 + $0x20] sm:$0xff] }
 0x3ea   : > { %2563 = vmatpush.bf16.msra.mxu1 %v3806_v21  ;;  %2437 = vmatpush.bf16.msra.mxu0 %v3799_v35 }
 0x3eb   : > { %v2207_v46 = vmax.f32 %v2177_v32, 0.0 }
 0x3ec   : > { %2702 = vmatpush.bf16.msra.mxu2 %v3816_v63  ;;  %v3826_v63 = vld [vmem:[#allocation22 + $0x38] sm:$0xff] }
 0x3ed   : > { %2841 = vmatpush.bf16.msra.mxu3 %v3826_v63 }
 0x3ee   : > { %2564 = vmatpush.bf16.msra.mxu1 %v3805_v34  ;;  %2438 = vmatpush.bf16.msra.mxu0 %v3798_v58 }
 0x3f0   : > { %v2178_v40 = vpop.f32.mrf.mxu0 }
 0x3f1   : > { %v2179_v29 = vadd.f32 %v5438_v26, %v2178_v40  ;;  %1981 = vmatmul.bf16.gmra.mxu2 %v1752_v52  ;;  %2070 = vmatmul.bf16.gmra.mxu3 %v1753_v49 }
 0x3f2   : > { %2565 = vmatpush.bf16.msra.mxu1 %v3804_v50 }
 0x3f3   : > { %v2208_v0 = vmax.f32 %v2179_v29, 0.0  ;;  %v3797_v29 = vld [vmem:[#allocation17 + $0x10] sm:$0xff] }
 0x3f4   : > { %2439 = vmatpush.bf16.msra.mxu0 %v3797_v29 }
 0x3f5   : > { %v2220_v16 = vpack.c.bf16 %v2208_v0, %v2207_v46  ;;  %v3795_v46 = vld [vmem:[#allocation17] sm:$0xff] }
 0x3f6   : > { %2566 = vmatpush.bf16.msra.mxu1 %v3803_v30 }
 0x3f7   : > { %2316 = vmatmul.bf16.gmra.mxu1 %v2220_v16 }
 0x3f8   : > { %v2181_v4 = vpop.f32.mrf.mxu0  ;;  %2440 = vmatpush.bf16.msra.mxu0 %v3796_v42 }
 0x3f9   : > { %v2182_v53 = vadd.f32 %v5438_v26, %v2181_v4 }
 0x3fb   : > { %v2209_v33 = vmax.f32 %v2182_v53, 0.0 }
 0x3fc   : > { %v1947_v37 = vpop.f32.mrf.mxu2  ;;  %v2036_v54 = vpop.f32.mrf.mxu3  ;;  %2441 = vmatpush.bf16.msra.mxu0 %v3795_v46 }
 0x3fd   : > { %v2037_v4 = vadd.f32 %v2036_v54, %v1947_v37 }
 0x400   : > { %v2183_v7 = vpop.f32.mrf.mxu0 }
 0x401   : > { %v2184_v15 = vadd.f32 %v5438_v26, %v2183_v7 }
 0x403   : > { %v2210_v39 = vmax.f32 %v2184_v15, 0.0 }
 0x404   : > { %v1949_v55 = vpop.f32.mrf.mxu2  ;;  %v2038_v23 = vpop.f32.mrf.mxu3 }
 0x405   : > { %v2221_v47 = vpack.c.bf16 %v2210_v39, %v2209_v33  ;;  %v2039_v27 = vadd.f32 %v2038_v23, %v1949_v55 }
 0x407   : > { %2321 = vmatmul.bf16.gmra.mxu1 %v2221_v47  ;;  %v2483_v31 = vpack.c.bf16 %v2039_v27, %v2037_v4 }
 0x408   : > { %v2186_v56 = vpop.f32.mrf.mxu0 }
 0x409   : > { %v2187_v41 = vadd.f32 %v5438_v26, %v2186_v56 }
 0x40b   : > { %v2211_v12 = vmax.f32 %v2187_v41, 0.0  ;;  %v3815_v41 = vld [vmem:[#allocation20 + $0x20] sm:$0xff] }
 0x40c   : > { %2703 = vmatpush.bf16.msra.mxu2 %v3815_v41 }
 0x410   : > { %v2188_v57 = vpop.f32.mrf.mxu0 }
 0x411   : > { %v2189_v11 = vadd.f32 %v5438_v26, %v2188_v57 }
 0x413   : > { %v2212_v20 = vmax.f32 %v2189_v11, 0.0 }
 0x414   : > { %v1952_v60 = vpop.f32.mrf.mxu2  ;;  %v2041_v44 = vpop.f32.mrf.mxu3 }
 0x415   : > { %v2222_v25 = vpack.c.bf16 %v2212_v20, %v2211_v12  ;;  %v2042_v7 = vadd.f32 %v2041_v44, %v1952_v60 }
 0x417   : > { %2326 = vmatmul.bf16.gmra.mxu1 %v2222_v25 }
 0x418   : > { %v2191_v51 = vpop.f32.mrf.mxu0 }
 0x419   : > { %v2192_v24 = vadd.f32 %v5438_v26, %v2191_v51 }
 0x41b   : > { %v2213_v38 = vmax.f32 %v2192_v24, 0.0 }
 0x41c   : > { %v1954_v2 = vpop.f32.mrf.mxu2  ;;  %v2043_v17 = vpop.f32.mrf.mxu3 }
 0x41d   : > { %v2044_v15 = vadd.f32 %v2043_v17, %v1954_v2 }
 0x41f   : > { %v2484_v10 = vpack.c.bf16 %v2044_v15, %v2042_v7 }
 0x420   : > { %v2193_v45 = vpop.f32.mrf.mxu0 }
 0x421   : > { %v2194_v36 = vadd.f32 %v5438_v26, %v2193_v45 }
 0x423   : > { %v2214_v32 = vmax.f32 %v2194_v36, 0.0 }
 0x424   : > { %v1957_v3 = vpop.f32.mrf.mxu2  ;;  %v2046_v19 = vpop.f32.mrf.mxu3 }
 0x425   : > { %v2223_v40 = vpack.c.bf16 %v2214_v32, %v2213_v38  ;;  %v2047_v25 = vadd.f32 %v2046_v19, %v1957_v3 }
 0x427   : > { %2331 = vmatmul.bf16.gmra.mxu1 %v2223_v40  ;;  %v3814_v40 = vld [vmem:[#allocation20 + $0x18] sm:$0xff] }
 0x428   : > { %v2196_v13 = vpop.f32.mrf.mxu0  ;;  %2704 = vmatpush.bf16.msra.mxu2 %v3814_v40 }
 0x429   : > { %v2197_v0 = vadd.f32 %v5438_v26, %v2196_v13 }
 0x42b   : > { %v2215_v61 = vmax.f32 %v2197_v0, 0.0 }
 0x42c   : > { %v2048_v18 = vpop.f32.mrf.mxu3 }
 0x430   : > { %v2198_v48 = vpop.f32.mrf.mxu0 }
 0x431   : > { %v2199_v16 = vadd.f32 %v5438_v26, %v2198_v48  ;;  %v1959_v26 = vpop.f32.mrf.mxu2 }
 0x432   : > { %v2049_v28 = vadd.f32 %v2048_v18, %v1959_v26 }
 0x433   : > { %v2216_v1 = vmax.f32 %v2199_v16, 0.0 }
 0x434   : > { %v2051_v56 = vpop.f32.mrf.mxu3  ;;  %v2485_v51 = vpack.c.bf16 %v2049_v28, %v2047_v25  ;;  %v3812_v25 = vld [vmem:[#allocation20 + $0x8] sm:$0xff] }
 0x435   : > { %v2224_v62 = vpack.c.bf16 %v2216_v1, %v2215_v61 }
 0x437   : > { %2336 = vmatmul.bf16.gmra.mxu1 %v2224_v62 }
 0x439   : > { %v1962_v39 = vpop.f32.mrf.mxu2 }
 0x43a   : > { %v2052_v36 = vadd.f32 %v2051_v56, %v1962_v39 }
 0x43c   : > { %v2053_v12 = vpop.f32.mrf.mxu3 }
 0x441   : > { %v1964_v8 = vpop.f32.mrf.mxu2 }
 0x442   : > { %v2054_v55 = vadd.f32 %v2053_v12, %v1964_v8 }
 0x444   : > { %v2302_v43 = vpop.f32.mrf.mxu1  ;;  %v2056_v22 = vpop.f32.mrf.mxu3  ;;  %v2486_v32 = vpack.c.bf16 %v2054_v55, %v2052_v36 }
 0x445   : > { %v2303_v59 = vadd.f32 %v5491_v5, %v2302_v43 }
 0x447   : > { %2567 = vmatmul.bf16.vlgmr.msra.gmra.mxu1 %v2483_v31  ;;  %v2342_v49 = vmax.f32 %v2303_v59, 0.0 }
 0x449   : > { %v1967_v54 = vpop.f32.mrf.mxu2 }
 0x44a   : > { %v2057_v48 = vadd.f32 %v2056_v22, %v1967_v54  ;;  %v3811_v22 = vld [vmem:[#allocation20] sm:$0xff] }
 0x44c   : > { %v2304_v6 = vpop.f32.mrf.mxu1  ;;  %v2058_v30 = vpop.f32.mrf.mxu3 }
 0x44d   : > { %v2305_v52 = vadd.f32 %v5491_v5, %v2304_v6 }
 0x44f   : > { %v2343_v53 = vmax.f32 %v2305_v52, 0.0 }
 0x451   : > { %v2358_v33 = vpack.c.bf16 %v2343_v53, %v2342_v49  ;;  %v1969_v58 = vpop.f32.mrf.mxu2  ;;  %v3813_v53 = vld [vmem:[#allocation20 + $0x10] sm:$0xff] }
 0x452   : > { %v2059_v16 = vadd.f32 %v2058_v30, %v1969_v58  ;;  %2705 = vmatpush.bf16.msra.mxu2 %v3813_v53 }
 0x453   : > { %2442 = vmatmul.bf16.vlgmr.msra.gmra.mxu0 %v2358_v33 }
 0x454   : > { %v2307_v47 = vpop.f32.mrf.mxu1  ;;  %v2061_v60 = vpop.f32.mrf.mxu3  ;;  %v2487_v62 = vpack.c.bf16 %v2059_v16, %v2057_v48 }
 0x455   : > { %v2308_v57 = vadd.f32 %v5491_v5, %v2307_v47 }
 0x456   : > { %2706 = vmatpush.bf16.msra.mxu2 %v3812_v25 }
 0x457   : > { %2572 = vmatmul.bf16.gmra.mxu1 %v2484_v10  ;;  %v2344_v20 = vmax.f32 %v2308_v57, 0.0 }
 0x459   : > { %v1972_v13 = vpop.f32.mrf.mxu2 }
 0x45a   : > { %v2062_v18 = vadd.f32 %v2061_v60, %v1972_v13  ;;  %2707 = vmatpush.bf16.msra.mxu2 %v3811_v22  ;;  %v5512_v13 = vld [vmem:[%s5684_s13] ss:$0 sm:$0xff] }
 0x45c   : > { %v2309_v11 = vpop.f32.mrf.mxu1  ;;  %v2063_v17 = vpop.f32.mrf.mxu3 }
 0x45d   : > { %v2310_v9 = vadd.f32 %v5491_v5, %v2309_v11 }
 0x45f   : > { %v2345_v14 = vmax.f32 %v2310_v9, 0.0 }
 0x461   : > { %v2359_v21 = vpack.c.bf16 %v2345_v14, %v2344_v20  ;;  %v1974_v2 = vpop.f32.mrf.mxu2  ;;  %v3825_v14 = vld [vmem:[#allocation22 + $0x30] sm:$0xff] }
 0x462   : > { %v2064_v59 = vadd.f32 %v2063_v17, %v1974_v2  ;;  %2842 = vmatpush.bf16.msra.mxu3 %v3825_v14 }
 0x463   : > { %2447 = vmatmul.bf16.gmra.mxu0 %v2359_v21 }
 0x464   : > { %v2312_v37 = vpop.f32.mrf.mxu1  ;;  %v2066_v26 = vpop.f32.mrf.mxu3  ;;  %v2488_v49 = vpack.c.bf16 %v2064_v59, %v2062_v18 }
 0x465   : > { %v2313_v34 = vadd.f32 %v5491_v5, %v2312_v37 }
 0x467   : > { %2577 = vmatmul.bf16.gmra.mxu1 %v2485_v51  ;;  %v2346_v24 = vmax.f32 %v2313_v34, 0.0 }
 0x469   : > { %v1977_v31 = vpop.f32.mrf.mxu2 }
 0x46a   : > { %v2067_v41 = vadd.f32 %v2066_v26, %v1977_v31 }
 0x46c   : > { %v2314_v35 = vpop.f32.mrf.mxu1  ;;  %v2068_v15 = vpop.f32.mrf.mxu3 }
 0x46d   : > { %v2315_v50 = vadd.f32 %v5491_v5, %v2314_v35 }
 0x46f   : > { %v2347_v45 = vmax.f32 %v2315_v50, 0.0 }
 0x471   : > { %v2360_v23 = vpack.c.bf16 %v2347_v45, %v2346_v24  ;;  %v1979_v7 = vpop.f32.mrf.mxu2 }
 0x472   : > { %v2069_v57 = vadd.f32 %v2068_v15, %v1979_v7 }
 0x473   : > { %2452 = vmatmul.bf16.gmra.mxu0 %v2360_v23 }
 0x474   : > { %v2317_v38 = vpop.f32.mrf.mxu1  ;;  %v2071_v8 = vpop.f32.mrf.mxu3  ;;  %v2489_v20 = vpack.c.bf16 %v2069_v57, %v2067_v41 }
 0x475   : > { %v2318_v29 = vadd.f32 %v5491_v5, %v2317_v38 }
 0x477   : > { %2582 = vmatmul.bf16.gmra.mxu1 %v2486_v32  ;;  %v2348_v46 = vmax.f32 %v2318_v29, 0.0 }
 0x479   : > { %v1982_v9 = vpop.f32.mrf.mxu2 }
 0x47a   : > { %v2072_v50 = vadd.f32 %v2071_v8, %v1982_v9 }
 0x47c   : > { %v2319_v42 = vpop.f32.mrf.mxu1  ;;  %v2073_v54 = vpop.f32.mrf.mxu3 }
 0x47d   : > { %v2320_v44 = vadd.f32 %v5491_v5, %v2319_v42  ;;  %v3824_v42 = vld [vmem:[#allocation22 + $0x28] sm:$0xff] }
 0x47e   : > { %2843 = vmatpush.bf16.msra.mxu3 %v3824_v42 }
 0x47f   : > { %v2349_v0 = vmax.f32 %v2320_v44, 0.0 }
 0x481   : > { %v2361_v61 = vpack.c.bf16 %v2349_v0, %v2348_v46  ;;  %v1984_v51 = vpop.f32.mrf.mxu2 }
 0x482   : > { %v2074_v24 = vadd.f32 %v2073_v54, %v1984_v51 }
 0x483   : > { %2457 = vmatmul.bf16.gmra.mxu0 %v2361_v61 }
 0x484   : > { %v2322_v1 = vpop.f32.mrf.mxu1  ;;  %v2490_v55 = vpack.c.bf16 %v2074_v24, %v2072_v50 }
 0x485   : > { %v2323_v3 = vadd.f32 %v5491_v5, %v2322_v1 }
 0x487   : > { %2587 = vmatmul.bf16.gmra.mxu1 %v2487_v62  ;;  %v2350_v27 = vmax.f32 %v2323_v3, 0.0 }
 0x48c   : > { %v2324_v19 = vpop.f32.mrf.mxu1 }
 0x48d   : > { %v2325_v4 = vadd.f32 %v5491_v5, %v2324_v19  ;;  %v3823_v19 = vld [vmem:[#allocation22 + $0x20] sm:$0xff] }
 0x48e   : > { %2844 = vmatpush.bf16.msra.mxu3 %v3823_v19 }
 0x48f   : > { %v2351_v43 = vmax.f32 %v2325_v4, 0.0 }
 0x491   : > { %v2362_v6 = vpack.c.bf16 %v2351_v43, %v2350_v27 }
 0x493   : > { %2462 = vmatmul.bf16.gmra.mxu0 %v2362_v6 }
 0x494   : > { %v2327_v52 = vpop.f32.mrf.mxu1 }
 0x495   : > { %v2328_v33 = vadd.f32 %v5491_v5, %v2327_v52 }
 0x497   : > { %2592 = vmatmul.bf16.gmra.mxu1 %v2488_v49  ;;  %v2352_v56 = vmax.f32 %v2328_v33, 0.0 }
 0x49c   : > { %v2329_v39 = vpop.f32.mrf.mxu1 }
 0x49d   : > { %v2330_v47 = vadd.f32 %v5491_v5, %v2329_v39  ;;  %v3822_v39 = vld [vmem:[#allocation22 + $0x18] sm:$0xff] }
 0x49e   : > { %2845 = vmatpush.bf16.msra.mxu3 %v3822_v39 }
 0x49f   : > { %v2353_v10 = vmax.f32 %v2330_v47, 0.0 }
 0x4a1   : > { %v2363_v11 = vpack.c.bf16 %v2353_v10, %v2352_v56 }
 0x4a3   : > { %2467 = vmatmul.bf16.gmra.mxu0 %v2363_v11 }
 0x4a4   : > { %v2332_v12 = vpop.f32.mrf.mxu1 }
 0x4a5   : > { %v2333_v28 = vadd.f32 %v5491_v5, %v2332_v12 }
 0x4a7   : > { %2597 = vmatmul.bf16.gmra.mxu1 %v2489_v20  ;;  %v2354_v34 = vmax.f32 %v2333_v28, 0.0 }
 0x4ac   : > { %v2334_v21 = vpop.f32.mrf.mxu1 }
 0x4ad   : > { %v2335_v37 = vadd.f32 %v5491_v5, %v2334_v21  ;;  %v3821_v21 = vld [vmem:[#allocation22 + $0x10] sm:$0xff] }
 0x4ae   : > { %2846 = vmatpush.bf16.msra.mxu3 %v3821_v21  ;;  %v3831_v21 = vld [vmem:[#allocation26 + $0x20] sm:$0xff] }
 0x4af   : > { %v2355_v35 = vmax.f32 %v2335_v37, 0.0 }
 0x4b1   : > { %v2364_v45 = vpack.c.bf16 %v2355_v35, %v2354_v34 }
 0x4b3   : > { %2472 = vmatmul.bf16.gmra.mxu0 %v2364_v45 }
 0x4b4   : > { %v2337_v36 = vpop.f32.mrf.mxu1 }
 0x4b5   : > { %v2338_v23 = vadd.f32 %v5491_v5, %v2337_v36 }
 0x4b7   : > { %2602 = vmatmul.bf16.gmra.mxu1 %v2490_v55  ;;  %v2356_v38 = vmax.f32 %v2338_v23, 0.0  ;;  %v3820_v55 = vld [vmem:[#allocation22 + $0x8] sm:$0xff] }
 0x4b8   : > { %2847 = vmatpush.bf16.msra.mxu3 %v3820_v55 }
 0x4bc   : > { %v2339_v58 = vpop.f32.mrf.mxu1 }
 0x4bd   : > { %v2340_v30 = vadd.f32 %v5491_v5, %v2339_v58 }
 0x4bf   : > { %v2357_v32 = vmax.f32 %v2340_v30, 0.0 }
 0x4c1   : > { %v2365_v40 = vpack.c.bf16 %v2357_v32, %v2356_v38  ;;  %v3819_v38 = vld [vmem:[#allocation22] sm:$0xff] }
 0x4c2   : > { %2848 = vmatpush.bf16.msra.mxu3 %v3819_v38  ;;  %v3828_v38 = vld [vmem:[#allocation26 + $0x8] sm:$0xff] }
 0x4c3   : > { %2477 = vmatmul.bf16.gmra.mxu0 %v2365_v40 }
 0x4c4   : > { %v2568_v29 = vpop.f32.mrf.mxu1 }
 0x4c5   : > { %v2569_v60 = vadd.f32 %v5512_v13, %v2568_v29  ;;  %v5533_v29 = vld [vmem:[%s5686_s15] ss:$0 sm:$0xff] }
 0x4c7   : > { %v2608_v0 = vmax.f32 %v2569_v60, 0.0 }
 0x4cc   : > { %v2570_v44 = vpop.f32.mrf.mxu1 }
 0x4cd   : > { %v2571_v46 = vadd.f32 %v5512_v13, %v2570_v44 }
 0x4cf   : > { %v2609_v48 = vmax.f32 %v2571_v46, 0.0 }
 0x4d1   : > { %v2624_v5 = vpack.c.bf16 %v2609_v48, %v2608_v0 }
 0x4d3   : > { %2708 = vmatmul.bf16.vlgmr.msra.gmra.mxu2 %v2624_v5 }
 0x4d4   : > { %v2573_v16 = vpop.f32.mrf.mxu1 }
 0x4d5   : > { %v2574_v61 = vadd.f32 %v5512_v13, %v2573_v16 }
 0x4d7   : > { %v2610_v2 = vmax.f32 %v2574_v61, 0.0 }
 0x4dc   : > { %v2575_v1 = vpop.f32.mrf.mxu1 }
 0x4dd   : > { %v2576_v62 = vadd.f32 %v5512_v13, %v2575_v1 }
 0x4df   : > { %v2611_v17 = vmax.f32 %v2576_v62, 0.0 }
 0x4e1   : > { %v2625_v63 = vpack.c.bf16 %v2611_v17, %v2610_v2 }
 0x4e3   : > { %2713 = vmatmul.bf16.gmra.mxu2 %v2625_v63 }
 0x4e4   : > { %v2578_v3 = vpop.f32.mrf.mxu1 }
 0x4e5   : > { %v2579_v4 = vadd.f32 %v5512_v13, %v2578_v3 }
 0x4e7   : > { %v2612_v31 = vmax.f32 %v2579_v4, 0.0 }
 0x4ec   : > { %v2580_v27 = vpop.f32.mrf.mxu1 }
 0x4ed   : > { %v2581_v43 = vadd.f32 %v5512_v13, %v2580_v27 }
 0x4ef   : > { %v2613_v26 = vmax.f32 %v2581_v43, 0.0 }
 0x4f1   : > { %v2626_v18 = vpack.c.bf16 %v2613_v26, %v2612_v31 }
 0x4f3   : > { %2718 = vmatmul.bf16.gmra.mxu2 %v2626_v18 }
 0x4f4   : > { %v2583_v59 = vpop.f32.mrf.mxu1 }
 0x4f5   : > { %v2584_v6 = vadd.f32 %v5512_v13, %v2583_v59 }
 0x4f7   : > { %v2614_v53 = vmax.f32 %v2584_v6, 0.0 }
 0x4fc   : > { %v2585_v52 = vpop.f32.mrf.mxu1 }
 0x4fd   : > { %v2586_v49 = vadd.f32 %v5512_v13, %v2585_v52 }
 0x4ff   : > { %v2615_v7 = vmax.f32 %v2586_v49, 0.0 }
 0x501   : > { %v2627_v15 = vpack.c.bf16 %v2615_v7, %v2614_v53  ;;  %v3834_v7 = vld [vmem:[#allocation26 + $0x38] sm:$0xff] }
 0x502   : > { %3016 = vmatpush.bf16.msrb.mxu0 %v3834_v7 }
 0x503   : > { %2723 = vmatmul.bf16.gmra.mxu2 %v2627_v15 }
 0x504   : > { %v2588_v33 = vpop.f32.mrf.mxu1 }
 0x505   : > { %v2589_v47 = vadd.f32 %v5512_v13, %v2588_v33 }
 0x507   : > { %v2616_v41 = vmax.f32 %v2589_v47, 0.0 }
 0x50c   : > { %v2590_v56 = vpop.f32.mrf.mxu1 }
 0x50d   : > { %v2591_v10 = vadd.f32 %v5512_v13, %v2590_v56 }
 0x50f   : > { %v2617_v57 = vmax.f32 %v2591_v10, 0.0 }
 0x511   : > { %v2628_v11 = vpack.c.bf16 %v2617_v57, %v2616_v41  ;;  %v3833_v57 = vld [vmem:[#allocation26 + $0x30] sm:$0xff] }
 0x512   : > { %3017 = vmatpush.bf16.msrb.mxu0 %v3833_v57  ;;  %v5896_v57 = vld [vmem:[#allocation52_spill] sm:$0xff] }
 0x513   : > { %2728 = vmatmul.bf16.gmra.mxu2 %v2628_v11 }
 0x514   : > { %v2593_v9 = vpop.f32.mrf.mxu1 }
 0x515   : > { %v2594_v8 = vadd.f32 %v5512_v13, %v2593_v9 }
 0x517   : > { %v2618_v14 = vmax.f32 %v2594_v8, 0.0 }
 0x51c   : > { %v2595_v12 = vpop.f32.mrf.mxu1 }
 0x51d   : > { %v2596_v20 = vadd.f32 %v5512_v13, %v2595_v12 }
 0x51f   : > { %v2619_v25 = vmax.f32 %v2596_v20, 0.0 }
 0x521   : > { %v2629_v28 = vpack.c.bf16 %v2619_v25, %v2618_v14  ;;  %v3832_v25 = vld [vmem:[#allocation26 + $0x28] sm:$0xff] }
 0x522   : > { %3018 = vmatpush.bf16.msrb.mxu0 %v3832_v25 }
 0x523   : > { %2733 = vmatmul.bf16.gmra.mxu2 %v2629_v28 }
 0x524   : > { %v2598_v37 = vpop.f32.mrf.mxu1 }
 0x525   : > { %v2599_v51 = vadd.f32 %v5512_v13, %v2598_v37 }
 0x526   : > { %3019 = vmatpush.bf16.msrb.mxu0 %v3831_v21 }
 0x527   : > { %v2620_v34 = vmax.f32 %v2599_v51, 0.0 }
 0x52c   : > { %v2600_v54 = vpop.f32.mrf.mxu1 }
 0x52d   : > { %v2601_v22 = vadd.f32 %v5512_v13, %v2600_v54 }
 0x52f   : > { %v2621_v35 = vmax.f32 %v2601_v22, 0.0 }
 0x531   : > { %v2630_v50 = vpack.c.bf16 %v2621_v35, %v2620_v34 }
 0x533   : > { %2738 = vmatmul.bf16.gmra.mxu2 %v2630_v50  ;;  %v2443_v50 = vpop.f32.mrf.mxu0 }
 0x534   : > { %v2603_v24 = vpop.f32.mrf.mxu1 }
 0x535   : > { %v2604_v45 = vadd.f32 %v5512_v13, %v2603_v24 }
 0x537   : > { %v2622_v58 = vmax.f32 %v2604_v45, 0.0  ;;  %v3830_v45 = vld [vmem:[#allocation26 + $0x18] sm:$0xff] }
 0x538   : > { %3020 = vmatpush.bf16.msrb.mxu0 %v3830_v45 }
 0x53c   : > { %v2605_v36 = vpop.f32.mrf.mxu1 }
 0x53d   : > { %v2606_v23 = vadd.f32 %v5512_v13, %v2605_v36  ;;  %v3829_v36 = vld [vmem:[#allocation26 + $0x10] sm:$0xff] }
 0x53e   : > { %3021 = vmatpush.bf16.msrb.mxu0 %v3829_v36 }
 0x53f   : > { %v2623_v30 = vmax.f32 %v2606_v23, 0.0  ;;  %v2445_v23 = vpop.f32.mrf.mxu0 }
 0x541   : > { %v2631_v32 = vpack.c.bf16 %v2623_v30, %v2622_v58 }
 0x542   : > { %3022 = vmatpush.bf16.msrb.mxu0 %v3828_v38 }
 0x543   : > { %2743 = vmatmul.bf16.gmra.mxu2 %v2631_v32 }
 0x556   : > { %v2709_v40 = vpop.f32.mrf.mxu2 }
 0x557   : > { %v2710_v42 = vadd.f32 %v5533_v29, %v2709_v40 }
 0x559   : > { %v2749_v46 = vmax.f32 %v2710_v42, 0.0 }
 0x55e   : > { %v2711_v60 = vpop.f32.mrf.mxu2 }
 0x55f   : > { %v2712_v44 = vadd.f32 %v5533_v29, %v2711_v60  ;;  %v3827_v60 = vld [vmem:[#allocation26] sm:$0xff] }
 0x560   : > { %3023 = vmatpush.bf16.msrb.mxu0 %v3827_v60 }
 0x561   : > { %v2750_v13 = vmax.f32 %v2712_v44, 0.0  ;;  %v2448_v44 = vpop.f32.mrf.mxu0 }
 0x563   : > { %v2765_v0 = vpack.c.bf16 %v2750_v13, %v2749_v46  ;;  %v5554_v13 = vld [vmem:[%s5891_s5] ss:$0 sm:$0xff]  ;;  %s3111_s5 = scalar_lea.sflag [#allocation10], %s5016_s0 }
 0x565   : > { %2849 = vmatmul.bf16.vlgmr.msra.gmra.mxu3 %v2765_v0 }
 0x566   : > { %v2714_v48 = vpop.f32.mrf.mxu2 }
 0x567   : > { %v2715_v5 = vadd.f32 %v5533_v29, %v2714_v48  ;;  %v2444_v48 = vadd.f32 %v5554_v13, %v2443_v50 }
 0x569   : > { %v2751_v1 = vmax.f32 %v2715_v5, 0.0  ;;  %v2450_v46 = vpop.f32.mrf.mxu0  ;;  %v5562_v5 = vstv %s2890_s17  ;;  %s3121_s17 = scalar_lea.hbm %s5912_s9, %s3740_s14 }
 0x56a   : > { %s3125_s20 = sshll.u32 %s3121_s17, 4  ;;  %s3126_s20 = int_to_ptr.hbm [resolvable:$true] %s3125_s20 }
 0x56b   : > { %s4547_s23 = sshra.s32 %s3126_s20, 4  ;;  %s4548_s23 = int_to_ptr.hbm [resolvable:$true] %s4547_s23 }
 0x56c   : > { %s4549_s1 = scalar_lea.hbm %s4548_s23, 8  ;;  %p4554_p3 = scmp.lt.s32.totalorder %s4548_s23, %s5912_s9 }
 0x56d   : > { %p4550_p0 = scmp.ne.s32.totalorder %s4548_s23, %s4549_s1  ;;  %p4555_p12 = scmp.lt.s32.totalorder %s4553_s30, %s4549_s1 }
 0x56e   : > { %v2716_v16 = vpop.f32.mrf.mxu2 }
 0x56f   : > { %v2717_v61 = vadd.f32 %v5533_v29, %v2716_v16  ;;  %p4551_p2 = pnand %p4550_p0, %p4957_p4  ;;  %p4556_p7 = por %p4555_p12, %p4554_p3 }
 0x571   : > { %v2752_v62 = vmax.f32 %v2717_v61, 0.0  ;;  %v2453_v16 = vpop.f32.mrf.mxu0  ;;  %v2446_v61 = vadd.f32 %v5554_v13, %v2445_v23  ;;  %p4552_p1 = pneg %p4551_p2 }
 0x573   : > { %v2766_v2 = vpack.c.bf16 %v2752_v62, %v2751_v1  ;;  %v2892_v62 = vmul.f32 %v5562_v5, %v2444_v48  ;;  %p4557_p9 = pnand %p4556_p7, %p4552_p1 }
 0x575   : > { %2854 = vmatmul.bf16.gmra.mxu3 %v2766_v2 }
 0x576   : > { %v2719_v17 = vpop.f32.mrf.mxu2 }
 0x577   : > { %v2720_v63 = vadd.f32 %v5533_v29, %v2719_v17  ;;  %v2893_v17 = vmul.f32 %v5562_v5, %v2446_v61 }
 0x579   : > { %v2753_v4 = vmax.f32 %v2720_v63, 0.0 }
 0x57e   : > { %v2721_v3 = vpop.f32.mrf.mxu2 }
 0x57f   : > { %v2722_v19 = vadd.f32 %v5533_v29, %v2721_v3 }
 0x581   : > { %v2754_v27 = vmax.f32 %v2722_v19, 0.0 }
 0x583   : > { %v2767_v43 = vpack.c.bf16 %v2754_v27, %v2753_v4  ;;  %v5893_v4 = vld [vmem:[#allocation49_spill] sm:$0xff] }
 0x585   : > { %2859 = vmatmul.bf16.gmra.mxu3 %v2767_v43  ;;  %v5894_v43 = vld [vmem:[#allocation50_spill] sm:$0xff] }
 0x586   : > { %v2724_v31 = vpop.f32.mrf.mxu2 }
 0x587   : > { %v2725_v26 = vadd.f32 %v5533_v29, %v2724_v31 }
 0x589   : > { %v2755_v6 = vmax.f32 %v2725_v26, 0.0  ;;  %v2455_v26 = vpop.f32.mrf.mxu0 }
 0x58e   : > { %v2726_v18 = vpop.f32.mrf.mxu2 }
 0x58f   : > { %v2727_v59 = vadd.f32 %v5533_v29, %v2726_v18 }
 0x591   : > { %v2756_v52 = vmax.f32 %v2727_v59, 0.0  ;;  %v2458_v7 = vpop.f32.mrf.mxu0 }
 0x592   : > { %v2459_v23 = vadd.f32 %v5554_v13, %v2458_v7 }
 0x593   : > { %v2768_v49 = vpack.c.bf16 %v2756_v52, %v2755_v6  ;;  %v2449_v6 = vadd.f32 %v5554_v13, %v2448_v44  ;;  %v2451_v52 = vadd.f32 %v5554_v13, %v2450_v46 }
 0x595   : > { %2864 = vmatmul.bf16.gmra.mxu3 %v2768_v49 }
 0x596   : > { %v2729_v53 = vpop.f32.mrf.mxu2 }
 0x597   : > { %v2730_v15 = vadd.f32 %v5533_v29, %v2729_v53  ;;  %v2894_v53 = vmul.f32 %v5562_v5, %v2449_v6 }
 0x599   : > { %v2757_v47 = vmax.f32 %v2730_v15, 0.0 }
 0x59e   : > { %v2731_v33 = vpop.f32.mrf.mxu2 }
 0x59f   : > { %v2732_v39 = vadd.f32 %v5533_v29, %v2731_v33  ;;  %v2895_v33 = vmul.f32 %v5562_v5, %v2451_v52  ;;  %v5902_v52 = vld [vmem:[#allocation58_spill] sm:$0xff] }
 0x5a1   : > { %v2758_v56 = vmax.f32 %v2732_v39, 0.0 }
 0x5a3   : > { %v2769_v10 = vpack.c.bf16 %v2758_v56, %v2757_v47 }
 0x5a5   : > { %2869 = vmatmul.bf16.gmra.mxu3 %v2769_v10  ;;  %v5895_v10 = vld [vmem:[#allocation51_spill] sm:$0xff] }
 0x5a6   : > { %v2734_v41 = vpop.f32.mrf.mxu2 }
 0x5a7   : > { %v2735_v11 = vadd.f32 %v5533_v29, %v2734_v41 }
 0x5a9   : > { %v2759_v12 = vmax.f32 %v2735_v11, 0.0 }
 0x5ae   : > { %v2736_v9 = vpop.f32.mrf.mxu2 }
 0x5af   : > { %v2737_v8 = vadd.f32 %v5533_v29, %v2736_v9 }
 0x5b1   : > { %v2760_v20 = vmax.f32 %v2737_v8, 0.0 }
 0x5b3   : > { %v2770_v14 = vpack.c.bf16 %v2760_v20, %v2759_v12  ;;  %v2460_v12 = vpop.f32.mrf.mxu0  ;;  %v2454_v20 = vadd.f32 %v5554_v13, %v2453_v16  ;;  %v5900_v16 = vld [vmem:[#allocation56_spill] sm:$0xff] }
 0x5b5   : > { %2874 = vmatmul.bf16.gmra.mxu3 %v2770_v14  ;;  %v2456_v14 = vadd.f32 %v5554_v13, %v2455_v26 }
 0x5b6   : > { %v2739_v28 = vpop.f32.mrf.mxu2 }
 0x5b7   : > { %v2740_v37 = vadd.f32 %v5533_v29, %v2739_v28  ;;  %v2896_v28 = vmul.f32 %v5562_v5, %v2454_v20  ;;  %v5904_v20 = vld [vmem:[#allocation60_spill] sm:$0xff] }
 0x5b9   : > { %v2761_v22 = vmax.f32 %v2740_v37, 0.0  ;;  %v2897_v37 = vmul.f32 %v5562_v5, %v2456_v14 }
 0x5be   : > { %v2741_v51 = vpop.f32.mrf.mxu2 }
 0x5bf   : > { %v2742_v54 = vadd.f32 %v5533_v29, %v2741_v51 }
 0x5c1   : > { %v2762_v34 = vmax.f32 %v2742_v54, 0.0 }
 0x5c3   : > { %v2771_v35 = vpack.c.bf16 %v2762_v34, %v2761_v22  ;;  %v2463_v34 = vpop.f32.mrf.mxu0 }
 0x5c5   : > { %2879 = vmatmul.bf16.gmra.mxu3 %v2771_v35  ;;  %v5897_v35 = vld [vmem:[#allocation53_spill] sm:$0xff] }
 0x5c6   : > { %v2744_v24 = vpop.f32.mrf.mxu2 }
 0x5c7   : > { %v2745_v55 = vadd.f32 %v5533_v29, %v2744_v24  ;;  %v5898_v24 = vld [vmem:[#allocation54_spill] sm:$0xff] }
 0x5c9   : > { %v2763_v32 = vmax.f32 %v2745_v55, 0.0 }
 0x5cb   : > { %v2465_v38 = vpop.f32.mrf.mxu0 }
 0x5ce   : > { %v2746_v58 = vpop.f32.mrf.mxu2 }
 0x5cf   : > { %v2747_v30 = vadd.f32 %v5533_v29, %v2746_v58  ;;  %v5559_v29 = vld [vmem:[%s5892_s26] ss:$0 sm:$0xff]  ;;  %v2461_v58 = vadd.f32 %v5554_v13, %v2460_v12 }
 0x5d1   : > { %v2764_v40 = vmax.f32 %v2747_v30, 0.0 }
 0x5d3   : > { %v2772_v42 = vpack.c.bf16 %v2764_v40, %v2763_v32  ;;  %v2898_v32 = vmul.f32 %v5562_v5, %v2459_v23 }
 0x5d5   : > { %2884 = vmatmul.bf16.gmra.mxu3 %v2772_v42  ;;  %v2899_v42 = vmul.f32 %v5562_v5, %v2461_v58  ;;  %v5906_v58 = vld [vmem:[#allocation62_spill] sm:$0xff] }
 0x5e8   : > { %v2850_v0 = vpop.f32.mrf.mxu3 }
 0x5e9   : > { %v2851_v1 = vadd.f32 %v5559_v29, %v2850_v0  ;;  %v5899_v0 = vld [vmem:[#allocation55_spill] sm:$0xff] }
 0x5eb   : > { %v2908_v63 = vadd.f32 %v2892_v62, %v2851_v1  ;;  %v2468_v62 = vpop.f32.mrf.mxu0 }
 0x5ed   : > { %v2924_v27 = vadd.f32 %v2908_v63, %v5893_v4  ;;  %v2466_v63 = vadd.f32 %v5554_v13, %v2465_v38 }
 0x5f0   : > { %v2852_v2 = vpop.f32.mrf.mxu3 }
 0x5f1   : > { %v2853_v3 = vadd.f32 %v5559_v29, %v2852_v2 }
 0x5f3   : > { %v2909_v19 = vadd.f32 %v2893_v17, %v2853_v3  ;;  %v2464_v17 = vadd.f32 %v5554_v13, %v2463_v34  ;;  %v2470_v26 = vpop.f32.mrf.mxu0 }
 0x5f5   : > { %v2925_v31 = vadd.f32 %v2909_v19, %v5894_v43  ;;  %v2900_v19 = vmul.f32 %v5562_v5, %v2464_v17  ;;  %v5908_v17 = vld [vmem:[#allocation64_spill] sm:$0xff] }
 0x5f7   : > { %v2940_v18 = vpack.c.bf16 %v2925_v31, %v2924_v27  ;;  %v2901_v27 = vmul.f32 %v5562_v5, %v2466_v63 }
 0x5f8   : > { %v2855_v59 = vpop.f32.mrf.mxu3 }
 0x5f9   : > { %3024 = vmatmul.bf16.vlgmr.msrb.gmra.mxu0 %v2940_v18  ;;  %v2856_v49 = vadd.f32 %v5559_v29, %v2855_v59  ;;  %v5901_v59 = vld [vmem:[#allocation57_spill] sm:$0xff] }
 0x5fb   : > { %v2910_v39 = vadd.f32 %v2894_v53, %v2856_v49 }
 0x5fd   : > { %v2926_v41 = vadd.f32 %v2910_v39, %v5895_v10  ;;  %v2471_v39 = vadd.f32 %v5554_v13, %v2470_v26 }
 0x600   : > { %v2857_v15 = vpop.f32.mrf.mxu3 }
 0x601   : > { %v2858_v47 = vadd.f32 %v5559_v29, %v2857_v15  ;;  %v2469_v15 = vadd.f32 %v5554_v13, %v2468_v62  ;;  %v5907_v62 = vld [vmem:[#allocation63_spill] sm:$0xff] }
 0x603   : > { %v2911_v56 = vadd.f32 %v2895_v33, %v2858_v47  ;;  %v2473_v33 = vpop.f32.mrf.mxu0 }
 0x605   : > { %v2927_v11 = vadd.f32 %v2911_v56, %v5896_v57  ;;  %v2902_v56 = vmul.f32 %v5562_v5, %v2469_v15 }
 0x607   : > { %v2941_v9 = vpack.c.bf16 %v2927_v11, %v2926_v41  ;;  %v2903_v41 = vmul.f32 %v5562_v5, %v2471_v39 }
 0x608   : > { %v2860_v8 = vpop.f32.mrf.mxu3 }
 0x609   : > { %3029 = vmatmul.bf16.gmra.mxu0 %v2941_v9  ;;  %v2861_v25 = vadd.f32 %v5559_v29, %v2860_v8  ;;  %v5903_v8 = vld [vmem:[#allocation59_spill] sm:$0xff] }
 0x60b   : > { %v2912_v51 = vadd.f32 %v2896_v28, %v2861_v25  ;;  %v2475_v25 = vpop.f32.mrf.mxu0 }
 0x60d   : > { %v2928_v50 = vadd.f32 %v2912_v51, %v5897_v35  ;;  %v2476_v51 = vadd.f32 %v5554_v13, %v2475_v25 }
 0x610   : > { %v2862_v21 = vpop.f32.mrf.mxu3 }
 0x611   : > { %v2863_v54 = vadd.f32 %v5559_v29, %v2862_v21 }
 0x613   : > { %v2913_v22 = vadd.f32 %v2897_v37, %v2863_v54  ;;  %v2474_v37 = vadd.f32 %v5554_v13, %v2473_v33  ;;  %v2478_v34 = vpop.f32.mrf.mxu0 }
 0x615   : > { %v2929_v45 = vadd.f32 %v2913_v22, %v5898_v24  ;;  %v2904_v22 = vmul.f32 %v5562_v5, %v2474_v37 }
 0x617   : > { %v2942_v36 = vpack.c.bf16 %v2929_v45, %v2928_v50  ;;  %v2905_v50 = vmul.f32 %v5562_v5, %v2476_v51 }
 0x618   : > { %v2865_v55 = vpop.f32.mrf.mxu3 }
 0x619   : > { %3034 = vmatmul.bf16.gmra.mxu0 %v2942_v36  ;;  %v2866_v30 = vadd.f32 %v5559_v29, %v2865_v55  ;;  %v5905_v55 = vld [vmem:[#allocation61_spill] sm:$0xff] }
 0x61b   : > { %v2914_v60 = vadd.f32 %v2898_v32, %v2866_v30 }
 0x61d   : > { %v2930_v48 = vadd.f32 %v2914_v60, %v5899_v0 }
 0x620   : > { %v2867_v40 = vpop.f32.mrf.mxu3 }
 0x621   : > { %v2868_v44 = vadd.f32 %v5559_v29, %v2867_v40  ;;  %v2480_v40 = vpop.f32.mrf.mxu0 }
 0x622   : > { %v2481_v60 = vadd.f32 %v5554_v13, %v2480_v40 }
 0x623   : > { %v2915_v46 = vadd.f32 %v2899_v42, %v2868_v44  ;;  %v2479_v42 = vadd.f32 %v5554_v13, %v2478_v34  ;;  %v4112_v13 = vld [vmem:[%s5909_s18] ss:$0 sm:$0xff] }
 0x625   : > { %v2931_v61 = vadd.f32 %v2915_v46, %v5900_v16  ;;  %v2906_v46 = vmul.f32 %v5562_v5, %v2479_v42 }
 0x627   : > { %v2943_v1 = vpack.c.bf16 %v2931_v61, %v2930_v48  ;;  %v2907_v48 = vmul.f32 %v5562_v5, %v2481_v60 }
 0x628   : > { %v2870_v2 = vpop.f32.mrf.mxu3 }
 0x629   : > { %3039 = vmatmul.bf16.gmra.mxu0 %v2943_v1  ;;  %v2871_v3 = vadd.f32 %v5559_v29, %v2870_v2 }
 0x62b   : > { %v2916_v43 = vadd.f32 %v2900_v19, %v2871_v3 }
 0x62d   : > { %v2932_v6 = vadd.f32 %v2916_v43, %v5901_v59 }
 0x630   : > { %v2872_v4 = vpop.f32.mrf.mxu3 }
 0x631   : > { %v2873_v31 = vadd.f32 %v5559_v29, %v2872_v4 }
 0x633   : > { %v2917_v18 = vadd.f32 %v2901_v27, %v2873_v31 }
 0x635   : > { %v2933_v49 = vadd.f32 %v2917_v18, %v5902_v52 }
 0x637   : > { %v2944_v53 = vpack.c.bf16 %v2933_v49, %v2932_v6 }
 0x638   : > { %v2875_v7 = vpop.f32.mrf.mxu3 }
 0x639   : > { %3044 = vmatmul.bf16.gmra.mxu0 %v2944_v53  ;;  %v2876_v47 = vadd.f32 %v5559_v29, %v2875_v7 }
 0x63b   : > { %v2918_v57 = vadd.f32 %v2902_v56, %v2876_v47 }
 0x63d   : > { %v2934_v12 = vadd.f32 %v2918_v57, %v5903_v8 }
 0x640   : > { %v2877_v10 = vpop.f32.mrf.mxu3 }
 0x641   : > { %v2878_v11 = vadd.f32 %v5559_v29, %v2877_v10 }
 0x643   : > { %v2919_v9 = vadd.f32 %v2903_v41, %v2878_v11 }
 0x645   : > { %v2935_v14 = vadd.f32 %v2919_v9, %v5904_v20 }
 0x647   : > { %v2945_v28 = vpack.c.bf16 %v2935_v14, %v2934_v12 }
 0x648   : > { %v2880_v21 = vpop.f32.mrf.mxu3 }
 0x649   : > { %3049 = vmatmul.bf16.gmra.mxu0 %v2945_v28  ;;  %v2881_v54 = vadd.f32 %v5559_v29, %v2880_v21 }
 0x64b   : > { %v2920_v24 = vadd.f32 %v2904_v22, %v2881_v54 }
 0x64d   : > { %v2936_v23 = vadd.f32 %v2920_v24, %v5905_v55 }
 0x650   : > { %v2882_v35 = vpop.f32.mrf.mxu3 }
 0x651   : > { %v2883_v45 = vadd.f32 %v5559_v29, %v2882_v35 }
 0x653   : > { %v2921_v36 = vadd.f32 %v2905_v50, %v2883_v45 }
 0x655   : > { %v2937_v30 = vadd.f32 %v2921_v36, %v5906_v58 }
 0x657   : > { %v2946_v38 = vpack.c.bf16 %v2937_v30, %v2936_v23 }
 0x658   : > { %v2885_v32 = vpop.f32.mrf.mxu3 }
 0x659   : > { %3054 = vmatmul.bf16.gmra.mxu0 %v2946_v38  ;;  %v2886_v44 = vadd.f32 %v5559_v29, %v2885_v32 }
 0x65b   : > { %v2922_v16 = vadd.f32 %v2906_v46, %v2886_v44 }
 0x65d   : > { %v2938_v2 = vadd.f32 %v2922_v16, %v5907_v62  ;;  %v3081_v62 = vld [vmem:[%s5911_s24] sm:$0xf] }
 0x660   : > { %v2887_v0 = vpop.f32.mrf.mxu3 }
 0x661   : > { %v2888_v61 = vadd.f32 %v5559_v29, %v2887_v0 }
 0x663   : > { %v2923_v1 = vadd.f32 %v2907_v48, %v2888_v61  ;;  %v3090_v61 = vld [vmem:[%s5910_s6] sm:$0xff] }
 0x665   : > { %v2939_v63 = vadd.f32 %v2923_v1, %v5908_v17  ;;  %v4668_v1 = vmov 0  }
 0x666   : > { %4105 = vset.pattern.permute.xlu0 %v4668_v1 }
 0x667   : > { %v2947_v3 = vpack.c.bf16 %v2939_v63, %v2938_v2  ;;  %3093 = vperm.xlu0 %4105, %v3090_v61  }
 0x669   : > { %3059 = vmatmul.bf16.gmra.mxu0 %v2947_v3 }
 0x676   : > { %v3025_v19 = vpop.f32.mrf.mxu0 }
 0x677   : > { %v3026_v4 = vadd.f32 %v4112_v13, %v3025_v19 }
 0x679   : > { %v3065_v31 = vmax.f32 %v3026_v4, 0.0 }
 0x67e   : > { %v3027_v27 = vpop.f32.mrf.mxu0 }
 0x67f   : > { %v3028_v43 = vadd.f32 %v4112_v13, %v3027_v27 }
 0x681   : > { %v3066_v5 = vmax.f32 %v3028_v43, 0.0 }
 0x683   : > { %v3082_v26 = vpack.c.bf16 %v3066_v5, %v3065_v31 }
 0x686   : > { %v3030_v18 = vpop.f32.mrf.mxu0 }
 0x687   : > { %v3031_v29 = vadd.f32 %v4112_v13, %v3030_v18 }
 0x689   : > { %v3067_v52 = vmax.f32 %v3031_v29, 0.0 }
 0x68e   : > { %v3032_v59 = vpop.f32.mrf.mxu0 }
 0x68f   : > { %v3033_v6 = vadd.f32 %v4112_v13, %v3032_v59 }
 0x691   : > { %v3068_v49 = vmax.f32 %v3033_v6, 0.0 }
 0x693   : > { %v3083_v53 = vpack.c.bf16 %v3068_v49, %v3067_v52 }
 0x696   : > { %v3035_v7 = vpop.f32.mrf.mxu0 }
 0x697   : > { %v3036_v15 = vadd.f32 %v4112_v13, %v3035_v7 }
 0x699   : > { %v3069_v47 = vmax.f32 %v3036_v15, 0.0 }
 0x69e   : > { %v3037_v33 = vpop.f32.mrf.mxu0 }
 0x69f   : > { %v3038_v39 = vadd.f32 %v4112_v13, %v3037_v33 }
 0x6a1   : > { %v3070_v56 = vmax.f32 %v3038_v39, 0.0 }
 0x6a3   : > { %v3084_v10 = vpack.c.bf16 %v3070_v56, %v3069_v47 }
 0x6a6   : > { %v3040_v41 = vpop.f32.mrf.mxu0 }
 0x6a7   : > { %v3041_v57 = vadd.f32 %v4112_v13, %v3040_v41 }
 0x6a9   : > { %v3071_v8 = vmax.f32 %v3041_v57, 0.0 }
 0x6ae   : > { %v3042_v11 = vpop.f32.mrf.mxu0 }
 0x6af   : > { %v3043_v9 = vadd.f32 %v4112_v13, %v3042_v11 }
 0x6b1   : > { %v3072_v12 = vmax.f32 %v3043_v9, 0.0 }
 0x6b3   : > { %v3085_v20 = vpack.c.bf16 %v3072_v12, %v3071_v8 }
 0x6b6   : > { %v3045_v14 = vpop.f32.mrf.mxu0 }
 0x6b7   : > { %v3046_v25 = vadd.f32 %v4112_v13, %v3045_v14 }
 0x6b9   : > { %v3073_v37 = vmax.f32 %v3046_v25, 0.0 }
 0x6be   : > { %v3047_v28 = vpop.f32.mrf.mxu0 }
 0x6bf   : > { %v3048_v21 = vadd.f32 %v4112_v13, %v3047_v28 }
 0x6c1   : > { %v3074_v51 = vmax.f32 %v3048_v21, 0.0 }
 0x6c3   : > { %v3086_v54 = vpack.c.bf16 %v3074_v51, %v3073_v37 }
 0x6c6   : > { %v3050_v22 = vpop.f32.mrf.mxu0 }
 0x6c7   : > { %v3051_v46 = vadd.f32 %v4112_v13, %v3050_v22 }
 0x6c9   : > { %v3075_v48 = vmax.f32 %v3051_v46, 0.0 }
 0x6ce   : > { %v3052_v34 = vpop.f32.mrf.mxu0 }
 0x6cf   : > { %v3053_v60 = vadd.f32 %v4112_v13, %v3052_v34 }
 0x6d1   : > { %v3076_v0 = vmax.f32 %v3053_v60, 0.0 }
 0x6d3   : > { %v3087_v16 = vpack.c.bf16 %v3076_v0, %v3075_v48 }
 0x6d6   : > { %v3055_v35 = vpop.f32.mrf.mxu0 }
 0x6d7   : > { %v3056_v32 = vadd.f32 %v4112_v13, %v3055_v35 }
 0x6d9   : > { %v3077_v42 = vmax.f32 %v3056_v32, 0.0  ;;  %v3094_v2 = vpop.permute.xlu0 %3093 }
 0x6de   : > { %v3057_v50 = vpop.f32.mrf.mxu0 }
 0x6df   : > { %v3058_v30 = vadd.f32 %v4112_v13, %v3057_v50 }
 0x6e1   : > { %v3078_v40 = vmax.f32 %v3058_v30, 0.0 }
 0x6e3   : > { %v3088_v44 = vpack.c.bf16 %v3078_v40, %v3077_v42 }
 0x6e6   : > { %v3060_v24 = vpop.f32.mrf.mxu0 }
 0x6e7   : > { %v3061_v45 = vadd.f32 %v4112_v13, %v3060_v24 }
 0x6e9   : > { %v3079_v23 = vmax.f32 %v3061_v45, 0.0 }
 0x6ee   : > { %v3062_v36 = vpop.f32.mrf.mxu0 }
 0x6ef   : > { %v3063_v55 = vadd.f32 %v4112_v13, %v3062_v36 }
 0x6f1   : > { %v3080_v58 = vmax.f32 %v3063_v55, 0.0 }
 0x6f3   : > { %v3089_v38 = vpack.c.bf16 %v3080_v58, %v3079_v23 }
 0x6f5   : > { %3096 = vmatpush.bf16.xpose.msrb.mxu1 %v3089_v38 }
 0x6fd   : > { %3097 = vmatpush.bf16.xpose.msrb.mxu1 %v3088_v44 }
 0x705   : > { %3098 = vmatpush.bf16.xpose.msrb.mxu1 %v3087_v16 }
 0x70d   : > { %3099 = vmatpush.bf16.xpose.msrb.mxu1 %v3086_v54 }
 0x715   : > { %3100 = vmatpush.bf16.xpose.msrb.mxu1 %v3085_v20 }
 0x71d   : > { %3101 = vmatpush.bf16.xpose.msrb.mxu1 %v3084_v10 }
 0x725   : > { %3102 = vmatpush.bf16.xpose.msrb.mxu1 %v3083_v53 }
 0x72d   : > { %3103 = vmatpush.bf16.xpose.msrb.mxu1 %v3082_v26 }
 0x734   : > { %3104 = vmatmul.bf16.vlgmr.msrb.gmra.mxu1 %v3081_v62 }
 0x7b1   : > { %v3105_v17 = vpop.f32.mrf.mxu1 }
 0x7b2   : > { %v3106_v63 = vadd.f32 %v3105_v17, %v3094_v2 }
 0x7b4   : > { %3109 = vst [vmem:[%s5059_s22] sm:$0xff] %v3106_v63 }
 0x7b5   : > { %4560 = shalt.err (!%p4557_p9)
}
 0x7b6   : > { %3973 = dma.vmem_to_hbm [thread:$0]  (%p4957_p4), %s3124_s3, 128, %s3126_s20, %s3111_s5  }
 0x7b9   : > { %v3107_v3 = vpop.f32.mrf.mxu1 }
 0x7ba PF: > { %s5913_s0 = sld [smem:[#allocation45_spill]]  ;;  %s3137_s22 = sand.u32 1, %s4629_s29  }
 0x7bb   : > { %s3138_s7 = scalar_lea.sflag [#allocation10], %s3137_s22 }
 0x7c0   : > { %p5914_p8 = scmp.ge.s32.totalorder %s5913_s0, 2 }
 0x7c2   : > { %p4014_p5 = pnand %p5914_p8, %p4961_p6 }
 0x7c4   : > { %p4015_p10 = pneg %p4014_p5 }
 0x7c6   : > { %4624 = dma.done.wait (%p4015_p10), %s3138_s7, 128  }
 0x7c7   : > { %4626 = vsyncadd (%p4015_p10), %s3138_s7, 4294967168  ;;  %s5915_s17 = sld [smem:[#allocation46_spill]] }
 0x7c8   : > { %s5916_s29 = sld [smem:[#allocation43_spill]] }
 0x7c9   : > { %s5917_s11 = sld [smem:[#allocation44_spill]] }
 0x7ca   : > { %s5918_s0 = sld [smem:[#allocation47_spill]] }
 0x7cd   : > { %p56_p11 = scmp.ge.s32.totalorder %s5915_s17, 4  }
 0x7cf   :  { %58 = sbr.rel (!%p56_p11) target bundleno = 48 (0x30), region = 257 }
 0x7d4   :  { %3144 = vsyncpa [#allocation9], 1 }
 0x7d5   :  { %3146 = vsyncpa [#allocation9 + $0x1], 1 }
 0x7d6   :  { %3147 = vsyncpa [#allocation12], 1 }
 0x7d7   :  { %3149 = vsyncpa [#allocation12 + $0x1], 1 }
 0x7d8   :  { %3150 = vsyncpa [#allocation15], 1 }
 0x7d9   :  { %3151 = vsyncpa [#allocation18], 1 }
 0x7da   :  { %3152 = vsyncpa [#allocation21], 1 }
 0x7db   :  { %3153 = vsyncpa [#allocation24], 1 }
 0x7dc   :  { %3154 = vsyncpa [#allocation27], 1 }
 0x7dd   :  { %3155 = vsyncpa [#allocation10], 1 }
 0x7de   :  { %3157 = vsyncpa [#allocation10 + $0x1], 1 }
 0x7df   :  { %3158 = vsyncmov [#allocation4] }
 0x7e2   :  { %s3159_s2 = vpop.sfrf %3158 }
 0x7e3   :  { %p3743_p4 = scmp.ne.s32.totalorder %s3159_s2, 0 }
 0x7e5   :  { %3163 = shalt.err (%p3743_p4)  }
 0x7e6   :  { %3165 = vsyncmov [#allocation4 + $0x1] }
 0x7e9   :  { %s3166_s28 = vpop.sfrf %3165 }
 0x7ea   :  { %p3744_p6 = scmp.ne.s32.totalorder %s3166_s28, 0 }
 0x7ec   :  { %3170 = shalt.err (%p3744_p6)  }

</bundles_post_ra>
